<compile_context>
chip_gen: v6e
topology: v6e:2x2x1
jax: 0.10.0
libtpu: 0.0.40
codegen_flags: <defaults>
</compile_context>

<pallas_src>
import functools

import jax
import jax.numpy as jnp
import numpy as np
from jax import lax
from jax.experimental import pallas as pl
from jax.experimental.pallas import tpu as pltpu


def _round_up(x, m):
    return ((x + m - 1) // m) * m


# ----------------------------------------------------------------------------
# Tiled matmul + bias kernel (used for input projection and the dense layer)
# ----------------------------------------------------------------------------
def matmul_bias_kernel(x_ref, w_ref, b_ref, o_ref, acc_ref):
    """o = x @ w + b, tiled over (M, N, K) grid with f32 accumulator."""
    @pl.when(pl.program_id(2) == 0)
    def _():
        acc_ref[...] = jnp.zeros_like(acc_ref)

    acc_ref[...] += jnp.dot(x_ref[...], w_ref[...],
                            preferred_element_type=jnp.float32)

    @pl.when(pl.program_id(2) == pl.num_programs(2) - 1)
    def _():
        o_ref[...] = (acc_ref[...] + b_ref[...]).astype(o_ref.dtype)


def matmul_bias(x, w, b, *, tm=256, tn=256, tk=512):
    """x:[N,K] @ w:[K,V] + b:[1,V] -> [N,V] via a tiled Pallas kernel."""
    N, K = x.shape
    Kw, V = w.shape
    assert Kw == K
    tm = min(tm, _round_up(N, 8))
    tn = min(tn, _round_up(V, 128))
    tk = min(tk, _round_up(K, 128))
    Np, Vp, Kp = _round_up(N, tm), _round_up(V, tn), _round_up(K, tk)

    xp = jnp.pad(x, ((0, Np - N), (0, Kp - K)))
    wp = jnp.pad(w, ((0, Kp - K), (0, Vp - V)))
    bp = jnp.pad(b, ((0, 0), (0, Vp - V)))

    out = pl.pallas_call(
        matmul_bias_kernel,
        out_shape=jax.ShapeDtypeStruct((Np, Vp), jnp.float32),
        grid_spec=pltpu.PrefetchScalarGridSpec(
            num_scalar_prefetch=0,
            grid=(Np // tm, Vp // tn, Kp // tk),
            in_specs=[pl.BlockSpec((tm, tk), lambda i, j, k: (i, k)),
                      pl.BlockSpec((tk, tn), lambda i, j, k: (k, j)),
                      pl.BlockSpec((1, tn), lambda i, j, k: (0, j))],
            out_specs=pl.BlockSpec((tm, tn), lambda i, j, k: (i, j)),
            scratch_shapes=[pltpu.VMEM((tm, tn), jnp.float32)]),
        compiler_params=pltpu.CompilerParams(
            dimension_semantics=("parallel", "parallel", "arbitrary"),
            vmem_limit_bytes=32 * 1024 * 1024),
    )(xp, wp, bp)
    return out[:N, :V]


# ----------------------------------------------------------------------------
# Fused multi-layer LSTM kernel (all padded shapes: Bp % 8 == 0, Hp % 128 == 0)
# ----------------------------------------------------------------------------
def lstm_stack_kernel(gx0_ref, wih_ref, whh_ref, b_ref, h0_ref, c0_ref,
                      y_ref, hn_ref, cn_ref,
                      *, num_layers, seq_len, Bp, Hp):
    """gx0_ref: [T, Bp, 4Hp]  layer-0 input projection (bias already added)
       wih_ref: [max(L-1,1), Hp, 4Hp]  W_ih^T for layers 1..L-1
       whh_ref: [L, Hp, 4Hp]           W_hh^T per layer
       b_ref:   [max(L-1,1), 1, 4Hp]   b_ih+b_hh for layers 1..L-1
       h0/c0:   [L, Bp, Hp];  y: [T, Bp, Hp];  hn/cn: [L, Bp, Hp]"""

    def body(gates_ref):                      # VMEM scratch: [T, Bp, 4Hp]
        for l in range(num_layers):
            if l == 0:
                g_src = gx0_ref
            else:
                # Input projection for this layer, hoisted out of the time
                # loop: one [T*Bp, Hp] @ [Hp, 4Hp] MXU matmul on the previous
                # layer's VMEM-resident activations.
                x_flat = y_ref[...].reshape(seq_len * Bp, Hp)
                gates_ref[...] = (
                    jnp.dot(x_flat, wih_ref[l - 1],
                            preferred_element_type=jnp.float32)
                    + b_ref[l - 1]
                ).reshape(seq_len, Bp, 4 * Hp)
                g_src = gates_ref

            whh = whh_ref[l]                  # hoisted out of the step loop

            def step(t, carry, g_src=g_src, whh=whh):
                h, c = carry
                gates = g_src[t] + jnp.dot(
                    h, whh, preferred_element_type=jnp.float32)  # [Bp, 4Hp]
                # Lane-aligned gate slices (PyTorch order i, f, g, o).
                i = jax.nn.sigmoid(gates[:, 0 * Hp:1 * Hp])
                f = jax.nn.sigmoid(gates[:, 1 * Hp:2 * Hp])
                g = jnp.tanh(gates[:, 2 * Hp:3 * Hp])
                o = jax.nn.sigmoid(gates[:, 3 * Hp:4 * Hp])
                c_new = f * c + i * g
                h_new = o * jnp.tanh(c_new)
                y_ref[t] = h_new
                return (h_new, c_new)

            h_fin, c_fin = lax.fori_loop(0, seq_len, step,
                                         (h0_ref[l], c0_ref[l]),
                                         unroll=True)
            hn_ref[l] = h_fin
            cn_ref[l] = c_fin

    pl.run_scoped(body, pltpu.VMEM((seq_len, Bp, 4 * Hp), jnp.float32))


_VMEM = pl.BlockSpec(memory_space=pltpu.MemorySpace.VMEM)


def lstm_stack(gx0, wih_rest, whh, b_rest, h0, c0, *, num_layers):
    T, Bp, G = gx0.shape
    Hp = G // 4
    kernel = functools.partial(lstm_stack_kernel, num_layers=num_layers,
                               seq_len=T, Bp=Bp, Hp=Hp)
    return pl.pallas_call(
        kernel,
        out_shape=(jax.ShapeDtypeStruct((T, Bp, Hp), jnp.float32),
                   jax.ShapeDtypeStruct((num_layers, Bp, Hp), jnp.float32),
                   jax.ShapeDtypeStruct((num_layers, Bp, Hp), jnp.float32)),
        in_specs=[_VMEM] * 6,
        out_specs=(_VMEM, _VMEM, _VMEM),
        compiler_params=pltpu.CompilerParams(
            vmem_limit_bytes=32 * 1024 * 1024),
    )(gx0, wih_rest, whh, b_rest, h0, c0)


# ----------------------------------------------------------------------------
# Parameters: raw (PyTorch-shaped, transposed) + padded/packed kernel params
# ----------------------------------------------------------------------------
def init_params(key, num_tokens, embedding_dim, hidden_dim, num_layers):
    k = 1.0 / np.sqrt(hidden_dim)
    keys = jax.random.split(key, 3 + 4 * num_layers)
    params = {
        "embedding": jax.random.normal(
            keys[0], (num_tokens, embedding_dim), jnp.float32),
        "dense_w_t": jax.random.uniform(
            keys[1], (hidden_dim, num_tokens), jnp.float32, -k, k),
        "dense_b": jax.random.uniform(
            keys[2], (1, num_tokens), jnp.float32, -k, k),
        "lstm": [],
    }
    for l in range(num_layers):
        din = embedding_dim if l == 0 else hidden_dim
        kk = keys[3 + 4 * l: 3 + 4 * (l + 1)]
        wih_t = jax.random.uniform(kk[0], (din, 4 * hidden_dim),
                                   jnp.float32, -k, k)
        whh_t = jax.random.uniform(kk[1], (hidden_dim, 4 * hidden_dim),
                                   jnp.float32, -k, k)
        b_ih = jax.random.uniform(kk[2], (1, 4 * hidden_dim),
                                  jnp.float32, -k, k)
        b_hh = jax.random.uniform(kk[3], (1, 4 * hidden_dim),
                                  jnp.float32, -k, k)
        params["lstm"].append((wih_t, whh_t, b_ih + b_hh))
    return params


def _pad_gate_cols(w, H, Hp):
    """[..., 4H] (gate order i,f,g,o) -> [..., 4Hp], each gate block padded."""
    lead = w.shape[:-1]
    w4 = w.reshape(lead + (4, H))
    w4 = jnp.pad(w4, [(0, 0)] * (len(lead) + 1) + [(0, Hp - H)])
    return w4.reshape(lead + (4 * Hp,))


def pad_params(raw, embedding_dim, hidden_dim, num_tokens, num_layers):
    E, H, V, L = embedding_dim, hidden_dim, num_tokens, num_layers
    Ep, Hp, Vp = _round_up(E, 128), _round_up(H, 128), _round_up(V, 128)

    wih0_t, _, b0 = raw["lstm"][0]
    kp = {
        "embedding": jnp.pad(raw["embedding"], ((0, 0), (0, Ep - E))),
        "wih0": jnp.pad(_pad_gate_cols(wih0_t, H, Hp), ((0, Ep - E), (0, 0))),
        "b0": _pad_gate_cols(b0, H, Hp),
        "dense_w": jnp.pad(raw["dense_w_t"], ((0, Hp - H), (0, Vp - V))),
        "dense_b": jnp.pad(raw["dense_b"], ((0, 0), (0, Vp - V))),
    }
    whh_list, wih_rest, b_rest = [], [], []
    for l in range(L):
        wih_t, whh_t, b = raw["lstm"][l]
        whh_list.append(
            jnp.pad(_pad_gate_cols(whh_t, H, Hp), ((0, Hp - H), (0, 0))))
        if l > 0:
            wih_rest.append(
                jnp.pad(_pad_gate_cols(wih_t, H, Hp), ((0, Hp - H), (0, 0))))
            b_rest.append(_pad_gate_cols(b, H, Hp))
    kp["whh"] = jnp.stack(whh_list)
    kp["wih_rest"] = (jnp.stack(wih_rest) if L > 1
                      else jnp.zeros((1, Hp, 4 * Hp), jnp.float32))
    kp["b_rest"] = (jnp.stack(b_rest) if L > 1
                    else jnp.zeros((1, 1, 4 * Hp), jnp.float32))
    return kp


# ----------------------------------------------------------------------------
# Forward pass (matches LanguageModelRNN.forward)
# ----------------------------------------------------------------------------
def language_model_forward(kparams, inputs, hidden, *, hidden_dim, num_tokens,
                           num_layers):
    """inputs: int32 token ids [B, T]; hidden: (h0, c0) each [L, B, H].
    Returns (logits [B*T, num_tokens], (h_n, c_n) each [L, B, H])."""
    h0_all, c0_all = hidden
    B, T = inputs.shape
    H, V, L = hidden_dim, num_tokens, num_layers
    Hp = _round_up(H, 128)
    Bp = _round_up(B, 8)

    # Embedding lookup (gather) -- plain-JAX glue; table cols pre-padded.
    emb = jnp.take(kparams["embedding"], inputs, axis=0)        # [B, T, Ep]
    x = jnp.transpose(emb, (1, 0, 2))                           # [T, B, Ep]
    x = jnp.pad(x, ((0, 0), (0, Bp - B), (0, 0)))               # [T, Bp, Ep]
    Ep = x.shape[-1]

    # Layer-0 input projection hoisted out of the recurrence:
    # one tiled MXU matmul over all T*Bp rows (bias folded in).
    gx0 = matmul_bias(x.reshape(T * Bp, Ep), kparams["wih0"], kparams["b0"])
    gx0 = gx0.reshape(T, Bp, 4 * Hp)

    h0p = jnp.pad(h0_all, ((0, 0), (0, Bp - B), (0, Hp - H)))
    c0p = jnp.pad(c0_all, ((0, 0), (0, Bp - B), (0, Hp - H)))

    # Fused multi-layer LSTM: inter-layer activations never leave VMEM.
    y, hn, cn = lstm_stack(gx0, kparams["wih_rest"], kparams["whh"],
                           kparams["b_rest"], h0p, c0p, num_layers=L)

    out = jnp.transpose(y, (1, 0, 2))[:B].reshape(B * T, Hp)    # [B*T, Hp]
    logits = matmul_bias(out, kparams["dense_w"], kparams["dense_b"])[:, :V]
    return logits, (hn[:, :B, :H], cn[:, :B, :H])


# ----------------------------------------------------------------------------
# Pure-JAX reference (for correctness check)
# ----------------------------------------------------------------------------
def reference_forward(params, inputs, hidden):
    h0_all, c0_all = hidden
    B, T = inputs.shape
    emb = jnp.take(params["embedding"], inputs, axis=0)
    x = jnp.transpose(emb, (1, 0, 2))
    h_finals, c_finals = [], []
    for l, (wih_t, whh_t, b) in enumerate(params["lstm"]):
        H = whh_t.shape[0]
        h, c = h0_all[l], c0_all[l]
        ys = []
        for t in range(T):
            gates = x[t] @ wih_t + h @ whh_t + b
            i = jax.nn.sigmoid(gates[:, 0 * H:1 * H])
            f = jax.nn.sigmoid(gates[:, 1 * H:2 * H])
            g = jnp.tanh(gates[:, 2 * H:3 * H])
            o = jax.nn.sigmoid(gates[:, 3 * H:4 * H])
            c = f * c + i * g
            h = o * jnp.tanh(c)
            ys.append(h)
        x = jnp.stack(ys)
        h_finals.append(h)
        c_finals.append(c)
    out = jnp.transpose(x, (1, 0, 2)).reshape(B * T, -1)
    logits = out @ params["dense_w_t"] + params["dense_b"]
    return logits, (jnp.stack(h_finals), jnp.stack(c_finals))


# ----------------------------------------------------------------------------
if __name__ == "__main__":
    num_tokens = 64
    embedding_dim = 16
    hidden_dim = 32
    num_layers = 2
    batch = 2
    seq = 8

    key = jax.random.PRNGKey(0)
    pkey, ikey = jax.random.split(key)
    raw = init_params(pkey, num_tokens, embedding_dim, hidden_dim, num_layers)
    kparams = pad_params(raw, embedding_dim, hidden_dim, num_tokens,
                         num_layers)

    inputs = jax.random.randint(ikey, (batch, seq), 0, num_tokens,
                                dtype=jnp.int32)
    # init_states: all-zero hidden states, shape [num_layers, B, H].
    h0 = jnp.zeros((num_layers, batch, hidden_dim), jnp.float32)
    c0 = jnp.zeros((num_layers, batch, hidden_dim), jnp.float32)

    forward = jax.jit(functools.partial(language_model_forward,
                                        hidden_dim=hidden_dim,
                                        num_tokens=num_tokens,
                                        num_layers=num_layers))
    logits, (h_n, c_n) = forward(kparams, inputs, (h0, c0))
    jax.block_until_ready((logits, h_n, c_n))

    # sanity vs pure-JAX reference
    ref_logits, (ref_h, ref_c) = reference_forward(raw, inputs, (h0, c0))
    np.testing.assert_allclose(np.asarray(logits), np.asarray(ref_logits),
                               rtol=1e-4, atol=1e-4)
    np.testing.assert_allclose(np.asarray(h_n), np.asarray(ref_h),
                               rtol=1e-4, atol=1e-4)
    np.testing.assert_allclose(np.asarray(c_n), np.asarray(ref_c),
                               rtol=1e-4, atol=1e-4)

    assert logits.shape == (batch * seq, num_tokens)
    assert h_n.shape == (num_layers, batch, hidden_dim)
    assert c_n.shape == (num_layers, batch, hidden_dim)
    print("KERNEL_OK")
</pallas_src>

<mosaic_0001>
module attributes {stable_mosaic.version = 11 : i64} {
  func.func @lstm_stack_kernel(%arg0: memref<8x8x512xf32, #tpu.memory_space<vmem>>, %arg1: memref<1x128x512xf32, #tpu.memory_space<vmem>>, %arg2: memref<2x128x512xf32, #tpu.memory_space<vmem>>, %arg3: memref<1x1x512xf32, #tpu.memory_space<vmem>>, %arg4: memref<2x8x128xf32, #tpu.memory_space<vmem>>, %arg5: memref<2x8x128xf32, #tpu.memory_space<vmem>>, %arg6: memref<8x8x128xf32, #tpu.memory_space<vmem>>, %arg7: memref<2x8x128xf32, #tpu.memory_space<vmem>>, %arg8: memref<2x8x128xf32, #tpu.memory_space<vmem>>) attributes {dimension_semantics = [], scalar_prefetch = 0 : i64, scratch_operands = 0 : i64, tpu.core_type = #tpu.core_type<tc>} {
    "tpu.region"() ({
      %alloca = memref.alloca() : memref<8x8x512xf32, #tpu.memory_space<vmem>>
      %c0 = arith.constant 0 : index
      %c0_0 = arith.constant 0 : index
      %c0_1 = arith.constant 0 : index
      %0 = vector.load %arg2[%c0, %c0_0, %c0_1] : memref<2x128x512xf32, #tpu.memory_space<vmem>>, vector<1x128x512xf32>
      %1 = vector.shape_cast %0 : vector<1x128x512xf32> to vector<128x512xf32>
      %c0_2 = arith.constant 0 : index
      %c0_3 = arith.constant 0 : index
      %c0_4 = arith.constant 0 : index
      %2 = vector.load %arg4[%c0_2, %c0_3, %c0_4] : memref<2x8x128xf32, #tpu.memory_space<vmem>>, vector<1x8x128xf32>
      %3 = vector.shape_cast %2 : vector<1x8x128xf32> to vector<8x128xf32>
      %c0_5 = arith.constant 0 : index
      %c0_6 = arith.constant 0 : index
      %c0_7 = arith.constant 0 : index
      %4 = vector.load %arg5[%c0_5, %c0_6, %c0_7] : memref<2x8x128xf32, #tpu.memory_space<vmem>>, vector<1x8x128xf32>
      %5 = vector.shape_cast %4 : vector<1x8x128xf32> to vector<8x128xf32>
      %c0_i32 = arith.constant 0 : i32
      %6 = arith.index_cast %c0_i32 : i32 to index
      %c0_8 = arith.constant 0 : index
      %c0_9 = arith.constant 0 : index
      %7 = vector.load %arg0[%6, %c0_8, %c0_9] : memref<8x8x512xf32, #tpu.memory_space<vmem>>, vector<1x8x512xf32>
      %8 = vector.shape_cast %7 : vector<1x8x512xf32> to vector<8x512xf32>
      %cst = arith.constant dense<0.000000e+00> : vector<8x512xf32>
      %9 = tpu.matmul %3, %1, %cst {dimension_numbers = #tpu.dot_dimension_numbers<[1], [0], [0], [1], [0, 0, 1, 1], [], []>} : vector<8x128xf32>, vector<128x512xf32>, vector<8x512xf32> -> vector<8x512xf32>
      %10 = arith.addf %8, %9 : vector<8x512xf32>
      %11 = vector.extract_strided_slice %10 {offsets = [0, 0], sizes = [8, 128], strides = [1, 1]} : vector<8x512xf32> to vector<8x128xf32>
      %12 = arith.negf %11 : vector<8x128xf32>
      %13 = math.exp %12 : vector<8x128xf32>
      %cst_10 = arith.constant 1.000000e+00 : f32
      %14 = vector.broadcast %cst_10 : f32 to vector<8x128xf32>
      %15 = arith.addf %14, %13 : vector<8x128xf32>
      %16 = arith.divf %14, %15 : vector<8x128xf32>
      %17 = vector.extract_strided_slice %10 {offsets = [0, 128], sizes = [8, 128], strides = [1, 1]} : vector<8x512xf32> to vector<8x128xf32>
      %18 = arith.negf %17 : vector<8x128xf32>
      %19 = math.exp %18 : vector<8x128xf32>
      %cst_11 = arith.constant 1.000000e+00 : f32
      %20 = vector.broadcast %cst_11 : f32 to vector<8x128xf32>
      %21 = arith.addf %20, %19 : vector<8x128xf32>
      %22 = arith.divf %20, %21 : vector<8x128xf32>
      %23 = vector.extract_strided_slice %10 {offsets = [0, 256], sizes = [8, 128], strides = [1, 1]} : vector<8x512xf32> to vector<8x128xf32>
      %24 = math.tanh %23 : vector<8x128xf32>
      %25 = vector.extract_strided_slice %10 {offsets = [0, 384], sizes = [8, 128], strides = [1, 1]} : vector<8x512xf32> to vector<8x128xf32>
      %26 = arith.negf %25 : vector<8x128xf32>
      %27 = math.exp %26 : vector<8x128xf32>
      %cst_12 = arith.constant 1.000000e+00 : f32
      %28 = vector.broadcast %cst_12 : f32 to vector<8x128xf32>
      %29 = arith.addf %28, %27 : vector<8x128xf32>
      %30 = arith.divf %28, %29 : vector<8x128xf32>
      %31 = arith.mulf %22, %5 : vector<8x128xf32>
      %32 = arith.mulf %16, %24 : vector<8x128xf32>
      %33 = arith.addf %31, %32 : vector<8x128xf32>
      %34 = math.tanh %33 : vector<8x128xf32>
      %35 = arith.mulf %30, %34 : vector<8x128xf32>
      %36 = arith.index_cast %c0_i32 : i32 to index
      %c0_13 = arith.constant 0 : index
      %c0_14 = arith.constant 0 : index
      %37 = vector.load %arg6[%36, %c0_13, %c0_14] : memref<8x8x128xf32, #tpu.memory_space<vmem>>, vector<1x8x128xf32>
      %38 = vector.shape_cast %37 : vector<1x8x128xf32> to vector<8x128xf32>
      %39 = vector.shape_cast %35 : vector<8x128xf32> to vector<1x8x128xf32>
      tpu.vector_store %arg6[%36, %c0_13, %c0_14], %39 {strides = array<i32>} : memref<8x8x128xf32, #tpu.memory_space<vmem>>, vector<1x8x128xf32>,
      %c1_i32 = arith.constant 1 : i32
      %40 = arith.index_cast %c1_i32 : i32 to index
      %c0_15 = arith.constant 0 : index
      %c0_16 = arith.constant 0 : index
      %41 = vector.load %arg0[%40, %c0_15, %c0_16] : memref<8x8x512xf32, #tpu.memory_space<vmem>>, vector<1x8x512xf32>
      %42 = vector.shape_cast %41 : vector<1x8x512xf32> to vector<8x512xf32>
      %cst_17 = arith.constant dense<0.000000e+00> : vector<8x512xf32>
      %43 = tpu.matmul %35, %1, %cst_17 {dimension_numbers = #tpu.dot_dimension_numbers<[1], [0], [0], [1], [0, 0, 1, 1], [], []>} : vector<8x128xf32>, vector<128x512xf32>, vector<8x512xf32> -> vector<8x512xf32>
      %44 = arith.addf %42, %43 : vector<8x512xf32>
      %45 = vector.extract_strided_slice %44 {offsets = [0, 0], sizes = [8, 128], strides = [1, 1]} : vector<8x512xf32> to vector<8x128xf32>
      %46 = arith.negf %45 : vector<8x128xf32>
      %47 = math.exp %46 : vector<8x128xf32>
      %cst_18 = arith.constant 1.000000e+00 : f32
      %48 = vector.broadcast %cst_18 : f32 to vector<8x128xf32>
      %49 = arith.addf %48, %47 : vector<8x128xf32>
      %50 = arith.divf %48, %49 : vector<8x128xf32>
      %51 = vector.extract_strided_slice %44 {offsets = [0, 128], sizes = [8, 128], strides = [1, 1]} : vector<8x512xf32> to vector<8x128xf32>
      %52 = arith.negf %51 : vector<8x128xf32>
      %53 = math.exp %52 : vector<8x128xf32>
      %cst_19 = arith.constant 1.000000e+00 : f32
      %54 = vector.broadcast %cst_19 : f32 to vector<8x128xf32>
      %55 = arith.addf %54, %53 : vector<8x128xf32>
      %56 = arith.divf %54, %55 : vector<8x128xf32>
      %57 = vector.extract_strided_slice %44 {offsets = [0, 256], sizes = [8, 128], strides = [1, 1]} : vector<8x512xf32> to vector<8x128xf32>
      %58 = math.tanh %57 : vector<8x128xf32>
      %59 = vector.extract_strided_slice %44 {offsets = [0, 384], sizes = [8, 128], strides = [1, 1]} : vector<8x512xf32> to vector<8x128xf32>
      %60 = arith.negf %59 : vector<8x128xf32>
      %61 = math.exp %60 : vector<8x128xf32>
      %cst_20 = arith.constant 1.000000e+00 : f32
      %62 = vector.broadcast %cst_20 : f32 to vector<8x128xf32>
      %63 = arith.addf %62, %61 : vector<8x128xf32>
      %64 = arith.divf %62, %63 : vector<8x128xf32>
      %65 = arith.mulf %56, %33 : vector<8x128xf32>
      %66 = arith.mulf %50, %58 : vector<8x128xf32>
      %67 = arith.addf %65, %66 : vector<8x128xf32>
      %68 = math.tanh %67 : vector<8x128xf32>
      %69 = arith.mulf %64, %68 : vector<8x128xf32>
      %70 = arith.index_cast %c1_i32 : i32 to index
      %c0_21 = arith.constant 0 : index
      %c0_22 = arith.constant 0 : index
      %71 = vector.load %arg6[%70, %c0_21, %c0_22] : memref<8x8x128xf32, #tpu.memory_space<vmem>>, vector<1x8x128xf32>
      %72 = vector.shape_cast %71 : vector<1x8x128xf32> to vector<8x128xf32>
      %73 = vector.shape_cast %69 : vector<8x128xf32> to vector<1x8x128xf32>
      tpu.vector_store %arg6[%70, %c0_21, %c0_22], %73 {strides = array<i32>} : memref<8x8x128xf32, #tpu.memory_space<vmem>>, vector<1x8x128xf32>,
      %c2_i32 = arith.constant 2 : i32
      %74 = arith.index_cast %c2_i32 : i32 to index
      %c0_23 = arith.constant 0 : index
      %c0_24 = arith.constant 0 : index
      %75 = vector.load %arg0[%74, %c0_23, %c0_24] : memref<8x8x512xf32, #tpu.memory_space<vmem>>, vector<1x8x512xf32>
      %76 = vector.shape_cast %75 : vector<1x8x512xf32> to vector<8x512xf32>
      %cst_25 = arith.constant dense<0.000000e+00> : vector<8x512xf32>
      %77 = tpu.matmul %69, %1, %cst_25 {dimension_numbers = #tpu.dot_dimension_numbers<[1], [0], [0], [1], [0, 0, 1, 1], [], []>} : vector<8x128xf32>, vector<128x512xf32>, vector<8x512xf32> -> vector<8x512xf32>
      %78 = arith.addf %76, %77 : vector<8x512xf32>
      %79 = vector.extract_strided_slice %78 {offsets = [0, 0], sizes = [8, 128], strides = [1, 1]} : vector<8x512xf32> to vector<8x128xf32>
      %80 = arith.negf %79 : vector<8x128xf32>
      %81 = math.exp %80 : vector<8x128xf32>
      %cst_26 = arith.constant 1.000000e+00 : f32
      %82 = vector.broadcast %cst_26 : f32 to vector<8x128xf32>
      %83 = arith.addf %82, %81 : vector<8x128xf32>
      %84 = arith.divf %82, %83 : vector<8x128xf32>
      %85 = vector.extract_strided_slice %78 {offsets = [0, 128], sizes = [8, 128], strides = [1, 1]} : vector<8x512xf32> to vector<8x128xf32>
      %86 = arith.negf %85 : vector<8x128xf32>
      %87 = math.exp %86 : vector<8x128xf32>
      %cst_27 = arith.constant 1.000000e+00 : f32
      %88 = vector.broadcast %cst_27 : f32 to vector<8x128xf32>
      %89 = arith.addf %88, %87 : vector<8x128xf32>
      %90 = arith.divf %88, %89 : vector<8x128xf32>
      %91 = vector.extract_strided_slice %78 {offsets = [0, 256], sizes = [8, 128], strides = [1, 1]} : vector<8x512xf32> to vector<8x128xf32>
      %92 = math.tanh %91 : vector<8x128xf32>
      %93 = vector.extract_strided_slice %78 {offsets = [0, 384], sizes = [8, 128], strides = [1, 1]} : vector<8x512xf32> to vector<8x128xf32>
      %94 = arith.negf %93 : vector<8x128xf32>
      %95 = math.exp %94 : vector<8x128xf32>
      %cst_28 = arith.constant 1.000000e+00 : f32
      %96 = vector.broadcast %cst_28 : f32 to vector<8x128xf32>
      %97 = arith.addf %96, %95 : vector<8x128xf32>
      %98 = arith.divf %96, %97 : vector<8x128xf32>
      %99 = arith.mulf %90, %67 : vector<8x128xf32>
      %100 = arith.mulf %84, %92 : vector<8x128xf32>
      %101 = arith.addf %99, %100 : vector<8x128xf32>
      %102 = math.tanh %101 : vector<8x128xf32>
      %103 = arith.mulf %98, %102 : vector<8x128xf32>
      %104 = arith.index_cast %c2_i32 : i32 to index
      %c0_29 = arith.constant 0 : index
      %c0_30 = arith.constant 0 : index
      %105 = vector.load %arg6[%104, %c0_29, %c0_30] : memref<8x8x128xf32, #tpu.memory_space<vmem>>, vector<1x8x128xf32>
      %106 = vector.shape_cast %105 : vector<1x8x128xf32> to vector<8x128xf32>
      %107 = vector.shape_cast %103 : vector<8x128xf32> to vector<1x8x128xf32>
      tpu.vector_store %arg6[%104, %c0_29, %c0_30], %107 {strides = array<i32>} : memref<8x8x128xf32, #tpu.memory_space<vmem>>, vector<1x8x128xf32>,
      %c3_i32 = arith.constant 3 : i32
      %108 = arith.index_cast %c3_i32 : i32 to index
      %c0_31 = arith.constant 0 : index
      %c0_32 = arith.constant 0 : index
      %109 = vector.load %arg0[%108, %c0_31, %c0_32] : memref<8x8x512xf32, #tpu.memory_space<vmem>>, vector<1x8x512xf32>
      %110 = vector.shape_cast %109 : vector<1x8x512xf32> to vector<8x512xf32>
      %cst_33 = arith.constant dense<0.000000e+00> : vector<8x512xf32>
      %111 = tpu.matmul %103, %1, %cst_33 {dimension_numbers = #tpu.dot_dimension_numbers<[1], [0], [0], [1], [0, 0, 1, 1], [], []>} : vector<8x128xf32>, vector<128x512xf32>, vector<8x512xf32> -> vector<8x512xf32>
      %112 = arith.addf %110, %111 : vector<8x512xf32>
      %113 = vector.extract_strided_slice %112 {offsets = [0, 0], sizes = [8, 128], strides = [1, 1]} : vector<8x512xf32> to vector<8x128xf32>
      %114 = arith.negf %113 : vector<8x128xf32>
      %115 = math.exp %114 : vector<8x128xf32>
      %cst_34 = arith.constant 1.000000e+00 : f32
      %116 = vector.broadcast %cst_34 : f32 to vector<8x128xf32>
      %117 = arith.addf %116, %115 : vector<8x128xf32>
      %118 = arith.divf %116, %117 : vector<8x128xf32>
      %119 = vector.extract_strided_slice %112 {offsets = [0, 128], sizes = [8, 128], strides = [1, 1]} : vector<8x512xf32> to vector<8x128xf32>
      %120 = arith.negf %119 : vector<8x128xf32>
      %121 = math.exp %120 : vector<8x128xf32>
      %cst_35 = arith.constant 1.000000e+00 : f32
      %122 = vector.broadcast %cst_35 : f32 to vector<8x128xf32>
      %123 = arith.addf %122, %121 : vector<8x128xf32>
      %124 = arith.divf %122, %123 : vector<8x128xf32>
      %125 = vector.extract_strided_slice %112 {offsets = [0, 256], sizes = [8, 128], strides = [1, 1]} : vector<8x512xf32> to vector<8x128xf32>
      %126 = math.tanh %125 : vector<8x128xf32>
      %127 = vector.extract_strided_slice %112 {offsets = [0, 384], sizes = [8, 128], strides = [1, 1]} : vector<8x512xf32> to vector<8x128xf32>
      %128 = arith.negf %127 : vector<8x128xf32>
      %129 = math.exp %128 : vector<8x128xf32>
      %cst_36 = arith.constant 1.000000e+00 : f32
      %130 = vector.broadcast %cst_36 : f32 to vector<8x128xf32>
      %131 = arith.addf %130, %129 : vector<8x128xf32>
      %132 = arith.divf %130, %131 : vector<8x128xf32>
      %133 = arith.mulf %124, %101 : vector<8x128xf32>
      %134 = arith.mulf %118, %126 : vector<8x128xf32>
      %135 = arith.addf %133, %134 : vector<8x128xf32>
      %136 = math.tanh %135 : vector<8x128xf32>
      %137 = arith.mulf %132, %136 : vector<8x128xf32>
      %138 = arith.index_cast %c3_i32 : i32 to index
      %c0_37 = arith.constant 0 : index
      %c0_38 = arith.constant 0 : index
      %139 = vector.load %arg6[%138, %c0_37, %c0_38] : memref<8x8x128xf32, #tpu.memory_space<vmem>>, vector<1x8x128xf32>
      %140 = vector.shape_cast %139 : vector<1x8x128xf32> to vector<8x128xf32>
      %141 = vector.shape_cast %137 : vector<8x128xf32> to vector<1x8x128xf32>
      tpu.vector_store %arg6[%138, %c0_37, %c0_38], %141 {strides = array<i32>} : memref<8x8x128xf32, #tpu.memory_space<vmem>>, vector<1x8x128xf32>,
      %c4_i32 = arith.constant 4 : i32
      %142 = arith.index_cast %c4_i32 : i32 to index
      %c0_39 = arith.constant 0 : index
      %c0_40 = arith.constant 0 : index
      %143 = vector.load %arg0[%142, %c0_39, %c0_40] : memref<8x8x512xf32, #tpu.memory_space<vmem>>, vector<1x8x512xf32>
      %144 = vector.shape_cast %143 : vector<1x8x512xf32> to vector<8x512xf32>
      %cst_41 = arith.constant dense<0.000000e+00> : vector<8x512xf32>
      %145 = tpu.matmul %137, %1, %cst_41 {dimension_numbers = #tpu.dot_dimension_numbers<[1], [0], [0], [1], [0, 0, 1, 1], [], []>} : vector<8x128xf32>, vector<128x512xf32>, vector<8x512xf32> -> vector<8x512xf32>
      %146 = arith.addf %144, %145 : vector<8x512xf32>
      %147 = vector.extract_strided_slice %146 {offsets = [0, 0], sizes = [8, 128], strides = [1, 1]} : vector<8x512xf32> to vector<8x128xf32>
      %148 = arith.negf %147 : vector<8x128xf32>
      %149 = math.exp %148 : vector<8x128xf32>
      %cst_42 = arith.constant 1.000000e+00 : f32
      %150 = vector.broadcast %cst_42 : f32 to vector<8x128xf32>
      %151 = arith.addf %150, %149 : vector<8x128xf32>
      %152 = arith.divf %150, %151 : vector<8x128xf32>
      %153 = vector.extract_strided_slice %146 {offsets = [0, 128], sizes = [8, 128], strides = [1, 1]} : vector<8x512xf32> to vector<8x128xf32>
      %154 = arith.negf %153 : vector<8x128xf32>
      %155 = math.exp %154 : vector<8x128xf32>
      %cst_43 = arith.constant 1.000000e+00 : f32
      %156 = vector.broadcast %cst_43 : f32 to vector<8x128xf32>
      %157 = arith.addf %156, %155 : vector<8x128xf32>
      %158 = arith.divf %156, %157 : vector<8x128xf32>
      %159 = vector.extract_strided_slice %146 {offsets = [0, 256], sizes = [8, 128], strides = [1, 1]} : vector<8x512xf32> to vector<8x128xf32>
      %160 = math.tanh %159 : vector<8x128xf32>
      %161 = vector.extract_strided_slice %146 {offsets = [0, 384], sizes = [8, 128], strides = [1, 1]} : vector<8x512xf32> to vector<8x128xf32>
      %162 = arith.negf %161 : vector<8x128xf32>
      %163 = math.exp %162 : vector<8x128xf32>
      %cst_44 = arith.constant 1.000000e+00 : f32
      %164 = vector.broadcast %cst_44 : f32 to vector<8x128xf32>
      %165 = arith.addf %164, %163 : vector<8x128xf32>
      %166 = arith.divf %164, %165 : vector<8x128xf32>
      %167 = arith.mulf %158, %135 : vector<8x128xf32>
      %168 = arith.mulf %152, %160 : vector<8x128xf32>
      %169 = arith.addf %167, %168 : vector<8x128xf32>
      %170 = math.tanh %169 : vector<8x128xf32>
      %171 = arith.mulf %166, %170 : vector<8x128xf32>
      %172 = arith.index_cast %c4_i32 : i32 to index
      %c0_45 = arith.constant 0 : index
      %c0_46 = arith.constant 0 : index
      %173 = vector.load %arg6[%172, %c0_45, %c0_46] : memref<8x8x128xf32, #tpu.memory_space<vmem>>, vector<1x8x128xf32>
      %174 = vector.shape_cast %173 : vector<1x8x128xf32> to vector<8x128xf32>
      %175 = vector.shape_cast %171 : vector<8x128xf32> to vector<1x8x128xf32>
      tpu.vector_store %arg6[%172, %c0_45, %c0_46], %175 {strides = array<i32>} : memref<8x8x128xf32, #tpu.memory_space<vmem>>, vector<1x8x128xf32>,
      %c5_i32 = arith.constant 5 : i32
      %176 = arith.index_cast %c5_i32 : i32 to index
      %c0_47 = arith.constant 0 : index
      %c0_48 = arith.constant 0 : index
      %177 = vector.load %arg0[%176, %c0_47, %c0_48] : memref<8x8x512xf32, #tpu.memory_space<vmem>>, vector<1x8x512xf32>
      %178 = vector.shape_cast %177 : vector<1x8x512xf32> to vector<8x512xf32>
      %cst_49 = arith.constant dense<0.000000e+00> : vector<8x512xf32>
      %179 = tpu.matmul %171, %1, %cst_49 {dimension_numbers = #tpu.dot_dimension_numbers<[1], [0], [0], [1], [0, 0, 1, 1], [], []>} : vector<8x128xf32>, vector<128x512xf32>, vector<8x512xf32> -> vector<8x512xf32>
      %180 = arith.addf %178, %179 : vector<8x512xf32>
      %181 = vector.extract_strided_slice %180 {offsets = [0, 0], sizes = [8, 128], strides = [1, 1]} : vector<8x512xf32> to vector<8x128xf32>
      %182 = arith.negf %181 : vector<8x128xf32>
      %183 = math.exp %182 : vector<8x128xf32>
      %cst_50 = arith.constant 1.000000e+00 : f32
      %184 = vector.broadcast %cst_50 : f32 to vector<8x128xf32>
      %185 = arith.addf %184, %183 : vector<8x128xf32>
      %186 = arith.divf %184, %185 : vector<8x128xf32>
      %187 = vector.extract_strided_slice %180 {offsets = [0, 128], sizes = [8, 128], strides = [1, 1]} : vector<8x512xf32> to vector<8x128xf32>
      %188 = arith.negf %187 : vector<8x128xf32>
      %189 = math.exp %188 : vector<8x128xf32>
      %cst_51 = arith.constant 1.000000e+00 : f32
      %190 = vector.broadcast %cst_51 : f32 to vector<8x128xf32>
      %191 = arith.addf %190, %189 : vector<8x128xf32>
      %192 = arith.divf %190, %191 : vector<8x128xf32>
      %193 = vector.extract_strided_slice %180 {offsets = [0, 256], sizes = [8, 128], strides = [1, 1]} : vector<8x512xf32> to vector<8x128xf32>
      %194 = math.tanh %193 : vector<8x128xf32>
      %195 = vector.extract_strided_slice %180 {offsets = [0, 384], sizes = [8, 128], strides = [1, 1]} : vector<8x512xf32> to vector<8x128xf32>
      %196 = arith.negf %195 : vector<8x128xf32>
      %197 = math.exp %196 : vector<8x128xf32>
      %cst_52 = arith.constant 1.000000e+00 : f32
      %198 = vector.broadcast %cst_52 : f32 to vector<8x128xf32>
      %199 = arith.addf %198, %197 : vector<8x128xf32>
      %200 = arith.divf %198, %199 : vector<8x128xf32>
      %201 = arith.mulf %192, %169 : vector<8x128xf32>
      %202 = arith.mulf %186, %194 : vector<8x128xf32>
      %203 = arith.addf %201, %202 : vector<8x128xf32>
      %204 = math.tanh %203 : vector<8x128xf32>
      %205 = arith.mulf %200, %204 : vector<8x128xf32>
      %206 = arith.index_cast %c5_i32 : i32 to index
      %c0_53 = arith.constant 0 : index
      %c0_54 = arith.constant 0 : index
      %207 = vector.load %arg6[%206, %c0_53, %c0_54] : memref<8x8x128xf32, #tpu.memory_space<vmem>>, vector<1x8x128xf32>
      %208 = vector.shape_cast %207 : vector<1x8x128xf32> to vector<8x128xf32>
      %209 = vector.shape_cast %205 : vector<8x128xf32> to vector<1x8x128xf32>
      tpu.vector_store %arg6[%206, %c0_53, %c0_54], %209 {strides = array<i32>} : memref<8x8x128xf32, #tpu.memory_space<vmem>>, vector<1x8x128xf32>,
      %c6_i32 = arith.constant 6 : i32
      %210 = arith.index_cast %c6_i32 : i32 to index
      %c0_55 = arith.constant 0 : index
      %c0_56 = arith.constant 0 : index
      %211 = vector.load %arg0[%210, %c0_55, %c0_56] : memref<8x8x512xf32, #tpu.memory_space<vmem>>, vector<1x8x512xf32>
      %212 = vector.shape_cast %211 : vector<1x8x512xf32> to vector<8x512xf32>
      %cst_57 = arith.constant dense<0.000000e+00> : vector<8x512xf32>
      %213 = tpu.matmul %205, %1, %cst_57 {dimension_numbers = #tpu.dot_dimension_numbers<[1], [0], [0], [1], [0, 0, 1, 1], [], []>} : vector<8x128xf32>, vector<128x512xf32>, vector<8x512xf32> -> vector<8x512xf32>
      %214 = arith.addf %212, %213 : vector<8x512xf32>
      %215 = vector.extract_strided_slice %214 {offsets = [0, 0], sizes = [8, 128], strides = [1, 1]} : vector<8x512xf32> to vector<8x128xf32>
      %216 = arith.negf %215 : vector<8x128xf32>
      %217 = math.exp %216 : vector<8x128xf32>
      %cst_58 = arith.constant 1.000000e+00 : f32
      %218 = vector.broadcast %cst_58 : f32 to vector<8x128xf32>
      %219 = arith.addf %218, %217 : vector<8x128xf32>
      %220 = arith.divf %218, %219 : vector<8x128xf32>
      %221 = vector.extract_strided_slice %214 {offsets = [0, 128], sizes = [8, 128], strides = [1, 1]} : vector<8x512xf32> to vector<8x128xf32>
      %222 = arith.negf %221 : vector<8x128xf32>
      %223 = math.exp %222 : vector<8x128xf32>
      %cst_59 = arith.constant 1.000000e+00 : f32
      %224 = vector.broadcast %cst_59 : f32 to vector<8x128xf32>
      %225 = arith.addf %224, %223 : vector<8x128xf32>
      %226 = arith.divf %224, %225 : vector<8x128xf32>
      %227 = vector.extract_strided_slice %214 {offsets = [0, 256], sizes = [8, 128], strides = [1, 1]} : vector<8x512xf32> to vector<8x128xf32>
      %228 = math.tanh %227 : vector<8x128xf32>
      %229 = vector.extract_strided_slice %214 {offsets = [0, 384], sizes = [8, 128], strides = [1, 1]} : vector<8x512xf32> to vector<8x128xf32>
      %230 = arith.negf %229 : vector<8x128xf32>
      %231 = math.exp %230 : vector<8x128xf32>
      %cst_60 = arith.constant 1.000000e+00 : f32
      %232 = vector.broadcast %cst_60 : f32 to vector<8x128xf32>
      %233 = arith.addf %232, %231 : vector<8x128xf32>
      %234 = arith.divf %232, %233 : vector<8x128xf32>
      %235 = arith.mulf %226, %203 : vector<8x128xf32>
      %236 = arith.mulf %220, %228 : vector<8x128xf32>
      %237 = arith.addf %235, %236 : vector<8x128xf32>
      %238 = math.tanh %237 : vector<8x128xf32>
      %239 = arith.mulf %234, %238 : vector<8x128xf32>
      %240 = arith.index_cast %c6_i32 : i32 to index
      %c0_61 = arith.constant 0 : index
      %c0_62 = arith.constant 0 : index
      %241 = vector.load %arg6[%240, %c0_61, %c0_62] : memref<8x8x128xf32, #tpu.memory_space<vmem>>, vector<1x8x128xf32>
      %242 = vector.shape_cast %241 : vector<1x8x128xf32> to vector<8x128xf32>
      %243 = vector.shape_cast %239 : vector<8x128xf32> to vector<1x8x128xf32>
      tpu.vector_store %arg6[%240, %c0_61, %c0_62], %243 {strides = array<i32>} : memref<8x8x128xf32, #tpu.memory_space<vmem>>, vector<1x8x128xf32>,
      %c7_i32 = arith.constant 7 : i32
      %244 = arith.index_cast %c7_i32 : i32 to index
      %c0_63 = arith.constant 0 : index
      %c0_64 = arith.constant 0 : index
      %245 = vector.load %arg0[%244, %c0_63, %c0_64] : memref<8x8x512xf32, #tpu.memory_space<vmem>>, vector<1x8x512xf32>
      %246 = vector.shape_cast %245 : vector<1x8x512xf32> to vector<8x512xf32>
      %cst_65 = arith.constant dense<0.000000e+00> : vector<8x512xf32>
      %247 = tpu.matmul %239, %1, %cst_65 {dimension_numbers = #tpu.dot_dimension_numbers<[1], [0], [0], [1], [0, 0, 1, 1], [], []>} : vector<8x128xf32>, vector<128x512xf32>, vector<8x512xf32> -> vector<8x512xf32>
      %248 = arith.addf %246, %247 : vector<8x512xf32>
      %249 = vector.extract_strided_slice %248 {offsets = [0, 0], sizes = [8, 128], strides = [1, 1]} : vector<8x512xf32> to vector<8x128xf32>
      %250 = arith.negf %249 : vector<8x128xf32>
      %251 = math.exp %250 : vector<8x128xf32>
      %cst_66 = arith.constant 1.000000e+00 : f32
      %252 = vector.broadcast %cst_66 : f32 to vector<8x128xf32>
      %253 = arith.addf %252, %251 : vector<8x128xf32>
      %254 = arith.divf %252, %253 : vector<8x128xf32>
      %255 = vector.extract_strided_slice %248 {offsets = [0, 128], sizes = [8, 128], strides = [1, 1]} : vector<8x512xf32> to vector<8x128xf32>
      %256 = arith.negf %255 : vector<8x128xf32>
      %257 = math.exp %256 : vector<8x128xf32>
      %cst_67 = arith.constant 1.000000e+00 : f32
      %258 = vector.broadcast %cst_67 : f32 to vector<8x128xf32>
      %259 = arith.addf %258, %257 : vector<8x128xf32>
      %260 = arith.divf %258, %259 : vector<8x128xf32>
      %261 = vector.extract_strided_slice %248 {offsets = [0, 256], sizes = [8, 128], strides = [1, 1]} : vector<8x512xf32> to vector<8x128xf32>
      %262 = math.tanh %261 : vector<8x128xf32>
      %263 = vector.extract_strided_slice %248 {offsets = [0, 384], sizes = [8, 128], strides = [1, 1]} : vector<8x512xf32> to vector<8x128xf32>
      %264 = arith.negf %263 : vector<8x128xf32>
      %265 = math.exp %264 : vector<8x128xf32>
      %cst_68 = arith.constant 1.000000e+00 : f32
      %266 = vector.broadcast %cst_68 : f32 to vector<8x128xf32>
      %267 = arith.addf %266, %265 : vector<8x128xf32>
      %268 = arith.divf %266, %267 : vector<8x128xf32>
      %269 = arith.mulf %260, %237 : vector<8x128xf32>
      %270 = arith.mulf %254, %262 : vector<8x128xf32>
      %271 = arith.addf %269, %270 : vector<8x128xf32>
      %272 = math.tanh %271 : vector<8x128xf32>
      %273 = arith.mulf %268, %272 : vector<8x128xf32>
      %274 = arith.index_cast %c7_i32 : i32 to index
      %c0_69 = arith.constant 0 : index
      %c0_70 = arith.constant 0 : index
      %275 = vector.load %arg6[%274, %c0_69, %c0_70] : memref<8x8x128xf32, #tpu.memory_space<vmem>>, vector<1x8x128xf32>
      %276 = vector.shape_cast %275 : vector<1x8x128xf32> to vector<8x128xf32>
      %277 = vector.shape_cast %273 : vector<8x128xf32> to vector<1x8x128xf32>
      tpu.vector_store %arg6[%274, %c0_69, %c0_70], %277 {strides = array<i32>} : memref<8x8x128xf32, #tpu.memory_space<vmem>>, vector<1x8x128xf32>,
      %c8_i32 = arith.constant 8 : i32
      %c0_71 = arith.constant 0 : index
      %c0_72 = arith.constant 0 : index
      %c0_73 = arith.constant 0 : index
      %278 = vector.load %arg7[%c0_71, %c0_72, %c0_73] : memref<2x8x128xf32, #tpu.memory_space<vmem>>, vector<1x8x128xf32>
      %279 = vector.shape_cast %278 : vector<1x8x128xf32> to vector<8x128xf32>
      %280 = vector.shape_cast %273 : vector<8x128xf32> to vector<1x8x128xf32>
      tpu.vector_store %arg7[%c0_71, %c0_72, %c0_73], %280 {strides = array<i32>} : memref<2x8x128xf32, #tpu.memory_space<vmem>>, vector<1x8x128xf32>,
      %c0_74 = arith.constant 0 : index
      %c0_75 = arith.constant 0 : index
      %c0_76 = arith.constant 0 : index
      %281 = vector.load %arg8[%c0_74, %c0_75, %c0_76] : memref<2x8x128xf32, #tpu.memory_space<vmem>>, vector<1x8x128xf32>
      %282 = vector.shape_cast %281 : vector<1x8x128xf32> to vector<8x128xf32>
      %283 = vector.shape_cast %271 : vector<8x128xf32> to vector<1x8x128xf32>
      tpu.vector_store %arg8[%c0_74, %c0_75, %c0_76], %283 {strides = array<i32>} : memref<2x8x128xf32, #tpu.memory_space<vmem>>, vector<1x8x128xf32>,
      %c0_77 = arith.constant 0 : index
      %c0_78 = arith.constant 0 : index
      %c0_79 = arith.constant 0 : index
      %284 = vector.load %arg6[%c0_77, %c0_78, %c0_79] : memref<8x8x128xf32, #tpu.memory_space<vmem>>, vector<8x8x128xf32>
      %285 = vector.shape_cast %284 : vector<8x8x128xf32> to vector<64x128xf32>
      %c0_80 = arith.constant 0 : index
      %c0_81 = arith.constant 0 : index
      %c0_82 = arith.constant 0 : index
      %286 = vector.load %arg1[%c0_80, %c0_81, %c0_82] : memref<1x128x512xf32, #tpu.memory_space<vmem>>, vector<1x128x512xf32>
      %287 = vector.shape_cast %286 : vector<1x128x512xf32> to vector<128x512xf32>
      %cst_83 = arith.constant dense<0.000000e+00> : vector<64x512xf32>
      %288 = tpu.matmul %285, %287, %cst_83 {dimension_numbers = #tpu.dot_dimension_numbers<[1], [0], [0], [1], [0, 0, 1, 1], [], []>} : vector<64x128xf32>, vector<128x512xf32>, vector<64x512xf32> -> vector<64x512xf32>
      %c0_84 = arith.constant 0 : index
      %c0_85 = arith.constant 0 : index
      %c0_86 = arith.constant 0 : index
      %289 = vector.load %arg3[%c0_84, %c0_85, %c0_86] : memref<1x1x512xf32, #tpu.memory_space<vmem>>, vector<1x1x512xf32>
      %290 = vector.shape_cast %289 : vector<1x1x512xf32> to vector<1x512xf32>
      %291 = vector.broadcast %290 : vector<1x512xf32> to vector<64x512xf32>
      %292 = arith.addf %288, %291 : vector<64x512xf32>
      %293 = vector.shape_cast %292 : vector<64x512xf32> to vector<8x8x512xf32>
      %c0_87 = arith.constant 0 : index
      %c0_88 = arith.constant 0 : index
      %c0_89 = arith.constant 0 : index
      %294 = vector.load %alloca[%c0_87, %c0_88, %c0_89] : memref<8x8x512xf32, #tpu.memory_space<vmem>>, vector<8x8x512xf32>
      tpu.vector_store %alloca[%c0_87, %c0_88, %c0_89], %293 {strides = array<i32>} : memref<8x8x512xf32, #tpu.memory_space<vmem>>, vector<8x8x512xf32>,
      %c1 = arith.constant 1 : index
      %c0_90 = arith.constant 0 : index
      %c0_91 = arith.constant 0 : index
      %295 = vector.load %arg2[%c1, %c0_90, %c0_91] : memref<2x128x512xf32, #tpu.memory_space<vmem>>, vector<1x128x512xf32>
      %296 = vector.shape_cast %295 : vector<1x128x512xf32> to vector<128x512xf32>
      %c1_92 = arith.constant 1 : index
      %c0_93 = arith.constant 0 : index
      %c0_94 = arith.constant 0 : index
      %297 = vector.load %arg4[%c1_92, %c0_93, %c0_94] : memref<2x8x128xf32, #tpu.memory_space<vmem>>, vector<1x8x128xf32>
      %298 = vector.shape_cast %297 : vector<1x8x128xf32> to vector<8x128xf32>
      %c1_95 = arith.constant 1 : index
      %c0_96 = arith.constant 0 : index
      %c0_97 = arith.constant 0 : index
      %299 = vector.load %arg5[%c1_95, %c0_96, %c0_97] : memref<2x8x128xf32, #tpu.memory_space<vmem>>, vector<1x8x128xf32>
      %300 = vector.shape_cast %299 : vector<1x8x128xf32> to vector<8x128xf32>
      %c0_i32_98 = arith.constant 0 : i32
      %301 = arith.index_cast %c0_i32_98 : i32 to index
      %c0_99 = arith.constant 0 : index
      %c0_100 = arith.constant 0 : index
      %302 = vector.load %alloca[%301, %c0_99, %c0_100] : memref<8x8x512xf32, #tpu.memory_space<vmem>>, vector<1x8x512xf32>
      %303 = vector.shape_cast %302 : vector<1x8x512xf32> to vector<8x512xf32>
      %cst_101 = arith.constant dense<0.000000e+00> : vector<8x512xf32>
      %304 = tpu.matmul %298, %296, %cst_101 {dimension_numbers = #tpu.dot_dimension_numbers<[1], [0], [0], [1], [0, 0, 1, 1], [], []>} : vector<8x128xf32>, vector<128x512xf32>, vector<8x512xf32> -> vector<8x512xf32>
      %305 = arith.addf %303, %304 : vector<8x512xf32>
      %306 = vector.extract_strided_slice %305 {offsets = [0, 0], sizes = [8, 128], strides = [1, 1]} : vector<8x512xf32> to vector<8x128xf32>
      %307 = arith.negf %306 : vector<8x128xf32>
      %308 = math.exp %307 : vector<8x128xf32>
      %cst_102 = arith.constant 1.000000e+00 : f32
      %309 = vector.broadcast %cst_102 : f32 to vector<8x128xf32>
      %310 = arith.addf %309, %308 : vector<8x128xf32>
      %311 = arith.divf %309, %310 : vector<8x128xf32>
      %312 = vector.extract_strided_slice %305 {offsets = [0, 128], sizes = [8, 128], strides = [1, 1]} : vector<8x512xf32> to vector<8x128xf32>
      %313 = arith.negf %312 : vector<8x128xf32>
      %314 = math.exp %313 : vector<8x128xf32>
      %cst_103 = arith.constant 1.000000e+00 : f32
      %315 = vector.broadcast %cst_103 : f32 to vector<8x128xf32>
      %316 = arith.addf %315, %314 : vector<8x128xf32>
      %317 = arith.divf %315, %316 : vector<8x128xf32>
      %318 = vector.extract_strided_slice %305 {offsets = [0, 256], sizes = [8, 128], strides = [1, 1]} : vector<8x512xf32> to vector<8x128xf32>
      %319 = math.tanh %318 : vector<8x128xf32>
      %320 = vector.extract_strided_slice %305 {offsets = [0, 384], sizes = [8, 128], strides = [1, 1]} : vector<8x512xf32> to vector<8x128xf32>
      %321 = arith.negf %320 : vector<8x128xf32>
      %322 = math.exp %321 : vector<8x128xf32>
      %cst_104 = arith.constant 1.000000e+00 : f32
      %323 = vector.broadcast %cst_104 : f32 to vector<8x128xf32>
      %324 = arith.addf %323, %322 : vector<8x128xf32>
      %325 = arith.divf %323, %324 : vector<8x128xf32>
      %326 = arith.mulf %317, %300 : vector<8x128xf32>
      %327 = arith.mulf %311, %319 : vector<8x128xf32>
      %328 = arith.addf %326, %327 : vector<8x128xf32>
      %329 = math.tanh %328 : vector<8x128xf32>
      %330 = arith.mulf %325, %329 : vector<8x128xf32>
      %331 = arith.index_cast %c0_i32_98 : i32 to index
      %c0_105 = arith.constant 0 : index
      %c0_106 = arith.constant 0 : index
      %332 = vector.load %arg6[%331, %c0_105, %c0_106] : memref<8x8x128xf32, #tpu.memory_space<vmem>>, vector<1x8x128xf32>
      %333 = vector.shape_cast %332 : vector<1x8x128xf32> to vector<8x128xf32>
      %334 = vector.shape_cast %330 : vector<8x128xf32> to vector<1x8x128xf32>
      tpu.vector_store %arg6[%331, %c0_105, %c0_106], %334 {strides = array<i32>} : memref<8x8x128xf32, #tpu.memory_space<vmem>>, vector<1x8x128xf32>,
      %c1_i32_107 = arith.constant 1 : i32
      %335 = arith.index_cast %c1_i32_107 : i32 to index
      %c0_108 = arith.constant 0 : index
      %c0_109 = arith.constant 0 : index
      %336 = vector.load %alloca[%335, %c0_108, %c0_109] : memref<8x8x512xf32, #tpu.memory_space<vmem>>, vector<1x8x512xf32>
      %337 = vector.shape_cast %336 : vector<1x8x512xf32> to vector<8x512xf32>
      %cst_110 = arith.constant dense<0.000000e+00> : vector<8x512xf32>
      %338 = tpu.matmul %330, %296, %cst_110 {dimension_numbers = #tpu.dot_dimension_numbers<[1], [0], [0], [1], [0, 0, 1, 1], [], []>} : vector<8x128xf32>, vector<128x512xf32>, vector<8x512xf32> -> vector<8x512xf32>
      %339 = arith.addf %337, %338 : vector<8x512xf32>
      %340 = vector.extract_strided_slice %339 {offsets = [0, 0], sizes = [8, 128], strides = [1, 1]} : vector<8x512xf32> to vector<8x128xf32>
      %341 = arith.negf %340 : vector<8x128xf32>
      %342 = math.exp %341 : vector<8x128xf32>
      %cst_111 = arith.constant 1.000000e+00 : f32
      %343 = vector.broadcast %cst_111 : f32 to vector<8x128xf32>
      %344 = arith.addf %343, %342 : vector<8x128xf32>
      %345 = arith.divf %343, %344 : vector<8x128xf32>
      %346 = vector.extract_strided_slice %339 {offsets = [0, 128], sizes = [8, 128], strides = [1, 1]} : vector<8x512xf32> to vector<8x128xf32>
      %347 = arith.negf %346 : vector<8x128xf32>
      %348 = math.exp %347 : vector<8x128xf32>
      %cst_112 = arith.constant 1.000000e+00 : f32
      %349 = vector.broadcast %cst_112 : f32 to vector<8x128xf32>
      %350 = arith.addf %349, %348 : vector<8x128xf32>
      %351 = arith.divf %349, %350 : vector<8x128xf32>
      %352 = vector.extract_strided_slice %339 {offsets = [0, 256], sizes = [8, 128], strides = [1, 1]} : vector<8x512xf32> to vector<8x128xf32>
      %353 = math.tanh %352 : vector<8x128xf32>
      %354 = vector.extract_strided_slice %339 {offsets = [0, 384], sizes = [8, 128], strides = [1, 1]} : vector<8x512xf32> to vector<8x128xf32>
      %355 = arith.negf %354 : vector<8x128xf32>
      %356 = math.exp %355 : vector<8x128xf32>
      %cst_113 = arith.constant 1.000000e+00 : f32
      %357 = vector.broadcast %cst_113 : f32 to vector<8x128xf32>
      %358 = arith.addf %357, %356 : vector<8x128xf32>
      %359 = arith.divf %357, %358 : vector<8x128xf32>
      %360 = arith.mulf %351, %328 : vector<8x128xf32>
      %361 = arith.mulf %345, %353 : vector<8x128xf32>
      %362 = arith.addf %360, %361 : vector<8x128xf32>
      %363 = math.tanh %362 : vector<8x128xf32>
      %364 = arith.mulf %359, %363 : vector<8x128xf32>
      %365 = arith.index_cast %c1_i32_107 : i32 to index
      %c0_114 = arith.constant 0 : index
      %c0_115 = arith.constant 0 : index
      %366 = vector.load %arg6[%365, %c0_114, %c0_115] : memref<8x8x128xf32, #tpu.memory_space<vmem>>, vector<1x8x128xf32>
      %367 = vector.shape_cast %366 : vector<1x8x128xf32> to vector<8x128xf32>
      %368 = vector.shape_cast %364 : vector<8x128xf32> to vector<1x8x128xf32>
      tpu.vector_store %arg6[%365, %c0_114, %c0_115], %368 {strides = array<i32>} : memref<8x8x128xf32, #tpu.memory_space<vmem>>, vector<1x8x128xf32>,
      %c2_i32_116 = arith.constant 2 : i32
      %369 = arith.index_cast %c2_i32_116 : i32 to index
      %c0_117 = arith.constant 0 : index
      %c0_118 = arith.constant 0 : index
      %370 = vector.load %alloca[%369, %c0_117, %c0_118] : memref<8x8x512xf32, #tpu.memory_space<vmem>>, vector<1x8x512xf32>
      %371 = vector.shape_cast %370 : vector<1x8x512xf32> to vector<8x512xf32>
      %cst_119 = arith.constant dense<0.000000e+00> : vector<8x512xf32>
      %372 = tpu.matmul %364, %296, %cst_119 {dimension_numbers = #tpu.dot_dimension_numbers<[1], [0], [0], [1], [0, 0, 1, 1], [], []>} : vector<8x128xf32>, vector<128x512xf32>, vector<8x512xf32> -> vector<8x512xf32>
      %373 = arith.addf %371, %372 : vector<8x512xf32>
      %374 = vector.extract_strided_slice %373 {offsets = [0, 0], sizes = [8, 128], strides = [1, 1]} : vector<8x512xf32> to vector<8x128xf32>
      %375 = arith.negf %374 : vector<8x128xf32>
      %376 = math.exp %375 : vector<8x128xf32>
      %cst_120 = arith.constant 1.000000e+00 : f32
      %377 = vector.broadcast %cst_120 : f32 to vector<8x128xf32>
      %378 = arith.addf %377, %376 : vector<8x128xf32>
      %379 = arith.divf %377, %378 : vector<8x128xf32>
      %380 = vector.extract_strided_slice %373 {offsets = [0, 128], sizes = [8, 128], strides = [1, 1]} : vector<8x512xf32> to vector<8x128xf32>
      %381 = arith.negf %380 : vector<8x128xf32>
      %382 = math.exp %381 : vector<8x128xf32>
      %cst_121 = arith.constant 1.000000e+00 : f32
      %383 = vector.broadcast %cst_121 : f32 to vector<8x128xf32>
      %384 = arith.addf %383, %382 : vector<8x128xf32>
      %385 = arith.divf %383, %384 : vector<8x128xf32>
      %386 = vector.extract_strided_slice %373 {offsets = [0, 256], sizes = [8, 128], strides = [1, 1]} : vector<8x512xf32> to vector<8x128xf32>
      %387 = math.tanh %386 : vector<8x128xf32>
      %388 = vector.extract_strided_slice %373 {offsets = [0, 384], sizes = [8, 128], strides = [1, 1]} : vector<8x512xf32> to vector<8x128xf32>
      %389 = arith.negf %388 : vector<8x128xf32>
      %390 = math.exp %389 : vector<8x128xf32>
      %cst_122 = arith.constant 1.000000e+00 : f32
      %391 = vector.broadcast %cst_122 : f32 to vector<8x128xf32>
      %392 = arith.addf %391, %390 : vector<8x128xf32>
      %393 = arith.divf %391, %392 : vector<8x128xf32>
      %394 = arith.mulf %385, %362 : vector<8x128xf32>
      %395 = arith.mulf %379, %387 : vector<8x128xf32>
      %396 = arith.addf %394, %395 : vector<8x128xf32>
      %397 = math.tanh %396 : vector<8x128xf32>
      %398 = arith.mulf %393, %397 : vector<8x128xf32>
      %399 = arith.index_cast %c2_i32_116 : i32 to index
      %c0_123 = arith.constant 0 : index
      %c0_124 = arith.constant 0 : index
      %400 = vector.load %arg6[%399, %c0_123, %c0_124] : memref<8x8x128xf32, #tpu.memory_space<vmem>>, vector<1x8x128xf32>
      %401 = vector.shape_cast %400 : vector<1x8x128xf32> to vector<8x128xf32>
      %402 = vector.shape_cast %398 : vector<8x128xf32> to vector<1x8x128xf32>
      tpu.vector_store %arg6[%399, %c0_123, %c0_124], %402 {strides = array<i32>} : memref<8x8x128xf32, #tpu.memory_space<vmem>>, vector<1x8x128xf32>,
      %c3_i32_125 = arith.constant 3 : i32
      %403 = arith.index_cast %c3_i32_125 : i32 to index
      %c0_126 = arith.constant 0 : index
      %c0_127 = arith.constant 0 : index
      %404 = vector.load %alloca[%403, %c0_126, %c0_127] : memref<8x8x512xf32, #tpu.memory_space<vmem>>, vector<1x8x512xf32>
      %405 = vector.shape_cast %404 : vector<1x8x512xf32> to vector<8x512xf32>
      %cst_128 = arith.constant dense<0.000000e+00> : vector<8x512xf32>
      %406 = tpu.matmul %398, %296, %cst_128 {dimension_numbers = #tpu.dot_dimension_numbers<[1], [0], [0], [1], [0, 0, 1, 1], [], []>} : vector<8x128xf32>, vector<128x512xf32>, vector<8x512xf32> -> vector<8x512xf32>
      %407 = arith.addf %405, %406 : vector<8x512xf32>
      %408 = vector.extract_strided_slice %407 {offsets = [0, 0], sizes = [8, 128], strides = [1, 1]} : vector<8x512xf32> to vector<8x128xf32>
      %409 = arith.negf %408 : vector<8x128xf32>
      %410 = math.exp %409 : vector<8x128xf32>
      %cst_129 = arith.constant 1.000000e+00 : f32
      %411 = vector.broadcast %cst_129 : f32 to vector<8x128xf32>
      %412 = arith.addf %411, %410 : vector<8x128xf32>
      %413 = arith.divf %411, %412 : vector<8x128xf32>
      %414 = vector.extract_strided_slice %407 {offsets = [0, 128], sizes = [8, 128], strides = [1, 1]} : vector<8x512xf32> to vector<8x128xf32>
      %415 = arith.negf %414 : vector<8x128xf32>
      %416 = math.exp %415 : vector<8x128xf32>
      %cst_130 = arith.constant 1.000000e+00 : f32
      %417 = vector.broadcast %cst_130 : f32 to vector<8x128xf32>
      %418 = arith.addf %417, %416 : vector<8x128xf32>
      %419 = arith.divf %417, %418 : vector<8x128xf32>
      %420 = vector.extract_strided_slice %407 {offsets = [0, 256], sizes = [8, 128], strides = [1, 1]} : vector<8x512xf32> to vector<8x128xf32>
      %421 = math.tanh %420 : vector<8x128xf32>
      %422 = vector.extract_strided_slice %407 {offsets = [0, 384], sizes = [8, 128], strides = [1, 1]} : vector<8x512xf32> to vector<8x128xf32>
      %423 = arith.negf %422 : vector<8x128xf32>
      %424 = math.exp %423 : vector<8x128xf32>
      %cst_131 = arith.constant 1.000000e+00 : f32
      %425 = vector.broadcast %cst_131 : f32 to vector<8x128xf32>
      %426 = arith.addf %425, %424 : vector<8x128xf32>
      %427 = arith.divf %425, %426 : vector<8x128xf32>
      %428 = arith.mulf %419, %396 : vector<8x128xf32>
      %429 = arith.mulf %413, %421 : vector<8x128xf32>
      %430 = arith.addf %428, %429 : vector<8x128xf32>
      %431 = math.tanh %430 : vector<8x128xf32>
      %432 = arith.mulf %427, %431 : vector<8x128xf32>
      %433 = arith.index_cast %c3_i32_125 : i32 to index
      %c0_132 = arith.constant 0 : index
      %c0_133 = arith.constant 0 : index
      %434 = vector.load %arg6[%433, %c0_132, %c0_133] : memref<8x8x128xf32, #tpu.memory_space<vmem>>, vector<1x8x128xf32>
      %435 = vector.shape_cast %434 : vector<1x8x128xf32> to vector<8x128xf32>
      %436 = vector.shape_cast %432 : vector<8x128xf32> to vector<1x8x128xf32>
      tpu.vector_store %arg6[%433, %c0_132, %c0_133], %436 {strides = array<i32>} : memref<8x8x128xf32, #tpu.memory_space<vmem>>, vector<1x8x128xf32>,
      %c4_i32_134 = arith.constant 4 : i32
      %437 = arith.index_cast %c4_i32_134 : i32 to index
      %c0_135 = arith.constant 0 : index
      %c0_136 = arith.constant 0 : index
      %438 = vector.load %alloca[%437, %c0_135, %c0_136] : memref<8x8x512xf32, #tpu.memory_space<vmem>>, vector<1x8x512xf32>
      %439 = vector.shape_cast %438 : vector<1x8x512xf32> to vector<8x512xf32>
      %cst_137 = arith.constant dense<0.000000e+00> : vector<8x512xf32>
      %440 = tpu.matmul %432, %296, %cst_137 {dimension_numbers = #tpu.dot_dimension_numbers<[1], [0], [0], [1], [0, 0, 1, 1], [], []>} : vector<8x128xf32>, vector<128x512xf32>, vector<8x512xf32> -> vector<8x512xf32>
      %441 = arith.addf %439, %440 : vector<8x512xf32>
      %442 = vector.extract_strided_slice %441 {offsets = [0, 0], sizes = [8, 128], strides = [1, 1]} : vector<8x512xf32> to vector<8x128xf32>
      %443 = arith.negf %442 : vector<8x128xf32>
      %444 = math.exp %443 : vector<8x128xf32>
      %cst_138 = arith.constant 1.000000e+00 : f32
      %445 = vector.broadcast %cst_138 : f32 to vector<8x128xf32>
      %446 = arith.addf %445, %444 : vector<8x128xf32>
      %447 = arith.divf %445, %446 : vector<8x128xf32>
      %448 = vector.extract_strided_slice %441 {offsets = [0, 128], sizes = [8, 128], strides = [1, 1]} : vector<8x512xf32> to vector<8x128xf32>
      %449 = arith.negf %448 : vector<8x128xf32>
      %450 = math.exp %449 : vector<8x128xf32>
      %cst_139 = arith.constant 1.000000e+00 : f32
      %451 = vector.broadcast %cst_139 : f32 to vector<8x128xf32>
      %452 = arith.addf %451, %450 : vector<8x128xf32>
      %453 = arith.divf %451, %452 : vector<8x128xf32>
      %454 = vector.extract_strided_slice %441 {offsets = [0, 256], sizes = [8, 128], strides = [1, 1]} : vector<8x512xf32> to vector<8x128xf32>
      %455 = math.tanh %454 : vector<8x128xf32>
      %456 = vector.extract_strided_slice %441 {offsets = [0, 384], sizes = [8, 128], strides = [1, 1]} : vector<8x512xf32> to vector<8x128xf32>
      %457 = arith.negf %456 : vector<8x128xf32>
      %458 = math.exp %457 : vector<8x128xf32>
      %cst_140 = arith.constant 1.000000e+00 : f32
      %459 = vector.broadcast %cst_140 : f32 to vector<8x128xf32>
      %460 = arith.addf %459, %458 : vector<8x128xf32>
      %461 = arith.divf %459, %460 : vector<8x128xf32>
      %462 = arith.mulf %453, %430 : vector<8x128xf32>
      %463 = arith.mulf %447, %455 : vector<8x128xf32>
      %464 = arith.addf %462, %463 : vector<8x128xf32>
      %465 = math.tanh %464 : vector<8x128xf32>
      %466 = arith.mulf %461, %465 : vector<8x128xf32>
      %467 = arith.index_cast %c4_i32_134 : i32 to index
      %c0_141 = arith.constant 0 : index
      %c0_142 = arith.constant 0 : index
      %468 = vector.load %arg6[%467, %c0_141, %c0_142] : memref<8x8x128xf32, #tpu.memory_space<vmem>>, vector<1x8x128xf32>
      %469 = vector.shape_cast %468 : vector<1x8x128xf32> to vector<8x128xf32>
      %470 = vector.shape_cast %466 : vector<8x128xf32> to vector<1x8x128xf32>
      tpu.vector_store %arg6[%467, %c0_141, %c0_142], %470 {strides = array<i32>} : memref<8x8x128xf32, #tpu.memory_space<vmem>>, vector<1x8x128xf32>,
      %c5_i32_143 = arith.constant 5 : i32
      %471 = arith.index_cast %c5_i32_143 : i32 to index
      %c0_144 = arith.constant 0 : index
      %c0_145 = arith.constant 0 : index
      %472 = vector.load %alloca[%471, %c0_144, %c0_145] : memref<8x8x512xf32, #tpu.memory_space<vmem>>, vector<1x8x512xf32>
      %473 = vector.shape_cast %472 : vector<1x8x512xf32> to vector<8x512xf32>
      %cst_146 = arith.constant dense<0.000000e+00> : vector<8x512xf32>
      %474 = tpu.matmul %466, %296, %cst_146 {dimension_numbers = #tpu.dot_dimension_numbers<[1], [0], [0], [1], [0, 0, 1, 1], [], []>} : vector<8x128xf32>, vector<128x512xf32>, vector<8x512xf32> -> vector<8x512xf32>
      %475 = arith.addf %473, %474 : vector<8x512xf32>
      %476 = vector.extract_strided_slice %475 {offsets = [0, 0], sizes = [8, 128], strides = [1, 1]} : vector<8x512xf32> to vector<8x128xf32>
      %477 = arith.negf %476 : vector<8x128xf32>
      %478 = math.exp %477 : vector<8x128xf32>
      %cst_147 = arith.constant 1.000000e+00 : f32
      %479 = vector.broadcast %cst_147 : f32 to vector<8x128xf32>
      %480 = arith.addf %479, %478 : vector<8x128xf32>
      %481 = arith.divf %479, %480 : vector<8x128xf32>
      %482 = vector.extract_strided_slice %475 {offsets = [0, 128], sizes = [8, 128], strides = [1, 1]} : vector<8x512xf32> to vector<8x128xf32>
      %483 = arith.negf %482 : vector<8x128xf32>
      %484 = math.exp %483 : vector<8x128xf32>
      %cst_148 = arith.constant 1.000000e+00 : f32
      %485 = vector.broadcast %cst_148 : f32 to vector<8x128xf32>
      %486 = arith.addf %485, %484 : vector<8x128xf32>
      %487 = arith.divf %485, %486 : vector<8x128xf32>
      %488 = vector.extract_strided_slice %475 {offsets = [0, 256], sizes = [8, 128], strides = [1, 1]} : vector<8x512xf32> to vector<8x128xf32>
      %489 = math.tanh %488 : vector<8x128xf32>
      %490 = vector.extract_strided_slice %475 {offsets = [0, 384], sizes = [8, 128], strides = [1, 1]} : vector<8x512xf32> to vector<8x128xf32>
      %491 = arith.negf %490 : vector<8x128xf32>
      %492 = math.exp %491 : vector<8x128xf32>
      %cst_149 = arith.constant 1.000000e+00 : f32
      %493 = vector.broadcast %cst_149 : f32 to vector<8x128xf32>
      %494 = arith.addf %493, %492 : vector<8x128xf32>
      %495 = arith.divf %493, %494 : vector<8x128xf32>
      %496 = arith.mulf %487, %464 : vector<8x128xf32>
      %497 = arith.mulf %481, %489 : vector<8x128xf32>
      %498 = arith.addf %496, %497 : vector<8x128xf32>
      %499 = math.tanh %498 : vector<8x128xf32>
      %500 = arith.mulf %495, %499 : vector<8x128xf32>
      %501 = arith.index_cast %c5_i32_143 : i32 to index
      %c0_150 = arith.constant 0 : index
      %c0_151 = arith.constant 0 : index
      %502 = vector.load %arg6[%501, %c0_150, %c0_151] : memref<8x8x128xf32, #tpu.memory_space<vmem>>, vector<1x8x128xf32>
      %503 = vector.shape_cast %502 : vector<1x8x128xf32> to vector<8x128xf32>
      %504 = vector.shape_cast %500 : vector<8x128xf32> to vector<1x8x128xf32>
      tpu.vector_store %arg6[%501, %c0_150, %c0_151], %504 {strides = array<i32>} : memref<8x8x128xf32, #tpu.memory_space<vmem>>, vector<1x8x128xf32>,
      %c6_i32_152 = arith.constant 6 : i32
      %505 = arith.index_cast %c6_i32_152 : i32 to index
      %c0_153 = arith.constant 0 : index
      %c0_154 = arith.constant 0 : index
      %506 = vector.load %alloca[%505, %c0_153, %c0_154] : memref<8x8x512xf32, #tpu.memory_space<vmem>>, vector<1x8x512xf32>
      %507 = vector.shape_cast %506 : vector<1x8x512xf32> to vector<8x512xf32>
      %cst_155 = arith.constant dense<0.000000e+00> : vector<8x512xf32>
      %508 = tpu.matmul %500, %296, %cst_155 {dimension_numbers = #tpu.dot_dimension_numbers<[1], [0], [0], [1], [0, 0, 1, 1], [], []>} : vector<8x128xf32>, vector<128x512xf32>, vector<8x512xf32> -> vector<8x512xf32>
      %509 = arith.addf %507, %508 : vector<8x512xf32>
      %510 = vector.extract_strided_slice %509 {offsets = [0, 0], sizes = [8, 128], strides = [1, 1]} : vector<8x512xf32> to vector<8x128xf32>
      %511 = arith.negf %510 : vector<8x128xf32>
      %512 = math.exp %511 : vector<8x128xf32>
      %cst_156 = arith.constant 1.000000e+00 : f32
      %513 = vector.broadcast %cst_156 : f32 to vector<8x128xf32>
      %514 = arith.addf %513, %512 : vector<8x128xf32>
      %515 = arith.divf %513, %514 : vector<8x128xf32>
      %516 = vector.extract_strided_slice %509 {offsets = [0, 128], sizes = [8, 128], strides = [1, 1]} : vector<8x512xf32> to vector<8x128xf32>
      %517 = arith.negf %516 : vector<8x128xf32>
      %518 = math.exp %517 : vector<8x128xf32>
      %cst_157 = arith.constant 1.000000e+00 : f32
      %519 = vector.broadcast %cst_157 : f32 to vector<8x128xf32>
      %520 = arith.addf %519, %518 : vector<8x128xf32>
      %521 = arith.divf %519, %520 : vector<8x128xf32>
      %522 = vector.extract_strided_slice %509 {offsets = [0, 256], sizes = [8, 128], strides = [1, 1]} : vector<8x512xf32> to vector<8x128xf32>
      %523 = math.tanh %522 : vector<8x128xf32>
      %524 = vector.extract_strided_slice %509 {offsets = [0, 384], sizes = [8, 128], strides = [1, 1]} : vector<8x512xf32> to vector<8x128xf32>
      %525 = arith.negf %524 : vector<8x128xf32>
      %526 = math.exp %525 : vector<8x128xf32>
      %cst_158 = arith.constant 1.000000e+00 : f32
      %527 = vector.broadcast %cst_158 : f32 to vector<8x128xf32>
      %528 = arith.addf %527, %526 : vector<8x128xf32>
      %529 = arith.divf %527, %528 : vector<8x128xf32>
      %530 = arith.mulf %521, %498 : vector<8x128xf32>
      %531 = arith.mulf %515, %523 : vector<8x128xf32>
      %532 = arith.addf %530, %531 : vector<8x128xf32>
      %533 = math.tanh %532 : vector<8x128xf32>
      %534 = arith.mulf %529, %533 : vector<8x128xf32>
      %535 = arith.index_cast %c6_i32_152 : i32 to index
      %c0_159 = arith.constant 0 : index
      %c0_160 = arith.constant 0 : index
      %536 = vector.load %arg6[%535, %c0_159, %c0_160] : memref<8x8x128xf32, #tpu.memory_space<vmem>>, vector<1x8x128xf32>
      %537 = vector.shape_cast %536 : vector<1x8x128xf32> to vector<8x128xf32>
      %538 = vector.shape_cast %534 : vector<8x128xf32> to vector<1x8x128xf32>
      tpu.vector_store %arg6[%535, %c0_159, %c0_160], %538 {strides = array<i32>} : memref<8x8x128xf32, #tpu.memory_space<vmem>>, vector<1x8x128xf32>,
      %c7_i32_161 = arith.constant 7 : i32
      %539 = arith.index_cast %c7_i32_161 : i32 to index
      %c0_162 = arith.constant 0 : index
      %c0_163 = arith.constant 0 : index
      %540 = vector.load %alloca[%539, %c0_162, %c0_163] : memref<8x8x512xf32, #tpu.memory_space<vmem>>, vector<1x8x512xf32>
      %541 = vector.shape_cast %540 : vector<1x8x512xf32> to vector<8x512xf32>
      %cst_164 = arith.constant dense<0.000000e+00> : vector<8x512xf32>
      %542 = tpu.matmul %534, %296, %cst_164 {dimension_numbers = #tpu.dot_dimension_numbers<[1], [0], [0], [1], [0, 0, 1, 1], [], []>} : vector<8x128xf32>, vector<128x512xf32>, vector<8x512xf32> -> vector<8x512xf32>
      %543 = arith.addf %541, %542 : vector<8x512xf32>
      %544 = vector.extract_strided_slice %543 {offsets = [0, 0], sizes = [8, 128], strides = [1, 1]} : vector<8x512xf32> to vector<8x128xf32>
      %545 = arith.negf %544 : vector<8x128xf32>
      %546 = math.exp %545 : vector<8x128xf32>
      %cst_165 = arith.constant 1.000000e+00 : f32
      %547 = vector.broadcast %cst_165 : f32 to vector<8x128xf32>
      %548 = arith.addf %547, %546 : vector<8x128xf32>
      %549 = arith.divf %547, %548 : vector<8x128xf32>
      %550 = vector.extract_strided_slice %543 {offsets = [0, 128], sizes = [8, 128], strides = [1, 1]} : vector<8x512xf32> to vector<8x128xf32>
      %551 = arith.negf %550 : vector<8x128xf32>
      %552 = math.exp %551 : vector<8x128xf32>
      %cst_166 = arith.constant 1.000000e+00 : f32
      %553 = vector.broadcast %cst_166 : f32 to vector<8x128xf32>
      %554 = arith.addf %553, %552 : vector<8x128xf32>
      %555 = arith.divf %553, %554 : vector<8x128xf32>
      %556 = vector.extract_strided_slice %543 {offsets = [0, 256], sizes = [8, 128], strides = [1, 1]} : vector<8x512xf32> to vector<8x128xf32>
      %557 = math.tanh %556 : vector<8x128xf32>
      %558 = vector.extract_strided_slice %543 {offsets = [0, 384], sizes = [8, 128], strides = [1, 1]} : vector<8x512xf32> to vector<8x128xf32>
      %559 = arith.negf %558 : vector<8x128xf32>
      %560 = math.exp %559 : vector<8x128xf32>
      %cst_167 = arith.constant 1.000000e+00 : f32
      %561 = vector.broadcast %cst_167 : f32 to vector<8x128xf32>
      %562 = arith.addf %561, %560 : vector<8x128xf32>
      %563 = arith.divf %561, %562 : vector<8x128xf32>
      %564 = arith.mulf %555, %532 : vector<8x128xf32>
      %565 = arith.mulf %549, %557 : vector<8x128xf32>
      %566 = arith.addf %564, %565 : vector<8x128xf32>
      %567 = math.tanh %566 : vector<8x128xf32>
      %568 = arith.mulf %563, %567 : vector<8x128xf32>
      %569 = arith.index_cast %c7_i32_161 : i32 to index
      %c0_168 = arith.constant 0 : index
      %c0_169 = arith.constant 0 : index
      %570 = vector.load %arg6[%569, %c0_168, %c0_169] : memref<8x8x128xf32, #tpu.memory_space<vmem>>, vector<1x8x128xf32>
      %571 = vector.shape_cast %570 : vector<1x8x128xf32> to vector<8x128xf32>
      %572 = vector.shape_cast %568 : vector<8x128xf32> to vector<1x8x128xf32>
      tpu.vector_store %arg6[%569, %c0_168, %c0_169], %572 {strides = array<i32>} : memref<8x8x128xf32, #tpu.memory_space<vmem>>, vector<1x8x128xf32>,
      %c8_i32_170 = arith.constant 8 : i32
      %c1_171 = arith.constant 1 : index
      %c0_172 = arith.constant 0 : index
      %c0_173 = arith.constant 0 : index
      %573 = vector.load %arg7[%c1_171, %c0_172, %c0_173] : memref<2x8x128xf32, #tpu.memory_space<vmem>>, vector<1x8x128xf32>
      %574 = vector.shape_cast %573 : vector<1x8x128xf32> to vector<8x128xf32>
      %575 = vector.shape_cast %568 : vector<8x128xf32> to vector<1x8x128xf32>
      tpu.vector_store %arg7[%c1_171, %c0_172, %c0_173], %575 {strides = array<i32>} : memref<2x8x128xf32, #tpu.memory_space<vmem>>, vector<1x8x128xf32>,
      %c1_174 = arith.constant 1 : index
      %c0_175 = arith.constant 0 : index
      %c0_176 = arith.constant 0 : index
      %576 = vector.load %arg8[%c1_174, %c0_175, %c0_176] : memref<2x8x128xf32, #tpu.memory_space<vmem>>, vector<1x8x128xf32>
      %577 = vector.shape_cast %576 : vector<1x8x128xf32> to vector<8x128xf32>
      %578 = vector.shape_cast %566 : vector<8x128xf32> to vector<1x8x128xf32>
      tpu.vector_store %arg8[%c1_174, %c0_175, %c0_176], %578 {strides = array<i32>} : memref<2x8x128xf32, #tpu.memory_space<vmem>>, vector<1x8x128xf32>,
      tpu.yield
    }) : () -> ()
    return
  }
}

module attributes {stable_mosaic.version = 11 : i64} {
  func.func @matmul_bias_kernel(%arg0: i32, %arg1: i32, %arg2: i32, %arg3: memref<64x128xf32, #tpu.memory_space<vmem>>, %arg4: memref<128x256xf32, #tpu.memory_space<vmem>>, %arg5: memref<1x256xf32, #tpu.memory_space<vmem>>, %arg6: memref<64x256xf32, #tpu.memory_space<vmem>>, %arg7: memref<64x256xf32, #tpu.memory_space<vmem>>) attributes {dimension_semantics = [#tpu.dimension_semantics<parallel>, #tpu.dimension_semantics<parallel>, #tpu.dimension_semantics<arbitrary>], iteration_bounds = array<i64: 1, 2, 1>, scalar_prefetch = 0 : i64, scratch_operands = 1 : i64, tpu.core_type = #tpu.core_type<tc>, window_params = [{transform_indices = @transform_0, window_bounds = array<i64: 64, 128>}, {transform_indices = @transform_1, window_bounds = array<i64: 128, 256>}, {transform_indices = @transform_2, window_bounds = array<i64: 1, 256>}, {transform_indices = @transform_3, window_bounds = array<i64: 64, 256>}]} {
    %c0_i32 = arith.constant 0 : i32
    %0 = arith.cmpi eq, %arg2, %c0_i32 : i32
    %1 = arith.extui %0 : i1 to i32
    %c0_i32_0 = arith.constant 0 : i32
    %2 = arith.cmpi ne, %1, %c0_i32_0 : i32
    scf.if %2 {
      %cst_10 = arith.constant 0.000000e+00 : f32
      %12 = vector.broadcast %cst_10 : f32 to vector<64x256xf32>
      %c0_11 = arith.constant 0 : index
      %c0_12 = arith.constant 0 : index
      %13 = vector.load %arg7[%c0_11, %c0_12] : memref<64x256xf32, #tpu.memory_space<vmem>>, vector<64x256xf32>
      tpu.vector_store %arg7[%c0_11, %c0_12], %12 {strides = array<i32>} : memref<64x256xf32, #tpu.memory_space<vmem>>, vector<64x256xf32>,
    } else {
    }
    %c0 = arith.constant 0 : index
    %c0_1 = arith.constant 0 : index
    %3 = vector.load %arg7[%c0, %c0_1] : memref<64x256xf32, #tpu.memory_space<vmem>>, vector<64x256xf32>
    %c0_2 = arith.constant 0 : index
    %c0_3 = arith.constant 0 : index
    %4 = vector.load %arg3[%c0_2, %c0_3] : memref<64x128xf32, #tpu.memory_space<vmem>>, vector<64x128xf32>
    %c0_4 = arith.constant 0 : index
    %c0_5 = arith.constant 0 : index
    %5 = vector.load %arg4[%c0_4, %c0_5] : memref<128x256xf32, #tpu.memory_space<vmem>>, vector<128x256xf32>
    %cst = arith.constant dense<0.000000e+00> : vector<64x256xf32>
    %6 = tpu.matmul %4, %5, %cst {dimension_numbers = #tpu.dot_dimension_numbers<[1], [0], [0], [1], [0, 0, 1, 1], [], []>} : vector<64x128xf32>, vector<128x256xf32>, vector<64x256xf32> -> vector<64x256xf32>
    %7 = arith.addf %3, %6 : vector<64x256xf32>
    %c0_6 = arith.constant 0 : index
    %c0_7 = arith.constant 0 : index
    %8 = vector.load %arg7[%c0_6, %c0_7] : memref<64x256xf32, #tpu.memory_space<vmem>>, vector<64x256xf32>
    tpu.vector_store %arg7[%c0_6, %c0_7], %7 {strides = array<i32>} : memref<64x256xf32, #tpu.memory_space<vmem>>, vector<64x256xf32>,
    %c0_i32_8 = arith.constant 0 : i32
    %9 = arith.cmpi eq, %arg2, %c0_i32_8 : i32
    %10 = arith.extui %9 : i1 to i32
    %c0_i32_9 = arith.constant 0 : i32
    %11 = arith.cmpi ne, %10, %c0_i32_9 : i32
    scf.if %11 {
      %c0_10 = arith.constant 0 : index
      %c0_11 = arith.constant 0 : index
      %12 = vector.load %arg7[%c0_10, %c0_11] : memref<64x256xf32, #tpu.memory_space<vmem>>, vector<64x256xf32>
      %c0_12 = arith.constant 0 : index
      %c0_13 = arith.constant 0 : index
      %13 = vector.load %arg5[%c0_12, %c0_13] : memref<1x256xf32, #tpu.memory_space<vmem>>, vector<1x256xf32>
      %14 = vector.broadcast %13 : vector<1x256xf32> to vector<64x256xf32>
      %15 = arith.addf %12, %14 : vector<64x256xf32>
      %c0_14 = arith.constant 0 : index
      %c0_15 = arith.constant 0 : index
      %16 = vector.load %arg6[%c0_14, %c0_15] : memref<64x256xf32, #tpu.memory_space<vmem>>, vector<64x256xf32>
      tpu.vector_store %arg6[%c0_14, %c0_15], %15 {strides = array<i32>} : memref<64x256xf32, #tpu.memory_space<vmem>>, vector<64x256xf32>,
    } else {
    }
    return
  }
  func.func @transform_0(%arg0: i32, %arg1: i32, %arg2: i32) -> (i32, i32) {
    %c0_i32 = arith.constant 0 : i32
    return %arg0, %arg2 : i32, i32
  }
  func.func @transform_1(%arg0: i32, %arg1: i32, %arg2: i32) -> (i32, i32) {
    %c0_i32 = arith.constant 0 : i32
    return %arg2, %arg1 : i32, i32
  }
  func.func @transform_2(%arg0: i32, %arg1: i32, %arg2: i32) -> (i32, i32) {
    %c0_i32 = arith.constant 0 : i32
    %c0_i32_0 = arith.constant 0 : i32
    return %c0_i32, %arg1 : i32, i32
  }
  func.func @transform_3(%arg0: i32, %arg1: i32, %arg2: i32) -> (i32, i32) {
    %c0_i32 = arith.constant 0 : i32
    return %arg0, %arg1 : i32, i32
  }
}

module attributes {stable_mosaic.version = 11 : i64} {
  func.func @matmul_bias_kernel(%arg0: i32, %arg1: i32, %arg2: i32, %arg3: memref<16x128xf32, #tpu.memory_space<vmem>>, %arg4: memref<128x128xf32, #tpu.memory_space<vmem>>, %arg5: memref<1x128xf32, #tpu.memory_space<vmem>>, %arg6: memref<16x128xf32, #tpu.memory_space<vmem>>, %arg7: memref<16x128xf32, #tpu.memory_space<vmem>>) attributes {dimension_semantics = [#tpu.dimension_semantics<parallel>, #tpu.dimension_semantics<parallel>, #tpu.dimension_semantics<arbitrary>], iteration_bounds = array<i64: 1, 1, 1>, scalar_prefetch = 0 : i64, scratch_operands = 1 : i64, tpu.core_type = #tpu.core_type<tc>, window_params = [{transform_indices = @transform_0, window_bounds = array<i64: 16, 128>}, {transform_indices = @transform_1, window_bounds = array<i64: 128, 128>}, {transform_indices = @transform_2, window_bounds = array<i64: 1, 128>}, {transform_indices = @transform_3, window_bounds = array<i64: 16, 128>}]} {
    %c0_i32 = arith.constant 0 : i32
    %0 = arith.cmpi eq, %arg2, %c0_i32 : i32
    %1 = arith.extui %0 : i1 to i32
    %c0_i32_0 = arith.constant 0 : i32
    %2 = arith.cmpi ne, %1, %c0_i32_0 : i32
    scf.if %2 {
      %cst_10 = arith.constant 0.000000e+00 : f32
      %12 = vector.broadcast %cst_10 : f32 to vector<16x128xf32>
      %c0_11 = arith.constant 0 : index
      %c0_12 = arith.constant 0 : index
      %13 = vector.load %arg7[%c0_11, %c0_12] : memref<16x128xf32, #tpu.memory_space<vmem>>, vector<16x128xf32>
      tpu.vector_store %arg7[%c0_11, %c0_12], %12 {strides = array<i32>} : memref<16x128xf32, #tpu.memory_space<vmem>>, vector<16x128xf32>,
    } else {
    }
    %c0 = arith.constant 0 : index
    %c0_1 = arith.constant 0 : index
    %3 = vector.load %arg7[%c0, %c0_1] : memref<16x128xf32, #tpu.memory_space<vmem>>, vector<16x128xf32>
    %c0_2 = arith.constant 0 : index
    %c0_3 = arith.constant 0 : index
    %4 = vector.load %arg3[%c0_2, %c0_3] : memref<16x128xf32, #tpu.memory_space<vmem>>, vector<16x128xf32>
    %c0_4 = arith.constant 0 : index
    %c0_5 = arith.constant 0 : index
    %5 = vector.load %arg4[%c0_4, %c0_5] : memref<128x128xf32, #tpu.memory_space<vmem>>, vector<128x128xf32>
    %cst = arith.constant dense<0.000000e+00> : vector<16x128xf32>
    %6 = tpu.matmul %4, %5, %cst {dimension_numbers = #tpu.dot_dimension_numbers<[1], [0], [0], [1], [0, 0, 1, 1], [], []>} : vector<16x128xf32>, vector<128x128xf32>, vector<16x128xf32> -> vector<16x128xf32>
    %7 = arith.addf %3, %6 : vector<16x128xf32>
    %c0_6 = arith.constant 0 : index
    %c0_7 = arith.constant 0 : index
    %8 = vector.load %arg7[%c0_6, %c0_7] : memref<16x128xf32, #tpu.memory_space<vmem>>, vector<16x128xf32>
    tpu.vector_store %arg7[%c0_6, %c0_7], %7 {strides = array<i32>} : memref<16x128xf32, #tpu.memory_space<vmem>>, vector<16x128xf32>,
    %c0_i32_8 = arith.constant 0 : i32
    %9 = arith.cmpi eq, %arg2, %c0_i32_8 : i32
    %10 = arith.extui %9 : i1 to i32
    %c0_i32_9 = arith.constant 0 : i32
    %11 = arith.cmpi ne, %10, %c0_i32_9 : i32
    scf.if %11 {
      %c0_10 = arith.constant 0 : index
      %c0_11 = arith.constant 0 : index
      %12 = vector.load %arg7[%c0_10, %c0_11] : memref<16x128xf32, #tpu.memory_space<vmem>>, vector<16x128xf32>
      %c0_12 = arith.constant 0 : index
      %c0_13 = arith.constant 0 : index
      %13 = vector.load %arg5[%c0_12, %c0_13] : memref<1x128xf32, #tpu.memory_space<vmem>>, vector<1x128xf32>
      %14 = vector.broadcast %13 : vector<1x128xf32> to vector<16x128xf32>
      %15 = arith.addf %12, %14 : vector<16x128xf32>
      %c0_14 = arith.constant 0 : index
      %c0_15 = arith.constant 0 : index
      %16 = vector.load %arg6[%c0_14, %c0_15] : memref<16x128xf32, #tpu.memory_space<vmem>>, vector<16x128xf32>
      tpu.vector_store %arg6[%c0_14, %c0_15], %15 {strides = array<i32>} : memref<16x128xf32, #tpu.memory_space<vmem>>, vector<16x128xf32>,
    } else {
    }
    return
  }
  func.func @transform_0(%arg0: i32, %arg1: i32, %arg2: i32) -> (i32, i32) {
    %c0_i32 = arith.constant 0 : i32
    return %arg0, %arg2 : i32, i32
  }
  func.func @transform_1(%arg0: i32, %arg1: i32, %arg2: i32) -> (i32, i32) {
    %c0_i32 = arith.constant 0 : i32
    return %arg2, %arg1 : i32, i32
  }
  func.func @transform_2(%arg0: i32, %arg1: i32, %arg2: i32) -> (i32, i32) {
    %c0_i32 = arith.constant 0 : i32
    %c0_i32_0 = arith.constant 0 : i32
    return %c0_i32, %arg1 : i32, i32
  }
  func.func @transform_3(%arg0: i32, %arg1: i32, %arg2: i32) -> (i32, i32) {
    %c0_i32 = arith.constant 0 : i32
    return %arg0, %arg1 : i32, i32
  }
}

</mosaic_0001>

<bundles_post_ra>
// kernel: language_model_forward.5
= control target key start
LH: loop header
LB: loop body
LE: loop exit
PB: predicated region body
PF: predicated region fallthrough
CT: control target
= control target key end

     0   :  { %s314_s0 = inlined_call_operand.vmem [shape: f32[16,128], index: 0, kind: input, shape index: {}]   ;;  %s315_s1 = inlined_call_operand.vmem [shape: f32[128,128], index: 1, kind: input, shape index: {}]   ;;  %s316_s2 = inlined_call_operand.vmem [shape: f32[1,128], index: 2, kind: input, shape index: {}]   ;;  %s317_s3 = inlined_call_operand.hbm [shape: f32[16,128], index: 3, kind: output, shape index: {}]  }
   0x1   :  { %v40_v0 = vld [vmem:[%s315_s1 + $0x78] sm:$0xff]  ;;  %v39_v1 = vld [vmem:[%s315_s1 + $0x70] sm:$0xff]  ;;  %v38_v2 = vld [vmem:[%s315_s1 + $0x68] sm:$0xff] }
   0x2   :  { %171 = vmatprep.subr.mxu0 %v40_v0  ;;  %v37_v3 = vld [vmem:[%s315_s1 + $0x60] sm:$0xff]  ;;  %v36_v5 = vld [vmem:[%s315_s1 + $0x58] sm:$0xff] }
   0x3   :  { %172 = vmatpush3.msra.mxu0 %v40_v0  ;;  %v23_v4 = vld [vmem:[%s314_s0] sm:$0xff] }
   0x4   :  { %173 = vmatprep.subr.mxu0 %v39_v1  ;;  %203 = vmatprep.mubr.f32.mxu0 %v23_v4 }
   0x5   :  { %174 = vmatpush3.msra.mxu0 %v39_v1 }
   0x6   :  { %175 = vmatprep.subr.mxu0 %v38_v2 }
   0x7   :  { %176 = vmatpush3.msra.mxu0 %v38_v2 }
   0x8   :  { %8 = vsyncpa [#allocation4], 0  ;;  %177 = vmatprep.subr.mxu0 %v37_v3  ;;  %v35_v6 = vld [vmem:[%s315_s1 + $0x50] sm:$0xff]  ;;  %v34_v7 = vld [vmem:[%s315_s1 + $0x48] sm:$0xff]  ;;  %s231_s23 = smov [#allocation3]  }
   0x9   :  { %178 = vmatpush3.msra.mxu0 %v37_v3  ;;  %v33_v8 = vld [vmem:[%s315_s1 + $0x40] sm:$0xff]  ;;  %v32_v9 = vld [vmem:[%s315_s1 + $0x38] sm:$0xff]  ;;  %v31_v10 = vld [vmem:[%s315_s1 + $0x30] sm:$0xff]  ;;  %s141_s24 = sshll.u32 %s231_s23, 4  ;;  %s142_s24 = int_to_ptr.vmem [resolvable:$true] %s141_s24 }
   0xa   :  { %179 = vmatprep.subr.mxu0 %v36_v5  ;;  %v30_v11 = vld [vmem:[%s315_s1 + $0x28] sm:$0xff]  ;;  %v29_v12 = vld [vmem:[%s315_s1 + $0x20] sm:$0xff]  ;;  %v28_v13 = vld [vmem:[%s315_s1 + $0x18] sm:$0xff]  ;;  %p214_p1 = scmp.lt.s32.totalorder %s142_s24, %s142_s24 }
   0xb   :  { %180 = vmatpush3.msra.mxu0 %v36_v5  ;;  %v27_v14 = vld [vmem:[%s315_s1 + $0x10] sm:$0xff]  ;;  %v26_v15 = vld [vmem:[%s315_s1 + $0x8] sm:$0xff]  ;;  %v25_v16 = vld [vmem:[%s315_s1] sm:$0xff]  ;;  %s209_s1 = scalar_lea.vmem %s142_s24, 256 }
   0xc   :  { %181 = vmatprep.subr.mxu0 %v35_v6  ;;  %v24_v17 = vld [vmem:[%s314_s0 + $0x8] sm:$0xff]  ;;  %v152_v18 = vld [vmem:[%s316_s2] ss:$0 sm:$0xff]  ;;  %p210_p0 = scmp.ne.s32.totalorder %s142_s24, %s209_s1  ;;  %p215_p2 = scmp.lt.s32.totalorder %s209_s1, %s209_s1 }
   0xd   :  { %182 = vmatpush3.msra.mxu0 %v35_v6 }
   0xe   :  { %183 = vmatprep.subr.mxu0 %v34_v7  ;;  %p216_p3 = por %p215_p2, %p214_p1 }
   0xf   :  { %184 = vmatpush3.msra.mxu0 %v34_v7 }
  0x10   :  { %185 = vmatprep.subr.mxu0 %v33_v8  ;;  %p217_p4 = pnand %p216_p3, %p210_p0 }
  0x11   :  { %186 = vmatpush3.msra.mxu0 %v33_v8 }
  0x12   :  { %187 = vmatprep.subr.mxu0 %v32_v9 }
  0x13   :  { %188 = vmatpush3.msra.mxu0 %v32_v9 }
  0x14   :  { %189 = vmatprep.subr.mxu0 %v31_v10 }
  0x15   :  { %190 = vmatpush3.msra.mxu0 %v31_v10 }
  0x16   :  { %191 = vmatprep.subr.mxu0 %v30_v11 }
  0x17   :  { %192 = vmatpush3.msra.mxu0 %v30_v11 }
  0x18   :  { %193 = vmatprep.subr.mxu0 %v29_v12 }
  0x19   :  { %194 = vmatpush3.msra.mxu0 %v29_v12 }
  0x1a   :  { %195 = vmatprep.subr.mxu0 %v28_v13 }
  0x1b   :  { %196 = vmatpush3.msra.mxu0 %v28_v13 }
  0x1c   :  { %197 = vmatprep.subr.mxu0 %v27_v14 }
  0x1d   :  { %198 = vmatpush3.msra.mxu0 %v27_v14 }
  0x1e   :  { %199 = vmatprep.subr.mxu0 %v26_v15 }
  0x1f   :  { %200 = vmatpush3.msra.mxu0 %v26_v15 }
  0x20   :  { %201 = vmatprep.subr.mxu0 %v25_v16 }
  0x21   :  { %202 = vmatpush3.msra.mxu0 %v25_v16 }
  0x22   :  { %204 = vmatmul.mubr.f32.vlgmr.msra.gmra.mxu0 %v24_v17 }
  0xe2   :  { %v205_v19 = vpop.f32.mrf.mxu0 }
  0xe3   :  { %v133_v20 = vadd.f32 %v205_v19, %v152_v18 }
  0xe4   :  { %v107_v21 = vpop.f32.mrf.mxu0 }
  0xe5   :  { %135 = vst [vmem:[#allocation3 + $0x8] sm:$0xff] %v133_v20  ;;  %v132_v22 = vadd.f32 %v152_v18, %v107_v21 }
  0xe7   :  { %134 = vst [vmem:[#allocation3] sm:$0xff] %v132_v22 }
  0xe8   :  { %220 = shalt.err (!%p217_p4)
}
  0xe9   :  { %s232_s0 = smov 128   ;;  %s233_s25 = smov 8  }
  0xea   :  { %147 = dma.vmem_to_hbm [thread:$0]  %s142_s24, 256, %s317_s3, [#allocation4], %s232_s0, %s232_s0, %s233_s25  }
  0xeb   :  { %229 = dma.done.wait [#allocation4], 256  }
  0xec   :  { %230 = vsyncadd [#allocation4], 4294967040 }
  0xed   :  { %151 = vsyncpa [#allocation4], 1 }

// kernel: language_model_forward.3
= control target key start
LH: loop header
LB: loop body
LE: loop exit
PB: predicated region body
PF: predicated region fallthrough
CT: control target
= control target key end

     0   :  { %8 = vsyncpa [#allocation4], 0  ;;  %s1249_s0 = inlined_call_operand.vmem [shape: f32[64,128], index: 0, kind: input, shape index: {}]   ;;  %s1250_s1 = inlined_call_operand.hbm [shape: f32[128,512], index: 1, kind: input, shape index: {}]   ;;  %s1251_s2 = inlined_call_operand.hbm [shape: f32[1,512], index: 2, kind: input, shape index: {}]   ;;  %s1252_s3 = inlined_call_operand.vmem [shape: f32[64,512], index: 3, kind: output, shape index: {}]  }
   0x1   :  { %10 = vsyncpa [#allocation4 + $0x1], 0 }
   0x2   :  { %11 = vsyncpa [#allocation6], 0 }
   0x3   :  { %13 = vsyncpa [#allocation6 + $0x1], 0  ;;  %s1008_s12 = smov 0   ;;  %s1010_s13 = smov 0  }
   0x4   :  { %s1012_s14 = smov 0   ;;  %s1014_s15 = smov 0  }
   0x5   :  { %s1016_s16 = smov 0   ;;  %s1018_s17 = smov 0  }
   0x6 LB: > { %s751_s18 = sadd.s32 4294967295, %s980_s17   ;;  %s34_s19 = sadd.s32 1, %s976_s16  ;;  %s980_s17 = sphi %s1018_s17, %s19_s17   ;;  %s976_s16 = sphi %s1016_s16, %s1262_s16   ;;  %s972_s15 = sphi %s1014_s15, %s1261_s15   ;;  %s968_s14 = sphi %s1012_s14, %s1260_s14   ;;  %s964_s13 = sphi %s1010_s13, %s1259_s13   ;;  %s960_s12 = sphi %s1008_s12, %s1258_s12  }
   0x7   : > { %p36_p0 = scmp.ge.s32.totalorder %s34_s19, 2  ;;  %s75_s20 = sadd.s32 1, %s968_s14 }
   0x8   : > { %p82_p1 = scmp.ne.s32.totalorder %s968_s14, %s964_s13  ;;  %p83_p2 = scmp.eq.s32.totalorder %s980_s17, 0 }
   0x9   : > { %s1264_s19 = smov (%p36_p0, %s34_s19), 0  ;;  %p88_p4 = scmp.ne.s32.totalorder %s964_s13, %s960_s12 }
   0xa   : > { %p1044_p3 = por %p83_p2, %p82_p1  ;;  %s71_s22 = ssub.s32 %s976_s16, %s1264_s19 }
   0xb   : > { %p89_p5 = scmp.eq.s32.totalorder %s751_s18, 0  ;;  %p73_p6 = scmp.eq.s32.totalorder %s71_s22, 0 }
   0xc   : > { %p140_p7 = scmp.eq.s32.totalorder %s751_s18, 1  ;;  %p817_p10 = scmp.lt.s32.totalorder %s980_s17, 2 }
   0xd   : > { %p1051_p8 = por %p89_p5, %p88_p4  ;;  %s1064_s26 = sand.u32 1, %s968_s14  }
   0xe   : > { %s1056_s24 = scalar_select %p73_p6, %s968_s14, %s75_s20  }
   0xf   : > { %p1058_p9 = por %p140_p7, %p82_p1  ;;  %s771_s27 = sshll.u32 %s976_s16, 8 }
  0x10   : > { %s756_s28 = sshll.u32 %s1064_s26, 8  ;;  %s191_s4 = scalar_lea.hbm %s1250_s1, %s771_s27 }
  0x11   : > { %s182_s5 = scalar_lea.vmem [#allocation3], %s756_s28  ;;  %p1073_p11 = pnand %p817_p10, %p1044_p3 }
  0x12   : > { %s192_s6 = sshll.u32 %s182_s5, 4  ;;  %p762_p12 = scmp.ge.s32.totalorder %s980_s17, 1  ;;  %s193_s6 = int_to_ptr.vmem [resolvable:$true] %s192_s6 }
  0x13   : > { %s179_s8 = scalar_lea.sflag [#allocation4], %s1064_s26  ;;  %p872_p13 = pneg %p1073_p11 }
  0x14   : > { %s883_s9 = scalar_lea.vmem %s193_s6, 4096  ;;  %s982_s10 = smov [#allocation3]  }
  0x15   : > { %p884_p0 = scmp.ne.s32.totalorder %s193_s6, %s883_s9  ;;  %s888_s11 = sshll.u32 %s982_s10, 4  ;;  %s889_s11 = int_to_ptr.vmem [resolvable:$false] %s888_s11 }
  0x16   : > { %s890_s12 = scalar_lea.vmem %s889_s11, 8192  ;;  %p891_p3 = scmp.lt.s32.totalorder %s193_s6, %s889_s11 }
  0x17   : > { %p886_p1 = pnand %p884_p0, %p872_p13  ;;  %p892_p4 = scmp.lt.s32.totalorder %s890_s12, %s883_s9 }
  0x19   : > { %p887_p2 = pneg %p886_p1  ;;  %p893_p5 = por %p892_p4, %p891_p3 }
  0x1b   : > { %p894_p6 = pnand %p893_p5, %p887_p2 }
  0x1d   : > { %897 = shalt.err (!%p894_p6)
}
  0x1e   : > { %s983_s18 = smov 512   ;;  %s984_s20 = smov 256  }
  0x1f   : > { %s985_s21 = smov 16   ;;  %p219_p7 = scmp.lt.s32.totalorder %s980_s17, 3 }
  0x20   : > { %813 = dma.hbm_to_vmem [thread:$0]  (!%p1073_p11), %s191_s4, 4096, %s193_s6, %s179_s8, %s983_s18, %s984_s20, %s985_s21  }
  0x21   : > { %s759_s22 = sshll.u32 %s1064_s26, 1  ;;  %s772_s27 = sshll.u32 %s976_s16, 5 }
  0x22   : > { %p1091_p10 = pnand %p762_p12, %p219_p7  ;;  %s212_s5 = scalar_lea.hbm %s1251_s2, %s772_s27 }
  0x23   : > { %s206_s9 = scalar_lea.vmem [#allocation5], %s759_s22  ;;  %s203_s11 = scalar_lea.sflag [#allocation6], %s1064_s26 }
  0x24   : > { %s214_s10 = sshll.u32 %s206_s9, 4  ;;  %s986_s4 = smov [#allocation5]   ;;  %s215_s10 = int_to_ptr.vmem [resolvable:$true] %s214_s10 }
  0x25   : > { %s911_s12 = scalar_lea.vmem %s215_s10, 32  ;;  %s916_s6 = sshll.u32 %s986_s4, 4  ;;  %s917_s6 = int_to_ptr.vmem [resolvable:$false] %s916_s6 }
  0x26   : > { %p912_p0 = scmp.ne.s32.totalorder %s215_s10, %s911_s12  ;;  %s918_s8 = scalar_lea.vmem %s917_s6, 64 }
  0x27   : > { %p919_p12 = scmp.lt.s32.totalorder %s215_s10, %s917_s6  ;;  %p920_p3 = scmp.lt.s32.totalorder %s918_s8, %s911_s12 }
  0x28   : > { %p914_p1 = pnand %p912_p0, %p872_p13 }
  0x29   : > { %p921_p4 = por %p920_p3, %p919_p12 }
  0x2a   : > { %p915_p2 = pneg %p914_p1 }
  0x2c   : > { %p922_p5 = pnand %p921_p4, %p915_p2 }
  0x2e   : > { %925 = shalt.err (!%p922_p5)
}
  0x2f   : > { %816 = dma.hbm_to_vmem [thread:$0]  (!%p1073_p11), %s212_s5, 32, %s215_s10, %s203_s11  }
  0x30   : > { %223 = sbr.rel (%p1091_p10) target bundleno = 310 (0x136), region = 32  ;;  %s1107_s26 = sand.u32 (!%p1091_p10), 1, %s964_s13  }
  0x31   : > { %s763_s18 = sshll.u32 (!%p1091_p10), %s1107_s26, 8  ;;  %s226_s20 = scalar_lea.sflag (!%p1091_p10), [#allocation4], %s1107_s26 }
  0x32   : > { %s1111_s21 = scalar_lea.vmem (!%p1091_p10), [#allocation3], %s763_s18 }
  0x35   : > { %951 = dma.done.wait (%p1051_p8), %s226_s20, 4096  }
  0x36   : > { %953 = vsyncadd (%p1051_p8), %s226_s20, 4294963200  ;;  %s764_s7 = sshll.u32 %s1107_s26, 1  ;;  %s235_s22 = scalar_lea.sflag [#allocation6], %s1107_s26 }
  0x37   : > { %s1119_s27 = scalar_lea.vmem [#allocation5], %s764_s7 }
  0x38   : > { %955 = dma.done.wait (%p1051_p8), %s235_s22, 32  }
  0x39   : > { %957 = vsyncadd (%p1051_p8), %s235_s22, 4294967264  ;;  %v987_v0 = vmov 0.0   ;;  %v362_v1 = vld [vmem:[%s1111_s21 + $0xf8] sm:$0xff]  ;;  %v361_v2 = vld [vmem:[%s1111_s21 + $0xf0] sm:$0xff]  ;;  %v529_v41 = vlaneseq  ;;  %s765_s22 = sshll.u32 %s1107_s26, 7  ;;  %s773_s26 = sshll.u32 (%p1058_p9), %s972_s15, 4 }
  0x3a   : > { %427 = vmatprep.mubr.f32.mxu0 %v987_v0  ;;  %451 = vmatprep.mubr.f32.mxu1 %v987_v0  ;;  %v360_v3 = vld [vmem:[%s1111_s21 + $0xe8] sm:$0xff]  ;;  %v359_v4 = vld [vmem:[%s1111_s21 + $0xe0] sm:$0xff]  ;;  %v358_v5 = vld [vmem:[%s1111_s21 + $0xd8] sm:$0xff]  ;;  %s1191_s23 = scalar_lea.vmem [#allocation7], %s765_s22  ;;  %s583_s29 = scalar_lea.vmem (%p1058_p9), %s1252_s3, %s773_s26 }
  0x3b   : > { %363 = vmatprep.subr.mxu0 %v362_v1  ;;  %774 = vmatprep.subr.mxu1 %v362_v1  ;;  %v357_v6 = vld [vmem:[%s1111_s21 + $0xd0] sm:$0xff]  ;;  %v356_v7 = vld [vmem:[%s1111_s21 + $0xc8] sm:$0xff]  ;;  %v355_v8 = vld [vmem:[%s1111_s21 + $0xc0] sm:$0xff]  ;;  %v530_v42 = vshrl.u32 %v529_v41, 7 }
  0x3c   : > { %364 = vmatpush1.msra.mxu0 %v361_v2  ;;  %790 = vmatpush1.msra.mxu1 %v361_v2  ;;  %v354_v9 = vld [vmem:[%s1111_s21 + $0xb8] sm:$0xff]  ;;  %v353_v10 = vld [vmem:[%s1111_s21 + $0xb0] sm:$0xff]  ;;  %v352_v11 = vld [vmem:[%s1111_s21 + $0xa8] sm:$0xff] }
  0x3d   : > { %365 = vmatprep.subr.mxu0 %v360_v3  ;;  %775 = vmatprep.subr.mxu1 %v360_v3  ;;  %v351_v12 = vld [vmem:[%s1111_s21 + $0xa0] sm:$0xff]  ;;  %v350_v13 = vld [vmem:[%s1111_s21 + $0x98] sm:$0xff]  ;;  %v349_v14 = vld [vmem:[%s1111_s21 + $0x90] sm:$0xff]  ;;  %v531_v43 = vsub.s32 0, %v530_v42  ;;  %v535_v45 = vsub.s32 1, %v530_v42 }
  0x3e   : > { %366 = vmatpush1.msra.mxu0 %v359_v4  ;;  %791 = vmatpush1.msra.mxu1 %v359_v4  ;;  %v348_v15 = vld [vmem:[%s1111_s21 + $0x88] sm:$0xff]  ;;  %v347_v16 = vld [vmem:[%s1111_s21 + $0x80] sm:$0xff]  ;;  %v346_v17 = vld [vmem:[%s1111_s21 + $0x78] sm:$0xff] }
  0x3f   : > { %367 = vmatprep.subr.mxu0 %v358_v5  ;;  %776 = vmatprep.subr.mxu1 %v358_v5  ;;  %v345_v18 = vld [vmem:[%s1111_s21 + $0x70] sm:$0xff]  ;;  %v344_v19 = vld [vmem:[%s1111_s21 + $0x68] sm:$0xff]  ;;  %v343_v20 = vld [vmem:[%s1111_s21 + $0x60] sm:$0xff] }
  0x40   : > { %368 = vmatpush1.msra.mxu0 %v357_v6  ;;  %792 = vmatpush1.msra.mxu1 %v357_v6  ;;  %v342_v21 = vld [vmem:[%s1111_s21 + $0x58] sm:$0xff]  ;;  %v341_v22 = vld [vmem:[%s1111_s21 + $0x50] sm:$0xff]  ;;  %v340_v23 = vld [vmem:[%s1111_s21 + $0x48] sm:$0xff] }
  0x41   : > { %369 = vmatprep.subr.mxu0 %v356_v7  ;;  %777 = vmatprep.subr.mxu1 %v356_v7  ;;  %v339_v24 = vld [vmem:[%s1111_s21 + $0x40] sm:$0xff]  ;;  %v338_v25 = vld [vmem:[%s1111_s21 + $0x38] sm:$0xff]  ;;  %v337_v26 = vld [vmem:[%s1111_s21 + $0x30] sm:$0xff] }
  0x42   : > { %370 = vmatpush1.msra.mxu0 %v355_v8  ;;  %793 = vmatpush1.msra.mxu1 %v355_v8  ;;  %v336_v27 = vld [vmem:[%s1111_s21 + $0x28] sm:$0xff]  ;;  %v335_v28 = vld [vmem:[%s1111_s21 + $0x20] sm:$0xff]  ;;  %v334_v29 = vld [vmem:[%s1111_s21 + $0x18] sm:$0xff] }
  0x43   : > { %371 = vmatprep.subr.mxu0 %v354_v9  ;;  %778 = vmatprep.subr.mxu1 %v354_v9  ;;  %v333_v30 = vld [vmem:[%s1111_s21 + $0x10] sm:$0xff]  ;;  %v332_v31 = vld [vmem:[%s1111_s21 + $0x8] sm:$0xff]  ;;  %v331_v32 = vld [vmem:[%s1111_s21] sm:$0xff] }
  0x44   : > { %372 = vmatpush1.msra.mxu0 %v353_v10  ;;  %794 = vmatpush1.msra.mxu1 %v353_v10  ;;  %v323_v33 = vld [vmem:[%s1249_s0] sm:$0xff]  ;;  %v324_v35 = vld [vmem:[%s1249_s0 + $0x8] sm:$0xff]  ;;  %v325_v37 = vld [vmem:[%s1249_s0 + $0x10] sm:$0xff] }
  0x45   : > { %373 = vmatprep.subr.mxu0 %v352_v11  ;;  %779 = vmatprep.subr.mxu1 %v352_v11  ;;  %v327_v34 = vld [vmem:[%s1249_s0 + $0x20] sm:$0xff]  ;;  %v328_v36 = vld [vmem:[%s1249_s0 + $0x28] sm:$0xff]  ;;  %v329_v38 = vld [vmem:[%s1249_s0 + $0x30] sm:$0xff] }
  0x46   : > { %374 = vmatpush1.msra.mxu0 %v351_v12  ;;  %795 = vmatpush1.msra.mxu1 %v351_v12  ;;  %v326_v39 = vld [vmem:[%s1249_s0 + $0x18] sm:$0xff]  ;;  %v527_v44 = vld [vmem:[%s1119_s27] sm:$0x3] }
  0x47   : > { %375 = vmatprep.subr.mxu0 %v350_v13  ;;  %780 = vmatprep.subr.mxu1 %v350_v13  ;;  %v330_v40 = vld [vmem:[%s1249_s0 + $0x38] sm:$0xff]  ;;  %v532_v46 = vrot.slane %v527_v44, %v531_v43  ;;  %v536_v47 = vrot.slane %v527_v44, %v535_v45 }
  0x48   : > { %376 = vmatpush1.msra.mxu0 %v349_v14  ;;  %796 = vmatpush1.msra.mxu1 %v349_v14 }
  0x49   : > { %377 = vmatprep.subr.mxu0 %v348_v15  ;;  %781 = vmatprep.subr.mxu1 %v348_v15 }
  0x4a   : > { %378 = vmatpush1.msra.mxu0 %v347_v16  ;;  %797 = vmatpush1.msra.mxu1 %v347_v16 }
  0x4b   : > { %379 = vmatprep.subr.mxu0 %v346_v17  ;;  %782 = vmatprep.subr.mxu1 %v346_v17 }
  0x4c   : > { %380 = vmatpush1.msra.mxu0 %v345_v18  ;;  %798 = vmatpush1.msra.mxu1 %v345_v18 }
  0x4d   : > { %381 = vmatprep.subr.mxu0 %v344_v19  ;;  %783 = vmatprep.subr.mxu1 %v344_v19 }
  0x4e   : > { %382 = vmatpush1.msra.mxu0 %v343_v20  ;;  %799 = vmatpush1.msra.mxu1 %v343_v20 }
  0x4f   : > { %383 = vmatprep.subr.mxu0 %v342_v21  ;;  %784 = vmatprep.subr.mxu1 %v342_v21 }
  0x50   : > { %384 = vmatpush1.msra.mxu0 %v341_v22  ;;  %800 = vmatpush1.msra.mxu1 %v341_v22 }
  0x51   : > { %385 = vmatprep.subr.mxu0 %v340_v23  ;;  %785 = vmatprep.subr.mxu1 %v340_v23 }
  0x52   : > { %386 = vmatpush1.msra.mxu0 %v339_v24  ;;  %801 = vmatpush1.msra.mxu1 %v339_v24 }
  0x53   : > { %387 = vmatprep.subr.mxu0 %v338_v25  ;;  %786 = vmatprep.subr.mxu1 %v338_v25 }
  0x54   : > { %388 = vmatpush1.msra.mxu0 %v337_v26  ;;  %802 = vmatpush1.msra.mxu1 %v337_v26 }
  0x55   : > { %389 = vmatprep.subr.mxu0 %v336_v27  ;;  %787 = vmatprep.subr.mxu1 %v336_v27 }
  0x56   : > { %390 = vmatpush1.msra.mxu0 %v335_v28  ;;  %803 = vmatpush1.msra.mxu1 %v335_v28 }
  0x57   : > { %391 = vmatprep.subr.mxu0 %v334_v29  ;;  %788 = vmatprep.subr.mxu1 %v334_v29 }
  0x58   : > { %392 = vmatpush1.msra.mxu0 %v333_v30  ;;  %804 = vmatpush1.msra.mxu1 %v333_v30 }
  0x59   : > { %393 = vmatprep.subr.mxu0 %v332_v31  ;;  %789 = vmatprep.subr.mxu1 %v332_v31 }
  0x5a   : > { %394 = vmatpush1.msra.mxu0 %v331_v32  ;;  %805 = vmatpush1.msra.mxu1 %v331_v32 }
  0x5b   : > { %428 = vmatmul.mubr.f32.vlgmr.msra.gmra.mxu0 %v323_v33  ;;  %452 = vmatmul.mubr.f32.vlgmr.msra.gmra.mxu1 %v327_v34 }
  0x5c   : > { %433 = vmatprep.mubr.f32.mxu0 %v987_v0  ;;  %457 = vmatprep.mubr.f32.mxu1 %v987_v0 }
  0x5f   : > { %434 = vmatmul.mubr.f32.gmra.mxu0 %v324_v35  ;;  %458 = vmatmul.mubr.f32.gmra.mxu1 %v328_v36 }
  0x60   : > { %439 = vmatprep.mubr.f32.mxu0 %v987_v0  ;;  %463 = vmatprep.mubr.f32.mxu1 %v987_v0 }
  0x63   : > { %440 = vmatmul.mubr.f32.gmra.mxu0 %v325_v37  ;;  %464 = vmatmul.mubr.f32.gmra.mxu1 %v329_v38 }
  0x64   : > { %445 = vmatprep.mubr.f32.mxu0 %v987_v0  ;;  %469 = vmatprep.mubr.f32.mxu1 %v987_v0 }
  0x67   : > { %446 = vmatmul.mubr.f32.gmra.mxu0 %v326_v39  ;;  %470 = vmatmul.mubr.f32.gmra.mxu1 %v330_v40 }
 0x11b   : > { %v429_v48 = vpop.f32.mrf.mxu0  ;;  %v453_v49 = vpop.f32.mrf.mxu1 }
 0x11c   : > { %v539_v50 = vadd.f32 %v532_v46, %v429_v48  ;;  %v547_v51 = vadd.f32 %v532_v46, %v453_v49 }
 0x11d   : > { %v431_v52 = vpop.f32.mrf.mxu0  ;;  %v455_v53 = vpop.f32.mrf.mxu1 }
 0x11e   : > { %555 = vst [vmem:[%s1191_s23] sm:$0xff] %v539_v50  ;;  %563 = vst [vmem:[%s1191_s23 + $0x40] sm:$0xff] %v547_v51  ;;  %v540_v54 = vadd.f32 %v536_v47, %v431_v52  ;;  %v548_v55 = vadd.f32 %v536_v47, %v455_v53 }
 0x11f   : > { %v435_v56 = vpop.f32.mrf.mxu0  ;;  %v459_v57 = vpop.f32.mrf.mxu1 }
 0x120   : > { %556 = vst [vmem:[%s1191_s23 + $0x8] sm:$0xff] %v540_v54  ;;  %564 = vst [vmem:[%s1191_s23 + $0x48] sm:$0xff] %v548_v55  ;;  %v541_v58 = vadd.f32 %v532_v46, %v435_v56  ;;  %v549_v59 = vadd.f32 %v532_v46, %v459_v57 }
 0x121   : > { %v437_v60 = vpop.f32.mrf.mxu0  ;;  %v461_v61 = vpop.f32.mrf.mxu1 }
 0x122   : > { %557 = vst [vmem:[%s1191_s23 + $0x10] sm:$0xff] %v541_v58  ;;  %565 = vst [vmem:[%s1191_s23 + $0x50] sm:$0xff] %v549_v59  ;;  %v542_v62 = vadd.f32 %v536_v47, %v437_v60  ;;  %v550_v63 = vadd.f32 %v536_v47, %v461_v61 }
 0x123   : > { %v441_v0 = vpop.f32.mrf.mxu0  ;;  %v465_v1 = vpop.f32.mrf.mxu1 }
 0x124   : > { %558 = vst [vmem:[%s1191_s23 + $0x18] sm:$0xff] %v542_v62  ;;  %566 = vst [vmem:[%s1191_s23 + $0x58] sm:$0xff] %v550_v63  ;;  %v543_v2 = vadd.f32 %v532_v46, %v441_v0  ;;  %v551_v3 = vadd.f32 %v532_v46, %v465_v1 }
 0x125   : > { %v443_v4 = vpop.f32.mrf.mxu0  ;;  %v467_v5 = vpop.f32.mrf.mxu1  ;;  %v596_v16 = vld [vmem:[%s1191_s23] sm:$0xff] (%p1058_p9) }
 0x126   : > { %559 = vst [vmem:[%s1191_s23 + $0x20] sm:$0xff] %v543_v2  ;;  %567 = vst [vmem:[%s1191_s23 + $0x60] sm:$0xff] %v551_v3  ;;  %v544_v6 = vadd.f32 %v536_v47, %v443_v4  ;;  %v552_v7 = vadd.f32 %v536_v47, %v467_v5  ;;  %v612_v24 = vld [vmem:[%s1191_s23 + $0x40] sm:$0xff] (%p1058_p9) }
 0x127   : > { %v447_v8 = vpop.f32.mrf.mxu0  ;;  %v471_v9 = vpop.f32.mrf.mxu1  ;;  %v598_v17 = vld [vmem:[%s1191_s23 + $0x8] sm:$0xff] (%p1058_p9)  ;;  %597 = vst [vmem:[%s583_s29] sm:$0xff] (%p1058_p9), %v596_v16  ;;  %613 = vst [vmem:[%s583_s29 + $0x80] sm:$0xff] (%p1058_p9), %v612_v24 }
 0x128   : > { %560 = vst [vmem:[%s1191_s23 + $0x28] sm:$0xff] %v544_v6  ;;  %568 = vst [vmem:[%s1191_s23 + $0x68] sm:$0xff] %v552_v7  ;;  %v545_v10 = vadd.f32 %v532_v46, %v447_v8  ;;  %v553_v11 = vadd.f32 %v532_v46, %v471_v9  ;;  %577 = sbr.rel (!%p1058_p9) target bundleno = 310 (0x136), region = 52  ;;  %v614_v25 = vld [vmem:[%s1191_s23 + $0x48] sm:$0xff] (%p1058_p9) }
 0x129   : > { %v449_v12 = vpop.f32.mrf.mxu0  ;;  %v473_v13 = vpop.f32.mrf.mxu1  ;;  %v600_v18 = vld [vmem:[%s1191_s23 + $0x10] sm:$0xff] (%p1058_p9)  ;;  %599 = vst [vmem:[%s583_s29 + $0x8] sm:$0xff] (%p1058_p9), %v598_v17  ;;  %615 = vst [vmem:[%s583_s29 + $0x88] sm:$0xff] (%p1058_p9), %v614_v25 }
 0x12a   : > { %561 = vst [vmem:[%s1191_s23 + $0x30] sm:$0xff] %v545_v10  ;;  %569 = vst [vmem:[%s1191_s23 + $0x70] sm:$0xff] %v553_v11  ;;  %v546_v14 = vadd.f32 %v536_v47, %v449_v12  ;;  %v554_v15 = vadd.f32 %v536_v47, %v473_v13  ;;  %v616_v26 = vld [vmem:[%s1191_s23 + $0x50] sm:$0xff] (%p1058_p9) }
 0x12b   : > { %v602_v19 = vld [vmem:[%s1191_s23 + $0x18] sm:$0xff] (%p1058_p9)  ;;  %601 = vst [vmem:[%s583_s29 + $0x20] sm:$0xff] (%p1058_p9), %v600_v18  ;;  %617 = vst [vmem:[%s583_s29 + $0xa0] sm:$0xff] (%p1058_p9), %v616_v26 }
 0x12c   : > { %562 = vst [vmem:[%s1191_s23 + $0x38] sm:$0xff] %v546_v14  ;;  %570 = vst [vmem:[%s1191_s23 + $0x78] sm:$0xff] %v554_v15  ;;  %v618_v27 = vld [vmem:[%s1191_s23 + $0x58] sm:$0xff] (%p1058_p9) }
 0x12d   : > { %v604_v20 = vld [vmem:[%s1191_s23 + $0x20] sm:$0xff]  ;;  %603 = vst [vmem:[%s583_s29 + $0x28] sm:$0xff] %v602_v19  ;;  %619 = vst [vmem:[%s583_s29 + $0xa8] sm:$0xff] %v618_v27 }
 0x12e   : > { %605 = vst [vmem:[%s583_s29 + $0x40] sm:$0xff] %v604_v20  ;;  %v620_v28 = vld [vmem:[%s1191_s23 + $0x60] sm:$0xff] }
 0x12f   : > { %v606_v21 = vld [vmem:[%s1191_s23 + $0x28] sm:$0xff]  ;;  %621 = vst [vmem:[%s583_s29 + $0xc0] sm:$0xff] %v620_v28 }
 0x130   : > { %607 = vst [vmem:[%s583_s29 + $0x48] sm:$0xff] %v606_v21  ;;  %v622_v29 = vld [vmem:[%s1191_s23 + $0x68] sm:$0xff] }
 0x131   : > { %v608_v22 = vld [vmem:[%s1191_s23 + $0x30] sm:$0xff]  ;;  %623 = vst [vmem:[%s583_s29 + $0xc8] sm:$0xff] %v622_v29 }
 0x132   : > { %609 = vst [vmem:[%s583_s29 + $0x60] sm:$0xff] %v608_v22  ;;  %v624_v30 = vld [vmem:[%s1191_s23 + $0x70] sm:$0xff] }
 0x133   : > { %v610_v23 = vld [vmem:[%s1191_s23 + $0x38] sm:$0xff]  ;;  %625 = vst [vmem:[%s583_s29 + $0xe0] sm:$0xff] %v624_v30 }
 0x134   : > { %611 = vst [vmem:[%s583_s29 + $0x68] sm:$0xff] %v610_v23  ;;  %v626_v31 = vld [vmem:[%s1191_s23 + $0x78] sm:$0xff] }
 0x135   : > { %627 = vst [vmem:[%s583_s29 + $0xe8] sm:$0xff] %v626_v31 }
 0x136 PF: > { %s19_s17 = sadd.s32 1, %s980_s17   ;;  %s1258_s12 = smov %s964_s13 }
 0x137   : > { %p16_p8 = scmp.ge.s32.totalorder %s19_s17, 4   ;;  %s1259_s13 = smov %s968_s14 }
 0x138   : > { %s1260_s14 = smov %s1056_s24  ;;  %s1261_s15 = smov %s976_s16 }
 0x139   : > { %s1262_s16 = smov %s1264_s19  ;;  %18 = sbr.rel (!%p16_p8) target bundleno = 6 (0x6), region = 119 }
 0x13e   :  { %643 = vsyncpa [#allocation4], 1 }
 0x13f   :  { %645 = vsyncpa [#allocation4 + $0x1], 1 }
 0x140   :  { %646 = vsyncpa [#allocation6], 1 }
 0x141   :  { %648 = vsyncpa [#allocation6 + $0x1], 1 }

// kernel: language_model_forward.4
= control target key start
LH: loop header
LB: loop body
LE: loop exit
PB: predicated region body
PF: predicated region fallthrough
CT: control target
= control target key end

     0   :  { %14 = vsyncpa [#allocation3], 0  ;;  %s3935_s27 = smov [#allocation2]   ;;  %s6704_s0 = inlined_call_operand.vmem [shape: f32[8,8,512], index: 0, kind: input, shape index: {}]   ;;  %s6705_s1 = inlined_call_operand.hbm [shape: f32[1,128,512], index: 1, kind: input, shape index: {}]   ;;  %s6706_s2 = inlined_call_operand.vmem [shape: f32[2,128,512], index: 2, kind: input, shape index: {}]   ;;  %s6707_s3 = inlined_call_operand.vmem [shape: f32[1,1,512], index: 3, kind: input, shape index: {}]   ;;  %s6708_s4 = inlined_call_operand.vmem [shape: f32[2,8,128], index: 4, kind: input, shape index: {}]   ;;  %s6709_s5 = inlined_call_operand.vmem [shape: f32[2,8,128], index: 5, kind: input, shape index: {}]   ;;  %s6710_s6 = inlined_call_operand.vmem [shape: f32[8,8,128], index: 6, kind: output, shape index: {0}]   ;;  %s6711_s7 = inlined_call_operand.vmem [shape: f32[2,8,128], index: 7, kind: output, shape index: {1}]   ;;  %s6712_s8 = inlined_call_operand.vmem [shape: f32[2,8,128], index: 8, kind: output, shape index: {2}]  }
   0x1   :  { %s22_s28 = sshll.u32 %s3935_s27, 4  ;;  %s23_s28 = int_to_ptr.vmem [resolvable:$true] %s22_s28 }
   0x2   :  { %s3921_s29 = scalar_lea.vmem %s23_s28, 8192  ;;  %p3926_p1 = scmp.lt.s32.totalorder %s23_s28, %s23_s28 }
   0x3   :  { %p3922_p0 = scmp.ne.s32.totalorder %s23_s28, %s3921_s29  ;;  %p3927_p2 = scmp.lt.s32.totalorder %s3921_s29, %s3921_s29 }
   0x5   :  { %p3928_p3 = por %p3927_p2, %p3926_p1 }
   0x7   :  { %p3929_p4 = pnand %p3928_p3, %p3922_p0 }
   0x9   :  { %3932 = shalt.err (!%p3929_p4)
}
   0xa   :  { %s3936_s30 = smov 512   ;;  %s3937_s9 = smov 32  }
   0xb   :  { %28 = dma.hbm_to_vmem [thread:$0]  %s6705_s1, 8192, %s23_s28, [#allocation3], %s3936_s30, %s3936_s30, %s3937_s9  }
   0xc   :  { %3933 = dma.done.wait [#allocation3], 8192  }
   0xd   :  { %3934 = vsyncadd [#allocation3], 4294959104 }
   0xe   :  { %v3990_v0 = vld [vmem:[%s6706_s2 + $0x1e8] sm:$0xff]  ;;  %v3995_v1 = vld [vmem:[%s6706_s2 + $0x1e0] sm:$0xff]  ;;  %v6713_v4 = vmov 0.0   ;;  %v4037_v9 = vld [vmem:[%s6706_s2 + $0x1f8] sm:$0xff] }
   0xf   :  { %6890 = vst [vmem:[#allocation6_spill] sm:$0xff] %v3990_v0  ;;  %v4000_v2 = vld [vmem:[%s6706_s2 + $0x1c8] sm:$0xff]  ;;  %110 = vmatprep.subr.mxu0 %v3990_v0  ;;  %v4006_v3 = vld [vmem:[%s6706_s2 + $0x1c0] sm:$0xff]  ;;  %174 = vmatprep.mubr.f32.mxu0 %v6713_v4  ;;  %6891 = vst [vmem:[#allocation7_spill] sm:$0xff] %v4037_v9 }
  0x10   :  { %111 = vmatpush1.msra.mxu0 %v3995_v1  ;;  %v4013_v5 = vld [vmem:[%s6706_s2 + $0x1a8] sm:$0xff]  ;;  %245 = vmatprep.mubr.f32.mxu1 %v6713_v4  ;;  %v4020_v6 = vld [vmem:[%s6706_s2 + $0x1a0] sm:$0xff]  ;;  %v4049_v11 = vld [vmem:[%s6706_s2 + $0x1f0] sm:$0xff] }
  0x11   :  { %112 = vmatprep.subr.mxu0 %v4000_v2  ;;  %v4026_v7 = vld [vmem:[%s6706_s2 + $0x188] sm:$0xff]  ;;  %v4032_v8 = vld [vmem:[%s6706_s2 + $0x180] sm:$0xff]  ;;  %181 = vmatprep.subr.mxu1 %v4037_v9  ;;  %v4061_v13 = vld [vmem:[%s6706_s2 + $0x1d8] sm:$0xff] }
  0x12   :  { %113 = vmatpush1.msra.mxu0 %v4006_v3  ;;  %v4043_v10 = vld [vmem:[%s6706_s2 + $0x168] sm:$0xff]  ;;  %v4055_v12 = vld [vmem:[%s6706_s2 + $0x160] sm:$0xff]  ;;  %182 = vmatpush1.msra.mxu1 %v4049_v11  ;;  %v4066_v14 = vld [vmem:[%s6706_s2 + $0x1d0] sm:$0xff] }
  0x13   :  { %114 = vmatprep.subr.mxu0 %v4013_v5  ;;  %v4072_v15 = vld [vmem:[%s6706_s2 + $0x148] sm:$0xff]  ;;  %183 = vmatprep.subr.mxu1 %v4061_v13  ;;  %v4078_v16 = vld [vmem:[%s6706_s2 + $0x1b8] sm:$0xff]  ;;  %v4084_v17 = vld [vmem:[%s6706_s2 + $0x140] sm:$0xff] }
  0x14   :  { %115 = vmatpush1.msra.mxu0 %v4020_v6  ;;  %184 = vmatpush1.msra.mxu1 %v4066_v14  ;;  %v4090_v18 = vld [vmem:[%s6706_s2 + $0x1b0] sm:$0xff]  ;;  %v4095_v19 = vld [vmem:[%s6706_s2 + $0x198] sm:$0xff]  ;;  %v4101_v20 = vld [vmem:[%s6706_s2 + $0x128] sm:$0xff] }
  0x15   :  { %116 = vmatprep.subr.mxu0 %v4026_v7  ;;  %185 = vmatprep.subr.mxu1 %v4078_v16  ;;  %v4107_v21 = vld [vmem:[%s6706_s2 + $0x190] sm:$0xff]  ;;  %v4113_v22 = vld [vmem:[%s6706_s2 + $0x120] sm:$0xff]  ;;  %v4119_v23 = vld [vmem:[%s6706_s2 + $0x178] sm:$0xff] }
  0x16   :  { %117 = vmatpush1.msra.mxu0 %v4032_v8  ;;  %186 = vmatpush1.msra.mxu1 %v4090_v18  ;;  %v4125_v24 = vld [vmem:[%s6706_s2 + $0x108] sm:$0xff]  ;;  %v4131_v25 = vld [vmem:[%s6706_s2 + $0x170] sm:$0xff]  ;;  %v4137_v26 = vld [vmem:[%s6706_s2 + $0x100] sm:$0xff] }
  0x17   :  { %118 = vmatprep.subr.mxu0 %v4043_v10  ;;  %187 = vmatprep.subr.mxu1 %v4095_v19  ;;  %v4143_v27 = vld [vmem:[%s6706_s2 + $0x158] sm:$0xff]  ;;  %v4149_v28 = vld [vmem:[%s6706_s2 + $0xe8] sm:$0xff]  ;;  %v4155_v29 = vld [vmem:[%s6706_s2 + $0x150] sm:$0xff] }
  0x18   :  { %119 = vmatpush1.msra.mxu0 %v4055_v12  ;;  %188 = vmatpush1.msra.mxu1 %v4107_v21  ;;  %v4161_v30 = vld [vmem:[%s6706_s2 + $0xe0] sm:$0xff]  ;;  %v4167_v31 = vld [vmem:[%s6706_s2 + $0x138] sm:$0xff]  ;;  %v4173_v32 = vld [vmem:[%s6706_s2 + $0xc8] sm:$0xff] }
  0x19   :  { %120 = vmatprep.subr.mxu0 %v4072_v15  ;;  %189 = vmatprep.subr.mxu1 %v4119_v23  ;;  %v4179_v33 = vld [vmem:[%s6706_s2 + $0x130] sm:$0xff]  ;;  %v4185_v34 = vld [vmem:[%s6706_s2 + $0xc0] sm:$0xff]  ;;  %v4191_v35 = vld [vmem:[%s6706_s2 + $0x118] sm:$0xff] }
  0x1a   :  { %121 = vmatpush1.msra.mxu0 %v4084_v17  ;;  %190 = vmatpush1.msra.mxu1 %v4131_v25  ;;  %v4197_v36 = vld [vmem:[%s6706_s2 + $0xa8] sm:$0xff]  ;;  %v4203_v37 = vld [vmem:[%s6706_s2 + $0x110] sm:$0xff]  ;;  %v4209_v38 = vld [vmem:[%s6706_s2 + $0xa0] sm:$0xff] }
  0x1b   :  { %122 = vmatprep.subr.mxu0 %v4101_v20  ;;  %191 = vmatprep.subr.mxu1 %v4143_v27  ;;  %v4215_v39 = vld [vmem:[%s6706_s2 + $0xf8] sm:$0xff]  ;;  %v4221_v40 = vld [vmem:[%s6706_s2 + $0x88] sm:$0xff]  ;;  %v4227_v41 = vld [vmem:[%s6706_s2 + $0xf0] sm:$0xff] }
  0x1c   :  { %123 = vmatpush1.msra.mxu0 %v4113_v22  ;;  %192 = vmatpush1.msra.mxu1 %v4155_v29  ;;  %v4233_v42 = vld [vmem:[%s6706_s2 + $0x80] sm:$0xff]  ;;  %v4239_v43 = vld [vmem:[%s6706_s2 + $0xd8] sm:$0xff]  ;;  %v4245_v44 = vld [vmem:[%s6706_s2 + $0x68] sm:$0xff] }
  0x1d   :  { %124 = vmatprep.subr.mxu0 %v4125_v24  ;;  %193 = vmatprep.subr.mxu1 %v4167_v31  ;;  %6892 = vst [vmem:[#allocation8_spill] sm:$0xff] %v4245_v44  ;;  %v4251_v45 = vld [vmem:[%s6706_s2 + $0xd0] sm:$0xff]  ;;  %v4257_v46 = vld [vmem:[%s6706_s2 + $0x60] sm:$0xff]  ;;  %v4263_v47 = vld [vmem:[%s6706_s2 + $0xb8] sm:$0xff] }
  0x1e   :  { %125 = vmatpush1.msra.mxu0 %v4137_v26  ;;  %194 = vmatpush1.msra.mxu1 %v4179_v33  ;;  %6893 = vst [vmem:[#allocation9_spill] sm:$0xff] %v4257_v46  ;;  %v4269_v48 = vld [vmem:[%s6706_s2 + $0x48] sm:$0xff]  ;;  %v4275_v49 = vld [vmem:[%s6706_s2 + $0xb0] sm:$0xff]  ;;  %v4281_v50 = vld [vmem:[%s6706_s2 + $0x40] sm:$0xff] }
  0x1f   :  { %126 = vmatprep.subr.mxu0 %v4149_v28  ;;  %195 = vmatprep.subr.mxu1 %v4191_v35  ;;  %6894 = vst [vmem:[#allocation10_spill] sm:$0xff] %v4269_v48  ;;  %6895 = vst [vmem:[#allocation11_spill] sm:$0xff] %v4281_v50  ;;  %v4287_v51 = vld [vmem:[%s6706_s2 + $0x98] sm:$0xff]  ;;  %v4293_v52 = vld [vmem:[%s6706_s2 + $0x28] sm:$0xff] }
  0x20   :  { %127 = vmatpush1.msra.mxu0 %v4161_v30  ;;  %196 = vmatpush1.msra.mxu1 %v4203_v37  ;;  %6896 = vst [vmem:[#allocation12_spill] sm:$0xff] %v4293_v52  ;;  %v4299_v53 = vld [vmem:[%s6706_s2 + $0x90] sm:$0xff]  ;;  %v4305_v54 = vld [vmem:[%s6706_s2 + $0x20] sm:$0xff]  ;;  %v4311_v55 = vld [vmem:[%s6706_s2 + $0x78] sm:$0xff] }
  0x21   :  { %128 = vmatprep.subr.mxu0 %v4173_v32  ;;  %197 = vmatprep.subr.mxu1 %v4215_v39  ;;  %6897 = vst [vmem:[#allocation13_spill] sm:$0xff] %v4305_v54  ;;  %6898 = vst [vmem:[#allocation14_spill] sm:$0xff] %v4311_v55  ;;  %v4317_v56 = vld [vmem:[%s6706_s2 + $0x8] sm:$0xff]  ;;  %v4323_v57 = vld [vmem:[%s6706_s2 + $0x70] sm:$0xff] }
  0x22   :  { %129 = vmatpush1.msra.mxu0 %v4185_v34  ;;  %198 = vmatpush1.msra.mxu1 %v4227_v41  ;;  %6899 = vst [vmem:[#allocation15_spill] sm:$0xff] %v4317_v56  ;;  %6900 = vst [vmem:[#allocation16_spill] sm:$0xff] %v4323_v57  ;;  %v4329_v58 = vld [vmem:[%s6706_s2] sm:$0xff]  ;;  %v4335_v59 = vld [vmem:[%s6706_s2 + $0x58] sm:$0xff] }
  0x23   :  { %130 = vmatprep.subr.mxu0 %v4197_v36  ;;  %199 = vmatprep.subr.mxu1 %v4239_v43  ;;  %6901 = vst [vmem:[#allocation17_spill] sm:$0xff] %v4329_v58  ;;  %6902 = vst [vmem:[#allocation18_spill] sm:$0xff] %v4335_v59  ;;  %v104_v60 = vld [vmem:[%s6708_s4] sm:$0xff]  ;;  %v4345_v61 = vld [vmem:[%s6706_s2 + $0x50] sm:$0xff] }
  0x24   :  { %131 = vmatpush1.msra.mxu0 %v4209_v38  ;;  %200 = vmatpush1.msra.mxu1 %v4251_v45  ;;  %6903 = vst [vmem:[#allocation19_spill] sm:$0xff] %v4345_v61  ;;  %v4352_v62 = vld [vmem:[%s6706_s2 + $0x38] sm:$0xff]  ;;  %v4359_v63 = vld [vmem:[%s6706_s2 + $0x30] sm:$0xff] }
  0x25   :  { %132 = vmatprep.subr.mxu0 %v4221_v40  ;;  %201 = vmatprep.subr.mxu1 %v4263_v47  ;;  %6904 = vst [vmem:[#allocation20_spill] sm:$0xff] %v4352_v62  ;;  %6905 = vst [vmem:[#allocation21_spill] sm:$0xff] %v4359_v63  ;;  %v4365_v4 = vld [vmem:[%s6706_s2 + $0x18] sm:$0xff] }
  0x26   :  { %133 = vmatpush1.msra.mxu0 %v4233_v42  ;;  %202 = vmatpush1.msra.mxu1 %v4275_v49  ;;  %6906 = vst [vmem:[#allocation22_spill] sm:$0xff] %v4365_v4 }
  0x27   :  { %134 = vmatprep.subr.mxu0 %v4245_v44  ;;  %203 = vmatprep.subr.mxu1 %v4287_v51 }
  0x28   :  { %135 = vmatpush1.msra.mxu0 %v4257_v46  ;;  %204 = vmatpush1.msra.mxu1 %v4299_v53 }
  0x29   :  { %136 = vmatprep.subr.mxu0 %v4269_v48  ;;  %205 = vmatprep.subr.mxu1 %v4311_v55 }
  0x2a   :  { %137 = vmatpush1.msra.mxu0 %v4281_v50  ;;  %206 = vmatpush1.msra.mxu1 %v4323_v57 }
  0x2b   :  { %138 = vmatprep.subr.mxu0 %v4293_v52  ;;  %207 = vmatprep.subr.mxu1 %v4335_v59 }
  0x2c   :  { %139 = vmatpush1.msra.mxu0 %v4305_v54  ;;  %208 = vmatpush1.msra.mxu1 %v4345_v61 }
  0x2d   :  { %140 = vmatprep.subr.mxu0 %v4317_v56  ;;  %209 = vmatprep.subr.mxu1 %v4352_v62 }
  0x2e   :  { %141 = vmatpush1.msra.mxu0 %v4329_v58  ;;  %v4371_v58 = vld [vmem:[%s6706_s2 + $0x10] sm:$0xff]  ;;  %210 = vmatpush1.msra.mxu1 %v4359_v63 }
  0x2f   :  { %175 = vmatmul.mubr.f32.vlgmr.msra.gmra.mxu0 %v104_v60  ;;  %6907 = vst [vmem:[#allocation23_spill] sm:$0xff] %v4371_v58  ;;  %286 = vmatprep.subr.mxu0 %v3990_v0 }
  0x30   :  { %287 = vmatpush1.msra.mxu0 %v3995_v1  ;;  %211 = vmatprep.subr.mxu1 %v4365_v4 }
  0x31   :  { %288 = vmatprep.subr.mxu0 %v4000_v2  ;;  %212 = vmatpush1.msra.mxu1 %v4371_v58 }
  0x32   :  { %289 = vmatpush1.msra.mxu0 %v4006_v3  ;;  %246 = vmatmul.mubr.f32.vlgmr.msra.gmra.mxu1 %v104_v60  ;;  %v6908_v60 = vld [vmem:[#allocation17_spill] sm:$0xff] }
  0x33   :  { %357 = vmatprep.subr.mxu1 %v4037_v9  ;;  %290 = vmatprep.subr.mxu0 %v4013_v5 }
  0x34   :  { %358 = vmatpush1.msra.mxu1 %v4049_v11  ;;  %291 = vmatpush1.msra.mxu0 %v4020_v6 }
  0x35   :  { %359 = vmatprep.subr.mxu1 %v4061_v13  ;;  %292 = vmatprep.subr.mxu0 %v4026_v7 }
  0x36   :  { %360 = vmatpush1.msra.mxu1 %v4066_v14  ;;  %293 = vmatpush1.msra.mxu0 %v4032_v8 }
  0x37   :  { %361 = vmatprep.subr.mxu1 %v4078_v16  ;;  %294 = vmatprep.subr.mxu0 %v4043_v10 }
  0x38   :  { %362 = vmatpush1.msra.mxu1 %v4090_v18  ;;  %295 = vmatpush1.msra.mxu0 %v4055_v12 }
  0x39   :  { %363 = vmatprep.subr.mxu1 %v4095_v19  ;;  %296 = vmatprep.subr.mxu0 %v4072_v15 }
  0x3a   :  { %364 = vmatpush1.msra.mxu1 %v4107_v21  ;;  %297 = vmatpush1.msra.mxu0 %v4084_v17 }
  0x3b   :  { %365 = vmatprep.subr.mxu1 %v4119_v23  ;;  %298 = vmatprep.subr.mxu0 %v4101_v20 }
  0x3c   :  { %366 = vmatpush1.msra.mxu1 %v4131_v25  ;;  %299 = vmatpush1.msra.mxu0 %v4113_v22 }
  0x3d   :  { %367 = vmatprep.subr.mxu1 %v4143_v27  ;;  %300 = vmatprep.subr.mxu0 %v4125_v24 }
  0x3e   :  { %368 = vmatpush1.msra.mxu1 %v4155_v29  ;;  %301 = vmatpush1.msra.mxu0 %v4137_v26 }
  0x3f   :  { %369 = vmatprep.subr.mxu1 %v4167_v31  ;;  %302 = vmatprep.subr.mxu0 %v4149_v28 }
  0x40   :  { %370 = vmatpush1.msra.mxu1 %v4179_v33  ;;  %303 = vmatpush1.msra.mxu0 %v4161_v30 }
  0x41   :  { %371 = vmatprep.subr.mxu1 %v4191_v35  ;;  %304 = vmatprep.subr.mxu0 %v4173_v32 }
  0x42   :  { %372 = vmatpush1.msra.mxu1 %v4203_v37  ;;  %305 = vmatpush1.msra.mxu0 %v4185_v34 }
  0x43   :  { %373 = vmatprep.subr.mxu1 %v4215_v39  ;;  %306 = vmatprep.subr.mxu0 %v4197_v36 }
  0x44   :  { %374 = vmatpush1.msra.mxu1 %v4227_v41  ;;  %307 = vmatpush1.msra.mxu0 %v4209_v38 }
  0x45   :  { %375 = vmatprep.subr.mxu1 %v4239_v43  ;;  %308 = vmatprep.subr.mxu0 %v4221_v40 }
  0x46   :  { %376 = vmatpush1.msra.mxu1 %v4251_v45  ;;  %309 = vmatpush1.msra.mxu0 %v4233_v42 }
  0x47   :  { %377 = vmatprep.subr.mxu1 %v4263_v47  ;;  %310 = vmatprep.subr.mxu0 %v4245_v44 }
  0x48   :  { %378 = vmatpush1.msra.mxu1 %v4275_v49  ;;  %311 = vmatpush1.msra.mxu0 %v4257_v46 }
  0x49   :  { %379 = vmatprep.subr.mxu1 %v4287_v51  ;;  %312 = vmatprep.subr.mxu0 %v4269_v48  ;;  %v6909_v48 = vmov 0.0  }
  0x4a   :  { %380 = vmatpush1.msra.mxu1 %v4299_v53  ;;  %313 = vmatpush1.msra.mxu0 %v4281_v50 }
  0x4b   :  { %381 = vmatprep.subr.mxu1 %v4311_v55  ;;  %314 = vmatprep.subr.mxu0 %v4293_v52 }
  0x4c   :  { %382 = vmatpush1.msra.mxu1 %v4323_v57  ;;  %315 = vmatpush1.msra.mxu0 %v4305_v54 }
  0x4d   :  { %383 = vmatprep.subr.mxu1 %v4335_v59  ;;  %316 = vmatprep.subr.mxu0 %v4317_v56  ;;  %v106_v56 = vld [vmem:[%s6704_s0] sm:$0xff] }
  0x4e   :  { %384 = vmatpush1.msra.mxu1 %v4345_v61  ;;  %317 = vmatpush1.msra.mxu0 %v6908_v60  ;;  %v107_v60 = vld [vmem:[%s6704_s0 + $0x8] sm:$0xff]  ;;  %v108_v61 = vld [vmem:[%s6704_s0 + $0x10] sm:$0xff] }
  0x4f   :  { %385 = vmatprep.subr.mxu1 %v4352_v62  ;;  %350 = vmatprep.mubr.f32.mxu0 %v6909_v48 }
  0x50   :  { %386 = vmatpush1.msra.mxu1 %v4359_v63  ;;  %421 = vmatprep.mubr.f32.mxu1 %v6909_v48 }
  0x51   :  { %387 = vmatprep.subr.mxu1 %v4365_v4  ;;  %463 = vmatprep.subr.mxu0 %v3990_v0 }
  0x52   :  { %388 = vmatpush1.msra.mxu1 %v4371_v58 }
  0x53   :  { %534 = vmatprep.subr.mxu1 %v4037_v9  ;;  %v109_v9 = vld [vmem:[%s6704_s0 + $0x18] sm:$0xff] }
  0xef   :  { %v176_v54 = vpop.f32.mrf.mxu0 }
  0xf0   :  { %v252_v63 = vadd.f32 %v176_v54, %v106_v56 }
  0xf1   :  { %v178_v62 = vpop.f32.mrf.mxu0 }
  0xf2   :  { %v3367_v4 = vmul.f32 -1.442695, %v252_v63  ;;  %v253_v52 = vadd.f32 %v178_v62, %v107_v60  ;;  %v247_v58 = vpop.f32.mrf.mxu1  ;;  %v105_v60 = vld [vmem:[%s6709_s5] sm:$0xff] }
  0xf3   :  { %v254_v59 = vadd.f32 %v247_v58, %v108_v61  ;;  %v6912_v61 = vld [vmem:[#allocation16_spill] sm:$0xff] }
  0xf4   :  { %3529 = vpow2.f32 %v3367_v4  ;;  %v3368_v48 = vmul.f32 -1.442695, %v253_v52  ;;  %v249_v0 = vpop.f32.mrf.mxu1 }
  0xf5   :  { %v255_v50 = vadd.f32 %v249_v0, %v109_v9 }
  0xf6   :  { %3531 = vpow2.f32 %v3368_v48 }
  0xf7   :  { %v3369_v57 = vmul.f32 -1.442695, %v255_v50  ;;  %3533 = vtanh.f32 %v254_v59 }
  0xf9   :  { %3535 = vpow2.f32 %v3369_v57 }
 0x101   :  { %v3530_v54 = vpop.eup %3529 }
 0x102   :  { %v259_v56 = vadd.f32 1.0, %v3530_v54  ;;  %v6913_v54 = vld [vmem:[#allocation10_spill] sm:$0xff] }
 0x103   :  { %v3532_v62 = vpop.eup %3531 }
 0x104   :  { %3537 = vrcp.f32 %v259_v56  ;;  %v265_v4 = vadd.f32 1.0, %v3532_v62  ;;  %v3534_v48 = vpop.eup %3533  ;;  %v6914_v56 = vld [vmem:[#allocation18_spill] sm:$0xff]  ;;  %v6915_v62 = vld [vmem:[#allocation11_spill] sm:$0xff] }
 0x106   :  { %3539 = vrcp.f32 %v265_v4  ;;  %v3536_v52 = vpop.eup %3535  ;;  %v6916_v4 = vld [vmem:[#allocation19_spill] sm:$0xff] }
 0x107   :  { %v272_v55 = vadd.f32 1.0, %v3536_v52  ;;  %v6918_v52 = vld [vmem:[#allocation20_spill] sm:$0xff] }
 0x109   :  { %3541 = vrcp.f32 %v272_v55  ;;  %v6911_v55 = vld [vmem:[#allocation9_spill] sm:$0xff] }
 0x111   :  { %v3538_v63 = vpop.eup %3537 }
 0x112   :  { %v276_v9 = vmul.f32 %v3538_v63, %v3534_v48  ;;  %v6917_v48 = vld [vmem:[#allocation12_spill] sm:$0xff]  ;;  %v6919_v63 = vld [vmem:[#allocation13_spill] sm:$0xff] }
 0x113   :  { %v3540_v46 = vpop.eup %3539 }
 0x114   :  { %v275_v0 = vmul.f32 %v3540_v46, %v105_v60  ;;  %v6910_v46 = vld [vmem:[#allocation14_spill] sm:$0xff]  ;;  %v6920_v60 = vld [vmem:[#allocation21_spill] sm:$0xff] }
 0x116   :  { %v4459_v50 = vadd.f32 %v276_v9, %v275_v0  ;;  %v3542_v57 = vpop.eup %3541  ;;  %v6921_v0 = vld [vmem:[#allocation15_spill] sm:$0xff]  ;;  %v6922_v9 = vld [vmem:[#allocation22_spill] sm:$0xff] }
 0x118   :  { %3543 = vtanh.f32 %v4459_v50 }
 0x125   :  { %v3544_v58 = vpop.eup %3543 }
 0x126   :  { %v279_v59 = vmul.f32 %v3544_v58, %v3542_v57  ;;  %v6923_v57 = vld [vmem:[#allocation17_spill] sm:$0xff]  ;;  %v6924_v58 = vmov 0.0  }
 0x128   :  { %280 = vst [vmem:[%s6710_s6] sm:$0xff] %v279_v59  ;;  %351 = vmatmul.mubr.f32.vlgmr.msra.gmra.mxu0 %v279_v59  ;;  %422 = vmatmul.mubr.f32.vlgmr.msra.gmra.mxu1 %v279_v59  ;;  %v6925_v59 = vld [vmem:[#allocation23_spill] sm:$0xff] }
 0x129   :  { %464 = vmatpush1.msra.mxu0 %v3995_v1  ;;  %535 = vmatpush1.msra.mxu1 %v4049_v11 }
 0x12a   :  { %465 = vmatprep.subr.mxu0 %v4000_v2  ;;  %536 = vmatprep.subr.mxu1 %v4061_v13 }
 0x12b   :  { %466 = vmatpush1.msra.mxu0 %v4006_v3  ;;  %537 = vmatpush1.msra.mxu1 %v4066_v14 }
 0x12c   :  { %467 = vmatprep.subr.mxu0 %v4013_v5  ;;  %538 = vmatprep.subr.mxu1 %v4078_v16 }
 0x12d   :  { %468 = vmatpush1.msra.mxu0 %v4020_v6  ;;  %539 = vmatpush1.msra.mxu1 %v4090_v18 }
 0x12e   :  { %469 = vmatprep.subr.mxu0 %v4026_v7  ;;  %540 = vmatprep.subr.mxu1 %v4095_v19 }
 0x12f   :  { %470 = vmatpush1.msra.mxu0 %v4032_v8  ;;  %541 = vmatpush1.msra.mxu1 %v4107_v21 }
 0x130   :  { %471 = vmatprep.subr.mxu0 %v4043_v10  ;;  %542 = vmatprep.subr.mxu1 %v4119_v23 }
 0x131   :  { %472 = vmatpush1.msra.mxu0 %v4055_v12  ;;  %543 = vmatpush1.msra.mxu1 %v4131_v25 }
 0x132   :  { %473 = vmatprep.subr.mxu0 %v4072_v15  ;;  %544 = vmatprep.subr.mxu1 %v4143_v27 }
 0x133   :  { %474 = vmatpush1.msra.mxu0 %v4084_v17  ;;  %545 = vmatpush1.msra.mxu1 %v4155_v29 }
 0x134   :  { %475 = vmatprep.subr.mxu0 %v4101_v20  ;;  %546 = vmatprep.subr.mxu1 %v4167_v31 }
 0x135   :  { %476 = vmatpush1.msra.mxu0 %v4113_v22  ;;  %547 = vmatpush1.msra.mxu1 %v4179_v33 }
 0x136   :  { %477 = vmatprep.subr.mxu0 %v4125_v24  ;;  %548 = vmatprep.subr.mxu1 %v4191_v35 }
 0x137   :  { %478 = vmatpush1.msra.mxu0 %v4137_v26  ;;  %549 = vmatpush1.msra.mxu1 %v4203_v37 }
 0x138   :  { %479 = vmatprep.subr.mxu0 %v4149_v28  ;;  %550 = vmatprep.subr.mxu1 %v4215_v39 }
 0x139   :  { %480 = vmatpush1.msra.mxu0 %v4161_v30  ;;  %551 = vmatpush1.msra.mxu1 %v4227_v41 }
 0x13a   :  { %481 = vmatprep.subr.mxu0 %v4173_v32  ;;  %552 = vmatprep.subr.mxu1 %v4239_v43 }
 0x13b   :  { %482 = vmatpush1.msra.mxu0 %v4185_v34  ;;  %553 = vmatpush1.msra.mxu1 %v4251_v45 }
 0x13c   :  { %483 = vmatprep.subr.mxu0 %v4197_v36  ;;  %554 = vmatprep.subr.mxu1 %v4263_v47 }
 0x13d   :  { %484 = vmatpush1.msra.mxu0 %v4209_v38  ;;  %555 = vmatpush1.msra.mxu1 %v4275_v49 }
 0x13e   :  { %485 = vmatprep.subr.mxu0 %v4221_v40  ;;  %556 = vmatprep.subr.mxu1 %v4287_v51 }
 0x13f   :  { %486 = vmatpush1.msra.mxu0 %v4233_v42  ;;  %557 = vmatpush1.msra.mxu1 %v4299_v53 }
 0x140   :  { %487 = vmatprep.subr.mxu0 %v4245_v44  ;;  %558 = vmatprep.subr.mxu1 %v6910_v46 }
 0x141   :  { %488 = vmatpush1.msra.mxu0 %v6911_v55  ;;  %559 = vmatpush1.msra.mxu1 %v6912_v61 }
 0x142   :  { %489 = vmatprep.subr.mxu0 %v6913_v54  ;;  %560 = vmatprep.subr.mxu1 %v6914_v56  ;;  %v3372_v54 = vld [vmem:[%s6704_s0 + $0x30] sm:$0xff] }
 0x143   :  { %490 = vmatpush1.msra.mxu0 %v6915_v62  ;;  %561 = vmatpush1.msra.mxu1 %v6916_v4  ;;  %v6926_v4 = vld [vmem:[#allocation6_spill] sm:$0xff] }
 0x144   :  { %491 = vmatprep.subr.mxu0 %v6917_v48  ;;  %562 = vmatprep.subr.mxu1 %v6918_v52  ;;  %v6927_v48 = vld [vmem:[#allocation7_spill] sm:$0xff] }
 0x145   :  { %492 = vmatpush1.msra.mxu0 %v6919_v63  ;;  %563 = vmatpush1.msra.mxu1 %v6920_v60  ;;  %v3370_v60 = vld [vmem:[%s6704_s0 + $0x20] sm:$0xff] }
 0x146   :  { %493 = vmatprep.subr.mxu0 %v6921_v0  ;;  %564 = vmatprep.subr.mxu1 %v6922_v9  ;;  %v3371_v9 = vld [vmem:[%s6704_s0 + $0x28] sm:$0xff] }
 0x147   :  { %494 = vmatpush1.msra.mxu0 %v6923_v57  ;;  %527 = vmatprep.mubr.f32.mxu0 %v6924_v58 }
 0x148   :  { %565 = vmatpush1.msra.mxu1 %v6925_v59  ;;  %598 = vmatprep.mubr.f32.mxu1 %v6924_v58 }
 0x149   :  { %640 = vmatprep.subr.mxu0 %v6926_v4  ;;  %711 = vmatprep.subr.mxu1 %v6927_v48  ;;  %v3373_v48 = vld [vmem:[%s6704_s0 + $0x38] sm:$0xff] }
 0x1e8   :  { %v352_v63 = vpop.f32.mrf.mxu0  ;;  %v423_v59 = vpop.f32.mrf.mxu1 }
 0x1e9   :  { %v428_v57 = vadd.f32 %v3370_v60, %v352_v63  ;;  %v430_v63 = vadd.f32 %v3372_v54, %v423_v59  ;;  %v6931_v59 = vld [vmem:[#allocation16_spill] sm:$0xff] }
 0x1ea   :  { %v354_v0 = vpop.f32.mrf.mxu0  ;;  %v425_v4 = vpop.f32.mrf.mxu1 }
 0x1eb   :  { %v3374_v52 = vmul.f32 -1.442695, %v428_v57  ;;  %v429_v62 = vadd.f32 %v3371_v9, %v354_v0  ;;  %v431_v56 = vadd.f32 %v3373_v48, %v425_v4 }
 0x1ed   :  { %3545 = vpow2.f32 %v3374_v52  ;;  %v3375_v58 = vmul.f32 -1.442695, %v429_v62  ;;  %v3376_v61 = vmul.f32 -1.442695, %v431_v56  ;;  %v6930_v56 = vld [vmem:[#allocation9_spill] sm:$0xff] }
 0x1ef   :  { %3547 = vpow2.f32 %v3375_v58 }
 0x1f0   :  { %3549 = vpow2.f32 %v3376_v61 }
 0x1fa   :  { %v3546_v55 = vpop.eup %3545 }
 0x1fb   :  { %v435_v60 = vadd.f32 1.0, %v3546_v55 }
 0x1fc   :  { %v3548_v57 = vpop.eup %3547 }
 0x1fd   :  { %3551 = vrcp.f32 %v435_v60  ;;  %v441_v52 = vadd.f32 1.0, %v3548_v57  ;;  %v3550_v62 = vpop.eup %3549  ;;  %v6933_v60 = vld [vmem:[#allocation18_spill] sm:$0xff]  ;;  %v6934_v57 = vld [vmem:[#allocation11_spill] sm:$0xff] }
 0x1fe   :  { %3553 = vtanh.f32 %v430_v63  ;;  %v448_v46 = vadd.f32 1.0, %v3550_v62  ;;  %v6932_v63 = vld [vmem:[#allocation10_spill] sm:$0xff]  ;;  %v6936_v62 = vld [vmem:[#allocation12_spill] sm:$0xff] }
 0x1ff   :  { %3555 = vrcp.f32 %v441_v52  ;;  %v6935_v52 = vld [vmem:[#allocation19_spill] sm:$0xff] }
 0x200   :  { %3557 = vrcp.f32 %v448_v46  ;;  %v6929_v46 = vld [vmem:[#allocation14_spill] sm:$0xff] }
 0x20a   :  { %v3552_v0 = vpop.eup %3551 }
 0x20b   :  { %v3554_v9 = vpop.eup %3553 }
 0x20c   :  { %v3556_v58 = vpop.eup %3555  ;;  %v452_v4 = vmul.f32 %v3554_v9, %v3552_v0  ;;  %v6937_v0 = vld [vmem:[#allocation20_spill] sm:$0xff]  ;;  %v6938_v9 = vld [vmem:[#allocation13_spill] sm:$0xff] }
 0x20d   :  { %v451_v48 = vmul.f32 %v3556_v58, %v4459_v50  ;;  %v3558_v55 = vpop.eup %3557  ;;  %v6928_v50 = vld [vmem:[#allocation8_spill] sm:$0xff]  ;;  %v6939_v58 = vld [vmem:[#allocation21_spill] sm:$0xff] }
 0x20f   :  { %v4544_v44 = vadd.f32 %v452_v4, %v451_v48  ;;  %v6940_v4 = vld [vmem:[#allocation15_spill] sm:$0xff]  ;;  %v6941_v48 = vld [vmem:[#allocation22_spill] sm:$0xff] }
 0x211   :  { %3559 = vtanh.f32 %v4544_v44 }
 0x21e   :  { %v3560_v54 = vpop.eup %3559 }
 0x21f   :  { %v455_v61 = vmul.f32 %v3560_v54, %v3558_v55  ;;  %v6942_v55 = vld [vmem:[#allocation17_spill] sm:$0xff]  ;;  %v6943_v54 = vmov 0.0  }
 0x221   :  { %3377 = vst [vmem:[%s6710_s6 + $0x8] sm:$0xff] %v455_v61  ;;  %528 = vmatmul.mubr.f32.vlgmr.msra.gmra.mxu0 %v455_v61  ;;  %599 = vmatmul.mubr.f32.vlgmr.msra.gmra.mxu1 %v455_v61  ;;  %v6944_v61 = vld [vmem:[#allocation23_spill] sm:$0xff] }
 0x222   :  { %641 = vmatpush1.msra.mxu0 %v3995_v1  ;;  %712 = vmatpush1.msra.mxu1 %v4049_v11 }
 0x223   :  { %642 = vmatprep.subr.mxu0 %v4000_v2  ;;  %713 = vmatprep.subr.mxu1 %v4061_v13 }
 0x224   :  { %643 = vmatpush1.msra.mxu0 %v4006_v3  ;;  %714 = vmatpush1.msra.mxu1 %v4066_v14 }
 0x225   :  { %644 = vmatprep.subr.mxu0 %v4013_v5  ;;  %715 = vmatprep.subr.mxu1 %v4078_v16 }
 0x226   :  { %645 = vmatpush1.msra.mxu0 %v4020_v6  ;;  %716 = vmatpush1.msra.mxu1 %v4090_v18 }
 0x227   :  { %646 = vmatprep.subr.mxu0 %v4026_v7  ;;  %717 = vmatprep.subr.mxu1 %v4095_v19 }
 0x228   :  { %647 = vmatpush1.msra.mxu0 %v4032_v8  ;;  %718 = vmatpush1.msra.mxu1 %v4107_v21 }
 0x229   :  { %648 = vmatprep.subr.mxu0 %v4043_v10  ;;  %719 = vmatprep.subr.mxu1 %v4119_v23 }
 0x22a   :  { %649 = vmatpush1.msra.mxu0 %v4055_v12  ;;  %720 = vmatpush1.msra.mxu1 %v4131_v25 }
 0x22b   :  { %650 = vmatprep.subr.mxu0 %v4072_v15  ;;  %721 = vmatprep.subr.mxu1 %v4143_v27 }
 0x22c   :  { %651 = vmatpush1.msra.mxu0 %v4084_v17  ;;  %722 = vmatpush1.msra.mxu1 %v4155_v29 }
 0x22d   :  { %652 = vmatprep.subr.mxu0 %v4101_v20  ;;  %723 = vmatprep.subr.mxu1 %v4167_v31 }
 0x22e   :  { %653 = vmatpush1.msra.mxu0 %v4113_v22  ;;  %724 = vmatpush1.msra.mxu1 %v4179_v33 }
 0x22f   :  { %654 = vmatprep.subr.mxu0 %v4125_v24  ;;  %725 = vmatprep.subr.mxu1 %v4191_v35 }
 0x230   :  { %655 = vmatpush1.msra.mxu0 %v4137_v26  ;;  %726 = vmatpush1.msra.mxu1 %v4203_v37 }
 0x231   :  { %656 = vmatprep.subr.mxu0 %v4149_v28  ;;  %727 = vmatprep.subr.mxu1 %v4215_v39 }
 0x232   :  { %657 = vmatpush1.msra.mxu0 %v4161_v30  ;;  %728 = vmatpush1.msra.mxu1 %v4227_v41 }
 0x233   :  { %658 = vmatprep.subr.mxu0 %v4173_v32  ;;  %729 = vmatprep.subr.mxu1 %v4239_v43 }
 0x234   :  { %659 = vmatpush1.msra.mxu0 %v4185_v34  ;;  %730 = vmatpush1.msra.mxu1 %v4251_v45 }
 0x235   :  { %660 = vmatprep.subr.mxu0 %v4197_v36  ;;  %731 = vmatprep.subr.mxu1 %v4263_v47 }
 0x236   :  { %661 = vmatpush1.msra.mxu0 %v4209_v38  ;;  %732 = vmatpush1.msra.mxu1 %v4275_v49 }
 0x237   :  { %662 = vmatprep.subr.mxu0 %v4221_v40  ;;  %733 = vmatprep.subr.mxu1 %v4287_v51 }
 0x238   :  { %663 = vmatpush1.msra.mxu0 %v4233_v42  ;;  %734 = vmatpush1.msra.mxu1 %v4299_v53 }
 0x239   :  { %664 = vmatprep.subr.mxu0 %v6928_v50  ;;  %735 = vmatprep.subr.mxu1 %v6929_v46 }
 0x23a   :  { %665 = vmatpush1.msra.mxu0 %v6930_v56  ;;  %736 = vmatpush1.msra.mxu1 %v6931_v59 }
 0x23b   :  { %666 = vmatprep.subr.mxu0 %v6932_v63  ;;  %737 = vmatprep.subr.mxu1 %v6933_v60  ;;  %v3380_v63 = vld [vmem:[%s6704_s0 + $0x50] sm:$0xff] }
 0x23c   :  { %667 = vmatpush1.msra.mxu0 %v6934_v57  ;;  %738 = vmatpush1.msra.mxu1 %v6935_v52  ;;  %v6945_v52 = vld [vmem:[#allocation6_spill] sm:$0xff] }
 0x23d   :  { %668 = vmatprep.subr.mxu0 %v6936_v62  ;;  %739 = vmatprep.subr.mxu1 %v6937_v0  ;;  %v6946_v62 = vld [vmem:[#allocation7_spill] sm:$0xff] }
 0x23e   :  { %669 = vmatpush1.msra.mxu0 %v6938_v9  ;;  %740 = vmatpush1.msra.mxu1 %v6939_v58  ;;  %v3378_v58 = vld [vmem:[%s6704_s0 + $0x40] sm:$0xff] }
 0x23f   :  { %670 = vmatprep.subr.mxu0 %v6940_v4  ;;  %741 = vmatprep.subr.mxu1 %v6941_v48  ;;  %v3379_v48 = vld [vmem:[%s6704_s0 + $0x48] sm:$0xff] }
 0x240   :  { %671 = vmatpush1.msra.mxu0 %v6942_v55  ;;  %704 = vmatprep.mubr.f32.mxu0 %v6943_v54 }
 0x241   :  { %742 = vmatpush1.msra.mxu1 %v6944_v61  ;;  %775 = vmatprep.mubr.f32.mxu1 %v6943_v54 }
 0x242   :  { %817 = vmatprep.subr.mxu0 %v6945_v52  ;;  %888 = vmatprep.subr.mxu1 %v6946_v62  ;;  %v3381_v52 = vld [vmem:[%s6704_s0 + $0x58] sm:$0xff] }
 0x2e1   :  { %v529_v9 = vpop.f32.mrf.mxu0  ;;  %v600_v61 = vpop.f32.mrf.mxu1 }
 0x2e2   :  { %v605_v55 = vadd.f32 %v3378_v58, %v529_v9  ;;  %v607_v9 = vadd.f32 %v3380_v63, %v600_v61 }
 0x2e3   :  { %v531_v4 = vpop.f32.mrf.mxu0  ;;  %v602_v62 = vpop.f32.mrf.mxu1 }
 0x2e4   :  { %v3382_v0 = vmul.f32 -1.442695, %v605_v55  ;;  %v606_v57 = vadd.f32 %v3379_v48, %v531_v4  ;;  %v608_v60 = vadd.f32 %v3381_v52, %v602_v62 }
 0x2e6   :  { %3561 = vpow2.f32 %v3382_v0  ;;  %v3383_v54 = vmul.f32 -1.442695, %v606_v57  ;;  %v3384_v59 = vmul.f32 -1.442695, %v608_v60 }
 0x2e8   :  { %3563 = vpow2.f32 %v3383_v54 }
 0x2e9   :  { %3565 = vpow2.f32 %v3384_v59 }
 0x2f3   :  { %v3562_v56 = vpop.eup %3561 }
 0x2f4   :  { %v612_v58 = vadd.f32 1.0, %v3562_v56 }
 0x2f5   :  { %v3564_v55 = vpop.eup %3563 }
 0x2f6   :  { %3567 = vrcp.f32 %v612_v58  ;;  %v618_v0 = vadd.f32 1.0, %v3564_v55  ;;  %v3566_v57 = vpop.eup %3565  ;;  %v4729_v55 = vld [vmem:[%s6706_s2 + $0x1e0] sm:$0xff] }
 0x2f7   :  { %3569 = vtanh.f32 %v607_v9  ;;  %v625_v46 = vadd.f32 1.0, %v3566_v57  ;;  %v4747_v57 = vld [vmem:[%s6706_s2 + $0x1d8] sm:$0xff] }
 0x2f8   :  { %3571 = vrcp.f32 %v618_v0  ;;  %v4741_v0 = vld [vmem:[%s6706_s2 + $0x1c8] sm:$0xff] }
 0x2f9   :  { %3573 = vrcp.f32 %v625_v46 }
 0x303   :  { %v3568_v4 = vpop.eup %3567 }
 0x304   :  { %v3570_v48 = vpop.eup %3569 }
 0x305   :  { %v3572_v54 = vpop.eup %3571  ;;  %v629_v62 = vmul.f32 %v3570_v48, %v3568_v4  ;;  %v4753_v4 = vld [vmem:[%s6706_s2 + $0x1c0] sm:$0xff]  ;;  %v4759_v48 = vld [vmem:[%s6706_s2 + $0x1d0] sm:$0xff] }
 0x306   :  { %v628_v52 = vmul.f32 %v3572_v54, %v4544_v44  ;;  %v3574_v56 = vpop.eup %3573  ;;  %v4765_v54 = vld [vmem:[%s6706_s2 + $0x1a8] sm:$0xff] }
 0x308   :  { %v4629_v50 = vadd.f32 %v629_v62, %v628_v52  ;;  %v4771_v62 = vld [vmem:[%s6706_s2 + $0x1b8] sm:$0xff]  ;;  %v4777_v52 = vld [vmem:[%s6706_s2 + $0x1a0] sm:$0xff] }
 0x30a   :  { %3575 = vtanh.f32 %v4629_v50 }
 0x317   :  { %v3576_v63 = vpop.eup %3575 }
 0x318   :  { %v632_v59 = vmul.f32 %v3576_v63, %v3574_v56  ;;  %v4783_v56 = vld [vmem:[%s6706_s2 + $0x1b0] sm:$0xff]  ;;  %v4789_v63 = vld [vmem:[%s6706_s2 + $0x188] sm:$0xff] }
 0x31a   :  { %3385 = vst [vmem:[%s6710_s6 + $0x10] sm:$0xff] %v632_v59  ;;  %705 = vmatmul.mubr.f32.vlgmr.msra.gmra.mxu0 %v632_v59  ;;  %776 = vmatmul.mubr.f32.vlgmr.msra.gmra.mxu1 %v632_v59  ;;  %v4795_v59 = vld [vmem:[%s6706_s2 + $0x198] sm:$0xff] }
 0x31b   :  { %818 = vmatpush1.msra.mxu0 %v3995_v1  ;;  %889 = vmatpush1.msra.mxu1 %v4049_v11  ;;  %v6947_v1 = vld [vmem:[#allocation8_spill] sm:$0xff] }
 0x31c   :  { %819 = vmatprep.subr.mxu0 %v4000_v2  ;;  %890 = vmatprep.subr.mxu1 %v4061_v13  ;;  %v6948_v2 = vld [vmem:[#allocation14_spill] sm:$0xff]  ;;  %v6955_v11 = vld [vmem:[#allocation12_spill] sm:$0xff]  ;;  %v6957_v13 = vld [vmem:[#allocation13_spill] sm:$0xff] }
 0x31d   :  { %820 = vmatpush1.msra.mxu0 %v4006_v3  ;;  %891 = vmatpush1.msra.mxu1 %v4066_v14  ;;  %v6949_v3 = vld [vmem:[#allocation9_spill] sm:$0xff] }
 0x31e   :  { %821 = vmatprep.subr.mxu0 %v4013_v5  ;;  %892 = vmatprep.subr.mxu1 %v4078_v16  ;;  %v6950_v5 = vld [vmem:[#allocation16_spill] sm:$0xff]  ;;  %v6958_v14 = vld [vmem:[#allocation21_spill] sm:$0xff]  ;;  %v6960_v16 = vld [vmem:[#allocation22_spill] sm:$0xff] }
 0x31f   :  { %822 = vmatpush1.msra.mxu0 %v4020_v6  ;;  %893 = vmatpush1.msra.mxu1 %v4090_v18  ;;  %v6951_v6 = vld [vmem:[#allocation10_spill] sm:$0xff]  ;;  %v6962_v18 = vmov 0.0  }
 0x320   :  { %823 = vmatprep.subr.mxu0 %v4026_v7  ;;  %894 = vmatprep.subr.mxu1 %v4095_v19  ;;  %v6952_v7 = vld [vmem:[#allocation18_spill] sm:$0xff]  ;;  %v6963_v19 = vld [vmem:[#allocation23_spill] sm:$0xff] }
 0x321   :  { %824 = vmatpush1.msra.mxu0 %v4032_v8  ;;  %895 = vmatpush1.msra.mxu1 %v4107_v21  ;;  %v6953_v8 = vld [vmem:[#allocation11_spill] sm:$0xff] }
 0x322   :  { %825 = vmatprep.subr.mxu0 %v4043_v10  ;;  %896 = vmatprep.subr.mxu1 %v4119_v23  ;;  %v6954_v10 = vld [vmem:[#allocation19_spill] sm:$0xff] }
 0x323   :  { %826 = vmatpush1.msra.mxu0 %v4055_v12  ;;  %897 = vmatpush1.msra.mxu1 %v4131_v25  ;;  %v6956_v12 = vld [vmem:[#allocation20_spill] sm:$0xff]  ;;  %v6965_v21 = vld [vmem:[#allocation7_spill] sm:$0xff] }
 0x324   :  { %827 = vmatprep.subr.mxu0 %v4072_v15  ;;  %898 = vmatprep.subr.mxu1 %v4143_v27  ;;  %v6959_v15 = vld [vmem:[#allocation15_spill] sm:$0xff] }
 0x325   :  { %828 = vmatpush1.msra.mxu0 %v4084_v17  ;;  %899 = vmatpush1.msra.mxu1 %v4155_v29  ;;  %v6961_v17 = vld [vmem:[#allocation17_spill] sm:$0xff] }
 0x326   :  { %829 = vmatprep.subr.mxu0 %v4101_v20  ;;  %900 = vmatprep.subr.mxu1 %v4167_v31  ;;  %v4702_v20 = vld [vmem:[%s6706_s2 + $0x1e8] sm:$0xff]  ;;  %v3389_v31 = vld [vmem:[%s6704_s0 + $0x78] sm:$0xff] }
 0x327   :  { %830 = vmatpush1.msra.mxu0 %v4113_v22  ;;  %901 = vmatpush1.msra.mxu1 %v4179_v33  ;;  %6964 = vst [vmem:[#allocation6_spill] sm:$0xff] %v4702_v20  ;;  %v3386_v22 = vld [vmem:[%s6704_s0 + $0x60] sm:$0xff] }
 0x328   :  { %831 = vmatprep.subr.mxu0 %v4125_v24  ;;  %902 = vmatprep.subr.mxu1 %v4191_v35  ;;  %v3387_v24 = vld [vmem:[%s6704_s0 + $0x68] sm:$0xff] }
 0x329   :  { %832 = vmatpush1.msra.mxu0 %v4137_v26  ;;  %903 = vmatpush1.msra.mxu1 %v4203_v37 }
 0x32a   :  { %833 = vmatprep.subr.mxu0 %v4149_v28  ;;  %904 = vmatprep.subr.mxu1 %v4215_v39 }
 0x32b   :  { %834 = vmatpush1.msra.mxu0 %v4161_v30  ;;  %905 = vmatpush1.msra.mxu1 %v4227_v41 }
 0x32c   :  { %835 = vmatprep.subr.mxu0 %v4173_v32  ;;  %906 = vmatprep.subr.mxu1 %v4239_v43 }
 0x32d   :  { %836 = vmatpush1.msra.mxu0 %v4185_v34  ;;  %907 = vmatpush1.msra.mxu1 %v4251_v45  ;;  %v3388_v34 = vld [vmem:[%s6704_s0 + $0x70] sm:$0xff] }
 0x32e   :  { %837 = vmatprep.subr.mxu0 %v4197_v36  ;;  %908 = vmatprep.subr.mxu1 %v4263_v47 }
 0x32f   :  { %838 = vmatpush1.msra.mxu0 %v4209_v38  ;;  %909 = vmatpush1.msra.mxu1 %v4275_v49 }
 0x330   :  { %839 = vmatprep.subr.mxu0 %v4221_v40  ;;  %910 = vmatprep.subr.mxu1 %v4287_v51 }
 0x331   :  { %840 = vmatpush1.msra.mxu0 %v4233_v42  ;;  %911 = vmatpush1.msra.mxu1 %v4299_v53 }
 0x332   :  { %841 = vmatprep.subr.mxu0 %v6947_v1  ;;  %912 = vmatprep.subr.mxu1 %v6948_v2  ;;  %v4801_v1 = vld [vmem:[%s6706_s2 + $0x180] sm:$0xff] }
 0x333   :  { %842 = vmatpush1.msra.mxu0 %v6949_v3  ;;  %913 = vmatpush1.msra.mxu1 %v6950_v5  ;;  %v4807_v3 = vld [vmem:[%s6706_s2 + $0x190] sm:$0xff] }
 0x334   :  { %843 = vmatprep.subr.mxu0 %v6951_v6  ;;  %914 = vmatprep.subr.mxu1 %v6952_v7  ;;  %v4813_v6 = vld [vmem:[%s6706_s2 + $0x168] sm:$0xff] }
 0x335   :  { %844 = vmatpush1.msra.mxu0 %v6953_v8  ;;  %915 = vmatpush1.msra.mxu1 %v6954_v10  ;;  %v4819_v8 = vld [vmem:[%s6706_s2 + $0x178] sm:$0xff] }
 0x336   :  { %845 = vmatprep.subr.mxu0 %v6955_v11  ;;  %916 = vmatprep.subr.mxu1 %v6956_v12  ;;  %v4825_v11 = vld [vmem:[%s6706_s2 + $0x160] sm:$0xff] }
 0x337   :  { %846 = vmatpush1.msra.mxu0 %v6957_v13  ;;  %917 = vmatpush1.msra.mxu1 %v6958_v14  ;;  %v4831_v13 = vld [vmem:[%s6706_s2 + $0x170] sm:$0xff] }
 0x338   :  { %847 = vmatprep.subr.mxu0 %v6959_v15  ;;  %918 = vmatprep.subr.mxu1 %v6960_v16  ;;  %v4837_v15 = vld [vmem:[%s6706_s2 + $0x148] sm:$0xff] }
 0x339   :  { %848 = vmatpush1.msra.mxu0 %v6961_v17  ;;  %881 = vmatprep.mubr.f32.mxu0 %v6962_v18  ;;  %v4843_v17 = vld [vmem:[%s6706_s2 + $0x158] sm:$0xff] }
 0x33a   :  { %919 = vmatpush1.msra.mxu1 %v6963_v19  ;;  %952 = vmatprep.mubr.f32.mxu1 %v6962_v18 }
 0x33b   :  { %994 = vmatprep.subr.mxu0 %v4702_v20  ;;  %1065 = vmatprep.subr.mxu1 %v6965_v21  ;;  %v4849_v21 = vld [vmem:[%s6706_s2 + $0x140] sm:$0xff] }
 0x3da   :  { %v706_v23 = vpop.f32.mrf.mxu0  ;;  %v777_v29 = vpop.f32.mrf.mxu1 }
 0x3db   :  { %v782_v25 = vadd.f32 %v3386_v22, %v706_v23  ;;  %v784_v37 = vadd.f32 %v3388_v34, %v777_v29  ;;  %v4855_v22 = vld [vmem:[%s6706_s2 + $0x150] sm:$0xff]  ;;  %v4861_v23 = vld [vmem:[%s6706_s2 + $0x128] sm:$0xff]  ;;  %v4897_v29 = vld [vmem:[%s6706_s2 + $0x100] sm:$0xff] }
 0x3dc   :  { %v708_v26 = vpop.f32.mrf.mxu0  ;;  %v779_v32 = vpop.f32.mrf.mxu1  ;;  %v4927_v34 = vld [vmem:[%s6706_s2 + $0xf0] sm:$0xff] }
 0x3dd   :  { %v3390_v27 = vmul.f32 -1.442695, %v782_v25  ;;  %v783_v28 = vadd.f32 %v3387_v24, %v708_v26  ;;  %v785_v33 = vadd.f32 %v3389_v31, %v779_v32  ;;  %v4867_v24 = vld [vmem:[%s6706_s2 + $0x138] sm:$0xff]  ;;  %v4873_v25 = vld [vmem:[%s6706_s2 + $0x120] sm:$0xff]  ;;  %v4879_v26 = vld [vmem:[%s6706_s2 + $0x130] sm:$0xff] }
 0x3de   :  { %v4909_v31 = vld [vmem:[%s6706_s2 + $0xe8] sm:$0xff]  ;;  %v4915_v32 = vld [vmem:[%s6706_s2 + $0xf8] sm:$0xff] }
 0x3df   :  { %3577 = vpow2.f32 %v3390_v27  ;;  %v3391_v30 = vmul.f32 -1.442695, %v783_v28  ;;  %v3392_v35 = vmul.f32 -1.442695, %v785_v33  ;;  %v4885_v27 = vld [vmem:[%s6706_s2 + $0x108] sm:$0xff]  ;;  %v4891_v28 = vld [vmem:[%s6706_s2 + $0x118] sm:$0xff] }
 0x3e0   :  { %v4921_v33 = vld [vmem:[%s6706_s2 + $0xe0] sm:$0xff] }
 0x3e1   :  { %3579 = vpow2.f32 %v3391_v30  ;;  %v4903_v30 = vld [vmem:[%s6706_s2 + $0x110] sm:$0xff] }
 0x3e2   :  { %3581 = vpow2.f32 %v3392_v35  ;;  %v4933_v35 = vld [vmem:[%s6706_s2 + $0xc8] sm:$0xff] }
 0x3ec   :  { %v3578_v36 = vpop.eup %3577 }
 0x3ed   :  { %v789_v38 = vadd.f32 1.0, %v3578_v36  ;;  %v4939_v36 = vld [vmem:[%s6706_s2 + $0xd8] sm:$0xff] }
 0x3ee   :  { %v3580_v39 = vpop.eup %3579 }
 0x3ef   :  { %3583 = vrcp.f32 %v789_v38  ;;  %v795_v40 = vadd.f32 1.0, %v3580_v39  ;;  %v3582_v41 = vpop.eup %3581  ;;  %v4951_v38 = vld [vmem:[%s6706_s2 + $0xd0] sm:$0xff]  ;;  %v4957_v39 = vld [vmem:[%s6706_s2 + $0xa8] sm:$0xff] }
 0x3f0   :  { %3585 = vtanh.f32 %v784_v37  ;;  %v802_v45 = vadd.f32 1.0, %v3582_v41  ;;  %v4945_v37 = vld [vmem:[%s6706_s2 + $0xc0] sm:$0xff] }
 0x3f1   :  { %3587 = vrcp.f32 %v795_v40  ;;  %v4963_v40 = vld [vmem:[%s6706_s2 + $0xb8] sm:$0xff]  ;;  %v4969_v41 = vld [vmem:[%s6706_s2 + $0xa0] sm:$0xff] }
 0x3f2   :  { %3589 = vrcp.f32 %v802_v45 }
 0x3fc   :  { %v3584_v42 = vpop.eup %3583 }
 0x3fd   :  { %v3586_v43 = vpop.eup %3585 }
 0x3fe   :  { %v3588_v44 = vpop.eup %3587  ;;  %v806_v47 = vmul.f32 %v3586_v43, %v3584_v42  ;;  %v4976_v42 = vld [vmem:[%s6706_s2 + $0x88] sm:$0xff]  ;;  %v4983_v43 = vld [vmem:[%s6706_s2 + $0x80] sm:$0xff] }
 0x3ff   :  { %v805_v46 = vmul.f32 %v3588_v44, %v4629_v50  ;;  %v3590_v61 = vpop.eup %3589  ;;  %v4735_v50 = vld [vmem:[%s6706_s2 + $0x1f0] sm:$0xff] }
 0x401   :  { %v4719_v60 = vadd.f32 %v806_v47, %v805_v46 }
 0x403   :  { %3591 = vtanh.f32 %v4719_v60 }
 0x410   :  { %v3592_v9 = vpop.eup %3591 }
 0x411   :  { %v4722_v58 = vmul.f32 %v3592_v9, %v3590_v61 }
 0x413   :  { %6966 = vst [vmem:[#allocation8_spill] sm:$0xff] %v4722_v58  ;;  %882 = vmatmul.mubr.f32.vlgmr.msra.gmra.mxu0 %v4722_v58  ;;  %953 = vmatmul.mubr.f32.vlgmr.msra.gmra.mxu1 %v4722_v58 }
 0x414   :  { %995 = vmatpush1.msra.mxu0 %v4729_v55  ;;  %1066 = vmatpush1.msra.mxu1 %v4735_v50 }
 0x415   :  { %996 = vmatprep.subr.mxu0 %v4741_v0  ;;  %1067 = vmatprep.subr.mxu1 %v4747_v57 }
 0x416   :  { %997 = vmatpush1.msra.mxu0 %v4753_v4  ;;  %1068 = vmatpush1.msra.mxu1 %v4759_v48 }
 0x417   :  { %998 = vmatprep.subr.mxu0 %v4765_v54  ;;  %1069 = vmatprep.subr.mxu1 %v4771_v62 }
 0x418   :  { %999 = vmatpush1.msra.mxu0 %v4777_v52  ;;  %1070 = vmatpush1.msra.mxu1 %v4783_v56 }
 0x419   :  { %1000 = vmatprep.subr.mxu0 %v4789_v63  ;;  %1071 = vmatprep.subr.mxu1 %v4795_v59 }
 0x41a   :  { %1001 = vmatpush1.msra.mxu0 %v4801_v1  ;;  %1072 = vmatpush1.msra.mxu1 %v4807_v3 }
 0x41b   :  { %1002 = vmatprep.subr.mxu0 %v4813_v6  ;;  %1073 = vmatprep.subr.mxu1 %v4819_v8 }
 0x41c   :  { %1003 = vmatpush1.msra.mxu0 %v4825_v11  ;;  %1074 = vmatpush1.msra.mxu1 %v4831_v13 }
 0x41d   :  { %1004 = vmatprep.subr.mxu0 %v4837_v15  ;;  %1075 = vmatprep.subr.mxu1 %v4843_v17 }
 0x41e   :  { %1005 = vmatpush1.msra.mxu0 %v4849_v21  ;;  %1076 = vmatpush1.msra.mxu1 %v4855_v22 }
 0x41f   :  { %1006 = vmatprep.subr.mxu0 %v4861_v23  ;;  %1077 = vmatprep.subr.mxu1 %v4867_v24 }
 0x420   :  { %1007 = vmatpush1.msra.mxu0 %v4873_v25  ;;  %1078 = vmatpush1.msra.mxu1 %v4879_v26 }
 0x421   :  { %1008 = vmatprep.subr.mxu0 %v4885_v27  ;;  %1079 = vmatprep.subr.mxu1 %v4891_v28 }
 0x422   :  { %1009 = vmatpush1.msra.mxu0 %v4897_v29  ;;  %1080 = vmatpush1.msra.mxu1 %v4903_v30 }
 0x423   :  { %1010 = vmatprep.subr.mxu0 %v4909_v31  ;;  %1081 = vmatprep.subr.mxu1 %v4915_v32 }
 0x424   :  { %1011 = vmatpush1.msra.mxu0 %v4921_v33  ;;  %1082 = vmatpush1.msra.mxu1 %v4927_v34 }
 0x425   :  { %1012 = vmatprep.subr.mxu0 %v4933_v35  ;;  %1083 = vmatprep.subr.mxu1 %v4939_v36 }
 0x426   :  { %1013 = vmatpush1.msra.mxu0 %v4945_v37  ;;  %1084 = vmatpush1.msra.mxu1 %v4951_v38 }
 0x427   :  { %1014 = vmatprep.subr.mxu0 %v4957_v39  ;;  %1085 = vmatprep.subr.mxu1 %v4963_v40 }
 0x428   :  { %1015 = vmatpush1.msra.mxu0 %v4969_v41  ;;  %1086 = vmatpush1.msra.mxu1 %v4275_v49  ;;  %v4990_v49 = vld [vmem:[%s6706_s2 + $0x68] sm:$0xff] }
 0x429   :  { %1016 = vmatprep.subr.mxu0 %v4976_v42  ;;  %1087 = vmatprep.subr.mxu1 %v4287_v51  ;;  %6967 = vst [vmem:[#allocation14_spill] sm:$0xff] %v4990_v49  ;;  %v4997_v51 = vld [vmem:[%s6706_s2 + $0x60] sm:$0xff] }
 0x42a   :  { %1017 = vmatpush1.msra.mxu0 %v4983_v43  ;;  %1088 = vmatpush1.msra.mxu1 %v4299_v53  ;;  %6968 = vst [vmem:[#allocation9_spill] sm:$0xff] %v4997_v51  ;;  %v5004_v53 = vld [vmem:[%s6706_s2 + $0x48] sm:$0xff] }
 0x42b   :  { %1018 = vmatprep.subr.mxu0 %v4990_v49  ;;  %1089 = vmatprep.subr.mxu1 %v6948_v2  ;;  %6969 = vst [vmem:[#allocation16_spill] sm:$0xff] %v5004_v53  ;;  %v5011_v2 = vld [vmem:[%s6706_s2 + $0x40] sm:$0xff] }
 0x42c   :  { %1019 = vmatpush1.msra.mxu0 %v4997_v51  ;;  %1090 = vmatpush1.msra.mxu1 %v6950_v5  ;;  %6970 = vst [vmem:[#allocation10_spill] sm:$0xff] %v5011_v2  ;;  %v5018_v5 = vld [vmem:[%s6706_s2 + $0x28] sm:$0xff] }
 0x42d   :  { %1020 = vmatprep.subr.mxu0 %v5004_v53  ;;  %1091 = vmatprep.subr.mxu1 %v6952_v7  ;;  %6971 = vst [vmem:[#allocation18_spill] sm:$0xff] %v5018_v5  ;;  %v5025_v7 = vld [vmem:[%s6706_s2 + $0x20] sm:$0xff] }
 0x42e   :  { %1021 = vmatpush1.msra.mxu0 %v5011_v2  ;;  %1092 = vmatpush1.msra.mxu1 %v6954_v10  ;;  %6972 = vst [vmem:[#allocation11_spill] sm:$0xff] %v5025_v7  ;;  %v5032_v10 = vld [vmem:[%s6706_s2 + $0x8] sm:$0xff] }
 0x42f   :  { %1022 = vmatprep.subr.mxu0 %v5018_v5  ;;  %1093 = vmatprep.subr.mxu1 %v6956_v12  ;;  %6973 = vst [vmem:[#allocation19_spill] sm:$0xff] %v5032_v10  ;;  %v5039_v12 = vld [vmem:[%s6706_s2] sm:$0xff] }
 0x430   :  { %1023 = vmatpush1.msra.mxu0 %v5025_v7  ;;  %1094 = vmatpush1.msra.mxu1 %v6958_v14  ;;  %6974 = vst [vmem:[#allocation12_spill] sm:$0xff] %v5039_v12  ;;  %v5049_v14 = vld [vmem:[%s6706_s2 + $0x1f8] sm:$0xff] }
 0x431   :  { %1024 = vmatprep.subr.mxu0 %v5032_v10  ;;  %1095 = vmatprep.subr.mxu1 %v6960_v16  ;;  %6975 = vst [vmem:[#allocation20_spill] sm:$0xff] %v5049_v14  ;;  %v3394_v16 = vld [vmem:[%s6704_s0 + $0x80] sm:$0xff] }
 0x432   :  { %1025 = vmatpush1.msra.mxu0 %v5039_v12  ;;  %1058 = vmatprep.mubr.f32.mxu0 %v6962_v18  ;;  %v3396_v12 = vld [vmem:[%s6704_s0 + $0x90] sm:$0xff] }
 0x433   :  { %1096 = vmatpush1.msra.mxu1 %v6963_v19  ;;  %1129 = vmatprep.mubr.f32.mxu1 %v6962_v18  ;;  %v3395_v19 = vld [vmem:[%s6704_s0 + $0x88] sm:$0xff] }
 0x434   :  { %1171 = vmatprep.subr.mxu0 %v4702_v20  ;;  %1242 = vmatprep.subr.mxu1 %v5049_v14  ;;  %v3397_v14 = vld [vmem:[%s6704_s0 + $0x98] sm:$0xff] }
 0x4d3   :  { %v883_v44 = vpop.f32.mrf.mxu0  ;;  %v954_v9 = vpop.f32.mrf.mxu1 }
 0x4d4   :  { %v959_v45 = vadd.f32 %v3394_v16, %v883_v44  ;;  %v961_v16 = vadd.f32 %v3396_v12, %v954_v9  ;;  %v5130_v12 = vld [vmem:[%s6706_s2 + $0x90] sm:$0xff]  ;;  %v5137_v9 = vld [vmem:[%s6706_s2 + $0x78] sm:$0xff] }
 0x4d5   :  { %v885_v47 = vpop.f32.mrf.mxu0  ;;  %v956_v20 = vpop.f32.mrf.mxu1  ;;  %6977 = vst [vmem:[#allocation21_spill] sm:$0xff] %v5137_v9 }
 0x4d6   :  { %v3398_v46 = vmul.f32 -1.442695, %v959_v45  ;;  %v960_v61 = vadd.f32 %v3395_v19, %v885_v47  ;;  %v962_v18 = vadd.f32 %v3397_v14, %v956_v20 }
 0x4d8   :  { %3593 = vpow2.f32 %v3398_v46  ;;  %v3399_v58 = vmul.f32 -1.442695, %v960_v61  ;;  %v3400_v10 = vmul.f32 -1.442695, %v962_v18 }
 0x4da   :  { %3595 = vpow2.f32 %v3399_v58 }
 0x4db   :  { %3597 = vpow2.f32 %v3400_v10 }
 0x4e5   :  { %v3594_v7 = vpop.eup %3593 }
 0x4e6   :  { %v966_v44 = vadd.f32 1.0, %v3594_v7 }
 0x4e7   :  { %v3596_v45 = vpop.eup %3595 }
 0x4e8   :  { %3599 = vrcp.f32 %v966_v44  ;;  %v972_v19 = vadd.f32 1.0, %v3596_v45  ;;  %v3598_v58 = vpop.eup %3597  ;;  %v5151_v44 = vld [vmem:[%s6706_s2 + $0x58] sm:$0xff]  ;;  %v6980_v45 = vld [vmem:[#allocation10_spill] sm:$0xff] }
 0x4e9   :  { %3601 = vtanh.f32 %v961_v16  ;;  %v979_v5 = vadd.f32 1.0, %v3598_v58  ;;  %v5144_v16 = vld [vmem:[%s6706_s2 + $0x70] sm:$0xff]  ;;  %6979 = vst [vmem:[#allocation22_spill] sm:$0xff] %v5151_v44  ;;  %v6982_v58 = vld [vmem:[#allocation18_spill] sm:$0xff] }
 0x4ea   :  { %3603 = vrcp.f32 %v972_v19  ;;  %6978 = vst [vmem:[#allocation15_spill] sm:$0xff] %v5144_v16  ;;  %v5158_v19 = vld [vmem:[%s6706_s2 + $0x50] sm:$0xff] }
 0x4eb   :  { %3605 = vrcp.f32 %v979_v5  ;;  %v5123_v5 = vld [vmem:[%s6706_s2 + $0x98] sm:$0xff]  ;;  %6981 = vst [vmem:[#allocation17_spill] sm:$0xff] %v5158_v19 }
 0x4f5   :  { %v3600_v47 = vpop.eup %3599 }
 0x4f6   :  { %v3602_v46 = vpop.eup %3601 }
 0x4f7   :  { %v3604_v61 = vpop.eup %3603  ;;  %v983_v20 = vmul.f32 %v3602_v46, %v3600_v47  ;;  %v5165_v47 = vld [vmem:[%s6706_s2 + $0x38] sm:$0xff]  ;;  %v6984_v46 = vld [vmem:[#allocation11_spill] sm:$0xff] }
 0x4f8   :  { %v982_v14 = vmul.f32 %v3604_v61, %v4719_v60  ;;  %v3606_v18 = vpop.eup %3605  ;;  %v5116_v60 = vld [vmem:[%s6706_s2 + $0xb0] sm:$0xff]  ;;  %6983 = vst [vmem:[#allocation23_spill] sm:$0xff] %v5165_v47 }
 0x4f9   :  { %v5172_v61 = vld [vmem:[%s6706_s2 + $0x30] sm:$0xff] }
 0x4fa   :  { %v5065_v2 = vadd.f32 %v983_v20, %v982_v14  ;;  %6985 = vst [vmem:[#allocation7_spill] sm:$0xff] %v5172_v61  ;;  %v6986_v20 = vld [vmem:[#allocation19_spill] sm:$0xff]  ;;  %v5179_v14 = vld [vmem:[%s6706_s2 + $0x18] sm:$0xff] }
 0x4fb   :  { %6987 = vst [vmem:[#allocation24_spill] sm:$0xff] %v5179_v14 }
 0x4fc   :  { %3607 = vtanh.f32 %v5065_v2 }
 0x509   :  { %v3608_v7 = vpop.eup %3607 }
 0x50a   :  { %v5068_v10 = vmul.f32 %v3608_v7, %v3606_v18  ;;  %v6988_v18 = vld [vmem:[#allocation12_spill] sm:$0xff]  ;;  %v6989_v7 = vmov 0.0  }
 0x50c   :  { %6976 = vst [vmem:[#allocation13_spill] sm:$0xff] %v5068_v10  ;;  %1059 = vmatmul.mubr.f32.vlgmr.msra.gmra.mxu0 %v5068_v10  ;;  %1130 = vmatmul.mubr.f32.vlgmr.msra.gmra.mxu1 %v5068_v10  ;;  %v5187_v10 = vld [vmem:[%s6706_s2 + $0x10] sm:$0xff] }
 0x50d   :  { %1172 = vmatpush1.msra.mxu0 %v4729_v55  ;;  %1243 = vmatpush1.msra.mxu1 %v4735_v50  ;;  %6990 = vst [vmem:[#allocation25_spill] sm:$0xff] %v5187_v10 }
 0x50e   :  { %1173 = vmatprep.subr.mxu0 %v4741_v0  ;;  %1244 = vmatprep.subr.mxu1 %v4747_v57 }
 0x50f   :  { %1174 = vmatpush1.msra.mxu0 %v4753_v4  ;;  %1245 = vmatpush1.msra.mxu1 %v4759_v48 }
 0x510   :  { %1175 = vmatprep.subr.mxu0 %v4765_v54  ;;  %1246 = vmatprep.subr.mxu1 %v4771_v62 }
 0x511   :  { %1176 = vmatpush1.msra.mxu0 %v4777_v52  ;;  %1247 = vmatpush1.msra.mxu1 %v4783_v56 }
 0x512   :  { %1177 = vmatprep.subr.mxu0 %v4789_v63  ;;  %1248 = vmatprep.subr.mxu1 %v4795_v59 }
 0x513   :  { %1178 = vmatpush1.msra.mxu0 %v4801_v1  ;;  %1249 = vmatpush1.msra.mxu1 %v4807_v3 }
 0x514   :  { %1179 = vmatprep.subr.mxu0 %v4813_v6  ;;  %1250 = vmatprep.subr.mxu1 %v4819_v8 }
 0x515   :  { %1180 = vmatpush1.msra.mxu0 %v4825_v11  ;;  %1251 = vmatpush1.msra.mxu1 %v4831_v13 }
 0x516   :  { %1181 = vmatprep.subr.mxu0 %v4837_v15  ;;  %1252 = vmatprep.subr.mxu1 %v4843_v17 }
 0x517   :  { %1182 = vmatpush1.msra.mxu0 %v4849_v21  ;;  %1253 = vmatpush1.msra.mxu1 %v4855_v22 }
 0x518   :  { %1183 = vmatprep.subr.mxu0 %v4861_v23  ;;  %1254 = vmatprep.subr.mxu1 %v4867_v24 }
 0x519   :  { %1184 = vmatpush1.msra.mxu0 %v4873_v25  ;;  %1255 = vmatpush1.msra.mxu1 %v4879_v26 }
 0x51a   :  { %1185 = vmatprep.subr.mxu0 %v4885_v27  ;;  %1256 = vmatprep.subr.mxu1 %v4891_v28 }
 0x51b   :  { %1186 = vmatpush1.msra.mxu0 %v4897_v29  ;;  %1257 = vmatpush1.msra.mxu1 %v4903_v30 }
 0x51c   :  { %1187 = vmatprep.subr.mxu0 %v4909_v31  ;;  %1258 = vmatprep.subr.mxu1 %v4915_v32 }
 0x51d   :  { %1188 = vmatpush1.msra.mxu0 %v4921_v33  ;;  %1259 = vmatpush1.msra.mxu1 %v4927_v34 }
 0x51e   :  { %1189 = vmatprep.subr.mxu0 %v4933_v35  ;;  %1260 = vmatprep.subr.mxu1 %v4939_v36 }
 0x51f   :  { %1190 = vmatpush1.msra.mxu0 %v4945_v37  ;;  %1261 = vmatpush1.msra.mxu1 %v4951_v38 }
 0x520   :  { %1191 = vmatprep.subr.mxu0 %v4957_v39  ;;  %1262 = vmatprep.subr.mxu1 %v4963_v40 }
 0x521   :  { %1192 = vmatpush1.msra.mxu0 %v4969_v41  ;;  %1263 = vmatpush1.msra.mxu1 %v5116_v60 }
 0x522   :  { %1193 = vmatprep.subr.mxu0 %v4976_v42  ;;  %1264 = vmatprep.subr.mxu1 %v5123_v5 }
 0x523   :  { %1194 = vmatpush1.msra.mxu0 %v4983_v43  ;;  %1265 = vmatpush1.msra.mxu1 %v5130_v12 }
 0x524   :  { %1195 = vmatprep.subr.mxu0 %v4990_v49  ;;  %1266 = vmatprep.subr.mxu1 %v5137_v9 }
 0x525   :  { %1196 = vmatpush1.msra.mxu0 %v4997_v51  ;;  %1267 = vmatpush1.msra.mxu1 %v5144_v16 }
 0x526   :  { %1197 = vmatprep.subr.mxu0 %v5004_v53  ;;  %1268 = vmatprep.subr.mxu1 %v5151_v44  ;;  %v3404_v53 = vld [vmem:[%s6704_s0 + $0xb0] sm:$0xff] }
 0x527   :  { %1198 = vmatpush1.msra.mxu0 %v6980_v45  ;;  %1269 = vmatpush1.msra.mxu1 %v5158_v19 }
 0x528   :  { %1199 = vmatprep.subr.mxu0 %v6982_v58  ;;  %1270 = vmatprep.subr.mxu1 %v5165_v47 }
 0x529   :  { %1200 = vmatpush1.msra.mxu0 %v6984_v46  ;;  %1271 = vmatpush1.msra.mxu1 %v5172_v61  ;;  %v6992_v61 = vld [vmem:[#allocation20_spill] sm:$0xff]  ;;  %v3403_v46 = vld [vmem:[%s6704_s0 + $0xa8] sm:$0xff] }
 0x52a   :  { %1201 = vmatprep.subr.mxu0 %v6986_v20  ;;  %1272 = vmatprep.subr.mxu1 %v5179_v14  ;;  %v6991_v20 = vld [vmem:[#allocation6_spill] sm:$0xff] }
 0x52b   :  { %1202 = vmatpush1.msra.mxu0 %v6988_v18  ;;  %1235 = vmatprep.mubr.f32.mxu0 %v6989_v7  ;;  %v3402_v14 = vld [vmem:[%s6704_s0 + $0xa0] sm:$0xff] }
 0x52c   :  { %1273 = vmatpush1.msra.mxu1 %v5187_v10  ;;  %1306 = vmatprep.mubr.f32.mxu1 %v6989_v7 }
 0x52d   :  { %1348 = vmatprep.subr.mxu0 %v6991_v20  ;;  %1419 = vmatprep.subr.mxu1 %v6992_v61  ;;  %v3405_v61 = vld [vmem:[%s6704_s0 + $0xb8] sm:$0xff] }
 0x5cc   :  { %v1060_v18 = vpop.f32.mrf.mxu0  ;;  %v1131_v10 = vpop.f32.mrf.mxu1 }
 0x5cd   :  { %v1136_v47 = vadd.f32 %v3402_v14, %v1060_v18  ;;  %v1138_v14 = vadd.f32 %v3404_v53, %v1131_v10 }
 0x5ce   :  { %v1062_v58 = vpop.f32.mrf.mxu0  ;;  %v1133_v20 = vpop.f32.mrf.mxu1 }
 0x5cf   :  { %v3406_v19 = vmul.f32 -1.442695, %v1136_v47  ;;  %v1137_v45 = vadd.f32 %v3403_v46, %v1062_v58  ;;  %v1139_v44 = vadd.f32 %v3405_v61, %v1133_v20 }
 0x5d1   :  { %3609 = vpow2.f32 %v3406_v19  ;;  %v3407_v7 = vmul.f32 -1.442695, %v1137_v45  ;;  %v3408_v16 = vmul.f32 -1.442695, %v1139_v44  ;;  %v1590_v44 = vld [vmem:[#allocation2 + $0x1e0] sm:$0xff] }
 0x5d3   :  { %3611 = vpow2.f32 %v3407_v7 }
 0x5d4   :  { %3613 = vpow2.f32 %v3408_v16 }
 0x5de   :  { %v3610_v51 = vpop.eup %3609 }
 0x5df   :  { %v1143_v18 = vadd.f32 1.0, %v3610_v51 }
 0x5e0   :  { %v3612_v47 = vpop.eup %3611 }
 0x5e1   :  { %3615 = vrcp.f32 %v1143_v18  ;;  %v1149_v19 = vadd.f32 1.0, %v3612_v47  ;;  %v3614_v45 = vpop.eup %3613  ;;  %v1587_v18 = vld [vmem:[#allocation2 + $0x1c8] sm:$0xff]  ;;  %v1589_v47 = vld [vmem:[#allocation2 + $0x1d8] sm:$0xff] }
 0x5e2   :  { %3617 = vtanh.f32 %v1138_v14  ;;  %v1156_v9 = vadd.f32 1.0, %v3614_v45  ;;  %v1592_v14 = vld [vmem:[#allocation2 + $0x1f0] sm:$0xff] }
 0x5e3   :  { %3619 = vrcp.f32 %v1149_v19  ;;  %v1586_v19 = vld [vmem:[#allocation2 + $0x1c0] sm:$0xff]  ;;  %v1588_v45 = vld [vmem:[#allocation2 + $0x1d0] sm:$0xff] }
 0x5e4   :  { %3621 = vrcp.f32 %v1156_v9 }
 0x5ee   :  { %v3616_v58 = vpop.eup %3615 }
 0x5ef   :  { %v3618_v46 = vpop.eup %3617 }
 0x5f0   :  { %v3620_v7 = vpop.eup %3619  ;;  %v1160_v61 = vmul.f32 %v3618_v46, %v3616_v58  ;;  %v1585_v58 = vld [vmem:[#allocation2 + $0x1b8] sm:$0xff]  ;;  %v1582_v46 = vld [vmem:[#allocation2 + $0x1a0] sm:$0xff] }
 0x5f1   :  { %v1159_v20 = vmul.f32 %v3620_v7, %v5065_v2  ;;  %v3622_v51 = vpop.eup %3621  ;;  %v1584_v7 = vld [vmem:[#allocation2 + $0x1b0] sm:$0xff] }
 0x5f3   :  { %v5206_v49 = vadd.f32 %v1160_v61, %v1159_v20  ;;  %v1579_v61 = vld [vmem:[#allocation2 + $0x188] sm:$0xff]  ;;  %v1581_v20 = vld [vmem:[#allocation2 + $0x198] sm:$0xff] }
 0x5f5   :  { %3623 = vtanh.f32 %v5206_v49 }
 0x602   :  { %v3624_v53 = vpop.eup %3623 }
 0x603   :  { %v5209_v10 = vmul.f32 %v3624_v53, %v3622_v51  ;;  %v1578_v51 = vld [vmem:[#allocation2 + $0x180] sm:$0xff]  ;;  %v1580_v53 = vld [vmem:[#allocation2 + $0x190] sm:$0xff] }
 0x605   :  { %1236 = vmatmul.mubr.f32.vlgmr.msra.gmra.mxu0 %v5209_v10  ;;  %1307 = vmatmul.mubr.f32.vlgmr.msra.gmra.mxu1 %v5209_v10 }
 0x606   :  { %1349 = vmatpush1.msra.mxu0 %v4729_v55  ;;  %1420 = vmatpush1.msra.mxu1 %v4735_v50  ;;  %v6993_v55 = vld [vmem:[#allocation14_spill] sm:$0xff]  ;;  %v6994_v50 = vld [vmem:[#allocation21_spill] sm:$0xff] }
 0x607   :  { %1350 = vmatprep.subr.mxu0 %v4741_v0  ;;  %1421 = vmatprep.subr.mxu1 %v4747_v57  ;;  %v6995_v0 = vld [vmem:[#allocation9_spill] sm:$0xff]  ;;  %v6996_v57 = vld [vmem:[#allocation15_spill] sm:$0xff] }
 0x608   :  { %1351 = vmatpush1.msra.mxu0 %v4753_v4  ;;  %1422 = vmatpush1.msra.mxu1 %v4759_v48  ;;  %v6997_v4 = vld [vmem:[#allocation16_spill] sm:$0xff]  ;;  %v6998_v48 = vld [vmem:[#allocation22_spill] sm:$0xff] }
 0x609   :  { %1352 = vmatprep.subr.mxu0 %v4765_v54  ;;  %1423 = vmatprep.subr.mxu1 %v4771_v62  ;;  %v6999_v54 = vld [vmem:[#allocation10_spill] sm:$0xff]  ;;  %v7000_v62 = vld [vmem:[#allocation17_spill] sm:$0xff] }
 0x60a   :  { %1353 = vmatpush1.msra.mxu0 %v4777_v52  ;;  %1424 = vmatpush1.msra.mxu1 %v4783_v56  ;;  %v7001_v52 = vld [vmem:[#allocation18_spill] sm:$0xff]  ;;  %v7002_v56 = vld [vmem:[#allocation23_spill] sm:$0xff] }
 0x60b   :  { %1354 = vmatprep.subr.mxu0 %v4789_v63  ;;  %1425 = vmatprep.subr.mxu1 %v4795_v59  ;;  %v7003_v63 = vld [vmem:[#allocation11_spill] sm:$0xff] }
 0x60c   :  { %1355 = vmatpush1.msra.mxu0 %v4801_v1  ;;  %1426 = vmatpush1.msra.mxu1 %v4807_v3  ;;  %v7004_v59 = vld [vmem:[#allocation7_spill] sm:$0xff]  ;;  %v7006_v3 = vld [vmem:[#allocation24_spill] sm:$0xff] }
 0x60d   :  { %1356 = vmatprep.subr.mxu0 %v4813_v6  ;;  %1427 = vmatprep.subr.mxu1 %v4819_v8  ;;  %v7005_v1 = vld [vmem:[#allocation19_spill] sm:$0xff]  ;;  %v7007_v6 = vld [vmem:[#allocation12_spill] sm:$0xff]  ;;  %v7008_v8 = vld [vmem:[#allocation25_spill] sm:$0xff] }
 0x60e   :  { %1357 = vmatpush1.msra.mxu0 %v4825_v11  ;;  %1428 = vmatpush1.msra.mxu1 %v4831_v13  ;;  %v7009_v11 = vmov 0.0   ;;  %v1591_v13 = vld [vmem:[#allocation2 + $0x1e8] sm:$0xff] }
 0x60f   :  { %1358 = vmatprep.subr.mxu0 %v4837_v15  ;;  %1429 = vmatprep.subr.mxu1 %v4843_v17  ;;  %v1593_v15 = vld [vmem:[#allocation2 + $0x1f8] sm:$0xff]  ;;  %v3410_v17 = vld [vmem:[%s6704_s0 + $0xc0] sm:$0xff] }
 0x610   :  { %1359 = vmatpush1.msra.mxu0 %v4849_v21  ;;  %1430 = vmatpush1.msra.mxu1 %v4855_v22  ;;  %v3411_v22 = vld [vmem:[%s6704_s0 + $0xc8] sm:$0xff] }
 0x611   :  { %1360 = vmatprep.subr.mxu0 %v4861_v23  ;;  %1431 = vmatprep.subr.mxu1 %v4867_v24 }
 0x612   :  { %1361 = vmatpush1.msra.mxu0 %v4873_v25  ;;  %1432 = vmatpush1.msra.mxu1 %v4879_v26 }
 0x613   :  { %1362 = vmatprep.subr.mxu0 %v4885_v27  ;;  %1433 = vmatprep.subr.mxu1 %v4891_v28 }
 0x614   :  { %1363 = vmatpush1.msra.mxu0 %v4897_v29  ;;  %1434 = vmatpush1.msra.mxu1 %v4903_v30  ;;  %v3413_v29 = vld [vmem:[%s6704_s0 + $0xd8] sm:$0xff] }
 0x615   :  { %1364 = vmatprep.subr.mxu0 %v4909_v31  ;;  %1435 = vmatprep.subr.mxu1 %v4915_v32  ;;  %v3412_v32 = vld [vmem:[%s6704_s0 + $0xd0] sm:$0xff] }
 0x616   :  { %1365 = vmatpush1.msra.mxu0 %v4921_v33  ;;  %1436 = vmatpush1.msra.mxu1 %v4927_v34 }
 0x617   :  { %1366 = vmatprep.subr.mxu0 %v4933_v35  ;;  %1437 = vmatprep.subr.mxu1 %v4939_v36 }
 0x618   :  { %1367 = vmatpush1.msra.mxu0 %v4945_v37  ;;  %1438 = vmatpush1.msra.mxu1 %v4951_v38 }
 0x619   :  { %1368 = vmatprep.subr.mxu0 %v4957_v39  ;;  %1439 = vmatprep.subr.mxu1 %v4963_v40 }
 0x61a   :  { %1369 = vmatpush1.msra.mxu0 %v4969_v41  ;;  %1440 = vmatpush1.msra.mxu1 %v5116_v60 }
 0x61b   :  { %1370 = vmatprep.subr.mxu0 %v4976_v42  ;;  %1441 = vmatprep.subr.mxu1 %v5123_v5 }
 0x61c   :  { %1371 = vmatpush1.msra.mxu0 %v4983_v43  ;;  %1442 = vmatpush1.msra.mxu1 %v5130_v12 }
 0x61d   :  { %1372 = vmatprep.subr.mxu0 %v6993_v55  ;;  %1443 = vmatprep.subr.mxu1 %v6994_v50  ;;  %v1575_v55 = vld [vmem:[#allocation2 + $0x168] sm:$0xff]  ;;  %v1577_v50 = vld [vmem:[#allocation2 + $0x178] sm:$0xff] }
 0x61e   :  { %1373 = vmatpush1.msra.mxu0 %v6995_v0  ;;  %1444 = vmatpush1.msra.mxu1 %v6996_v57  ;;  %v1574_v0 = vld [vmem:[#allocation2 + $0x160] sm:$0xff]  ;;  %v1576_v57 = vld [vmem:[#allocation2 + $0x170] sm:$0xff] }
 0x61f   :  { %1374 = vmatprep.subr.mxu0 %v6997_v4  ;;  %1445 = vmatprep.subr.mxu1 %v6998_v48  ;;  %v1571_v4 = vld [vmem:[#allocation2 + $0x148] sm:$0xff]  ;;  %v1573_v48 = vld [vmem:[#allocation2 + $0x158] sm:$0xff] }
 0x620   :  { %1375 = vmatpush1.msra.mxu0 %v6999_v54  ;;  %1446 = vmatpush1.msra.mxu1 %v7000_v62  ;;  %v1570_v54 = vld [vmem:[#allocation2 + $0x140] sm:$0xff]  ;;  %v1572_v62 = vld [vmem:[#allocation2 + $0x150] sm:$0xff] }
 0x621   :  { %1376 = vmatprep.subr.mxu0 %v7001_v52  ;;  %1447 = vmatprep.subr.mxu1 %v7002_v56  ;;  %v1567_v52 = vld [vmem:[#allocation2 + $0x128] sm:$0xff]  ;;  %v1569_v56 = vld [vmem:[#allocation2 + $0x138] sm:$0xff] }
 0x622   :  { %1377 = vmatpush1.msra.mxu0 %v7003_v63  ;;  %1448 = vmatpush1.msra.mxu1 %v7004_v59  ;;  %v1566_v63 = vld [vmem:[#allocation2 + $0x120] sm:$0xff]  ;;  %v1568_v59 = vld [vmem:[#allocation2 + $0x130] sm:$0xff] }
 0x623   :  { %1378 = vmatprep.subr.mxu0 %v7005_v1  ;;  %1449 = vmatprep.subr.mxu1 %v7006_v3  ;;  %v1563_v1 = vld [vmem:[#allocation2 + $0x108] sm:$0xff]  ;;  %v1565_v3 = vld [vmem:[#allocation2 + $0x118] sm:$0xff] }
 0x624   :  { %1379 = vmatpush1.msra.mxu0 %v7007_v6  ;;  %1450 = vmatpush1.msra.mxu1 %v7008_v8  ;;  %v1562_v6 = vld [vmem:[#allocation2 + $0x100] sm:$0xff]  ;;  %v1564_v8 = vld [vmem:[#allocation2 + $0x110] sm:$0xff] }
 0x625   :  { %1412 = vmatprep.mubr.f32.mxu0 %v7009_v11  ;;  %1483 = vmatprep.mubr.f32.mxu1 %v7009_v11 }
 0x626   :  { %1616 = vmatprep.subr.mxu0 %v1591_v13  ;;  %1729 = vmatprep.subr.mxu1 %v1593_v15  ;;  %v1559_v13 = vld [vmem:[#allocation2 + $0xe8] sm:$0xff]  ;;  %v1561_v15 = vld [vmem:[#allocation2 + $0xf8] sm:$0xff] }
 0x6c5   :  { %v1237_v21 = vpop.f32.mrf.mxu0  ;;  %v1308_v27 = vpop.f32.mrf.mxu1 }
 0x6c6   :  { %v1313_v23 = vadd.f32 %v3410_v17, %v1237_v21  ;;  %v1315_v35 = vadd.f32 %v3412_v32, %v1308_v27  ;;  %v1558_v17 = vld [vmem:[#allocation2 + $0xe0] sm:$0xff]  ;;  %v1560_v21 = vld [vmem:[#allocation2 + $0xf0] sm:$0xff]  ;;  %v1553_v27 = vld [vmem:[#allocation2 + $0xb8] sm:$0xff] }
 0x6c7   :  { %v1239_v24 = vpop.f32.mrf.mxu0  ;;  %v1310_v30 = vpop.f32.mrf.mxu1  ;;  %v1546_v32 = vld [vmem:[#allocation2 + $0x80] sm:$0xff] }
 0x6c8   :  { %v3414_v25 = vmul.f32 -1.442695, %v1313_v23  ;;  %v1314_v26 = vadd.f32 %v3411_v22, %v1239_v24  ;;  %v1316_v31 = vadd.f32 %v3413_v29, %v1310_v30  ;;  %v1555_v22 = vld [vmem:[#allocation2 + $0xc8] sm:$0xff]  ;;  %v1557_v23 = vld [vmem:[#allocation2 + $0xd8] sm:$0xff]  ;;  %v1554_v24 = vld [vmem:[#allocation2 + $0xc0] sm:$0xff] }
 0x6c9   :  { %v1552_v29 = vld [vmem:[#allocation2 + $0xb0] sm:$0xff]  ;;  %v1547_v30 = vld [vmem:[#allocation2 + $0x88] sm:$0xff] }
 0x6ca   :  { %3625 = vpow2.f32 %v3414_v25  ;;  %v3415_v28 = vmul.f32 -1.442695, %v1314_v26  ;;  %v3416_v33 = vmul.f32 -1.442695, %v1316_v31  ;;  %v1556_v25 = vld [vmem:[#allocation2 + $0xd0] sm:$0xff]  ;;  %v1551_v26 = vld [vmem:[#allocation2 + $0xa8] sm:$0xff] }
 0x6cb   :  { %v1549_v31 = vld [vmem:[#allocation2 + $0x98] sm:$0xff] }
 0x6cc   :  { %3627 = vpow2.f32 %v3415_v28  ;;  %v1550_v28 = vld [vmem:[#allocation2 + $0xa0] sm:$0xff] }
 0x6cd   :  { %3629 = vpow2.f32 %v3416_v33  ;;  %v1548_v33 = vld [vmem:[#allocation2 + $0x90] sm:$0xff] }
 0x6d7   :  { %v3626_v34 = vpop.eup %3625 }
 0x6d8   :  { %v1320_v36 = vadd.f32 1.0, %v3626_v34  ;;  %v1543_v34 = vld [vmem:[#allocation2 + $0x68] sm:$0xff] }
 0x6d9   :  { %v3628_v37 = vpop.eup %3627 }
 0x6da   :  { %3631 = vrcp.f32 %v1320_v36  ;;  %v1326_v38 = vadd.f32 1.0, %v3628_v37  ;;  %v3630_v39 = vpop.eup %3629  ;;  %v1542_v36 = vld [vmem:[#allocation2 + $0x60] sm:$0xff]  ;;  %v1544_v37 = vld [vmem:[#allocation2 + $0x70] sm:$0xff] }
 0x6db   :  { %3633 = vtanh.f32 %v1315_v35  ;;  %v1333_v43 = vadd.f32 1.0, %v3630_v39  ;;  %v1545_v35 = vld [vmem:[#allocation2 + $0x78] sm:$0xff] }
 0x6dc   :  { %3635 = vrcp.f32 %v1326_v38  ;;  %v1539_v38 = vld [vmem:[#allocation2 + $0x48] sm:$0xff]  ;;  %v1541_v39 = vld [vmem:[#allocation2 + $0x58] sm:$0xff] }
 0x6dd   :  { %3637 = vrcp.f32 %v1333_v43  ;;  %v1537_v43 = vld [vmem:[#allocation2 + $0x38] sm:$0xff] }
 0x6e7   :  { %v3632_v40 = vpop.eup %3631 }
 0x6e8   :  { %v3634_v41 = vpop.eup %3633 }
 0x6e9   :  { %v3636_v42 = vpop.eup %3635  ;;  %v1337_v2 = vmul.f32 %v3634_v41, %v3632_v40  ;;  %v1538_v40 = vld [vmem:[#allocation2 + $0x40] sm:$0xff]  ;;  %v1540_v41 = vld [vmem:[#allocation2 + $0x50] sm:$0xff] }
 0x6ea   :  { %v1336_v60 = vmul.f32 %v3636_v42, %v5206_v49  ;;  %v3638_v12 = vpop.eup %3637  ;;  %v1583_v49 = vld [vmem:[#allocation2 + $0x1a8] sm:$0xff] }
 0x6eb   :  { %v1535_v42 = vld [vmem:[#allocation2 + $0x28] sm:$0xff] }
 0x6ec   :  { %v5290_v5 = vadd.f32 %v1337_v2, %v1336_v60  ;;  %v1534_v2 = vld [vmem:[#allocation2 + $0x20] sm:$0xff]  ;;  %v1536_v60 = vld [vmem:[#allocation2 + $0x30] sm:$0xff] }
 0x6ee   :  { %3639 = vtanh.f32 %v5290_v5 }
 0x6fb   :  { %v3640_v9 = vpop.eup %3639 }
 0x6fc   :  { %v5293_v16 = vmul.f32 %v3640_v9, %v3638_v12  ;;  %v1531_v12 = vld [vmem:[#allocation2 + $0x8] sm:$0xff]  ;;  %v1533_v9 = vld [vmem:[#allocation2 + $0x18] sm:$0xff] }
 0x6fe   :  { %1413 = vmatmul.mubr.f32.vlgmr.msra.gmra.mxu0 %v5293_v16  ;;  %1484 = vmatmul.mubr.f32.vlgmr.msra.gmra.mxu1 %v5293_v16 }
 0x6ff   :  { %1617 = vmatpush1.msra.mxu0 %v1590_v44  ;;  %1730 = vmatpush1.msra.mxu1 %v1592_v14  ;;  %v1530_v44 = vld [vmem:[#allocation2] sm:$0xff]  ;;  %v1532_v14 = vld [vmem:[#allocation2 + $0x10] sm:$0xff] }
 0x700   :  { %1618 = vmatprep.subr.mxu0 %v1587_v18  ;;  %1731 = vmatprep.subr.mxu1 %v1589_v47  ;;  %v1522_v18 = vld [vmem:[%s6710_s6] sm:$0xff]  ;;  %v1523_v47 = vld [vmem:[%s6710_s6 + $0x8] sm:$0xff] }
 0x701   :  { %1619 = vmatpush1.msra.mxu0 %v1586_v19  ;;  %1732 = vmatpush1.msra.mxu1 %v1588_v45  ;;  %v1524_v19 = vld [vmem:[%s6710_s6 + $0x10] sm:$0xff] }
 0x702   :  { %1620 = vmatprep.subr.mxu0 %v1583_v49  ;;  %1733 = vmatprep.subr.mxu1 %v1585_v58  ;;  %v7010_v45 = vld [vmem:[#allocation8_spill] sm:$0xff]  ;;  %v7011_v49 = vld [vmem:[#allocation13_spill] sm:$0xff]  ;;  %v5333_v58 = vld [vmem:[%s6706_s2 + $0x3e8] sm:$0xff] }
 0x703   :  { %1621 = vmatpush1.msra.mxu0 %v1582_v46  ;;  %1734 = vmatpush1.msra.mxu1 %v1584_v7  ;;  %7012 = vst [vmem:[#allocation6_spill] sm:$0xff] %v5333_v58  ;;  %v5350_v46 = vld [vmem:[%s6706_s2 + $0x3f0] sm:$0xff]  ;;  %v5356_v7 = vld [vmem:[%s6706_s2 + $0x3c8] sm:$0xff] }
 0x704   :  { %1622 = vmatprep.subr.mxu0 %v1579_v61  ;;  %1735 = vmatprep.subr.mxu1 %v1581_v20  ;;  %v5362_v61 = vld [vmem:[%s6706_s2 + $0x3d8] sm:$0xff]  ;;  %v5368_v20 = vld [vmem:[%s6706_s2 + $0x3c0] sm:$0xff] }
 0x705   :  { %1623 = vmatpush1.msra.mxu0 %v1578_v51  ;;  %1736 = vmatpush1.msra.mxu1 %v1580_v53  ;;  %v5374_v51 = vld [vmem:[%s6706_s2 + $0x3d0] sm:$0xff]  ;;  %v5380_v53 = vld [vmem:[%s6706_s2 + $0x3a8] sm:$0xff] }
 0x706   :  { %1624 = vmatprep.subr.mxu0 %v1575_v55  ;;  %1737 = vmatprep.subr.mxu1 %v1577_v50  ;;  %v5386_v55 = vld [vmem:[%s6706_s2 + $0x3b8] sm:$0xff]  ;;  %v5392_v50 = vld [vmem:[%s6706_s2 + $0x3a0] sm:$0xff] }
 0x707   :  { %1625 = vmatpush1.msra.mxu0 %v1574_v0  ;;  %1738 = vmatpush1.msra.mxu1 %v1576_v57  ;;  %v5398_v0 = vld [vmem:[%s6706_s2 + $0x3b0] sm:$0xff]  ;;  %v5404_v57 = vld [vmem:[%s6706_s2 + $0x388] sm:$0xff] }
 0x708   :  { %1626 = vmatprep.subr.mxu0 %v1571_v4  ;;  %1739 = vmatprep.subr.mxu1 %v1573_v48  ;;  %v5410_v4 = vld [vmem:[%s6706_s2 + $0x398] sm:$0xff]  ;;  %v5416_v48 = vld [vmem:[%s6706_s2 + $0x380] sm:$0xff] }
 0x709   :  { %1627 = vmatpush1.msra.mxu0 %v1570_v54  ;;  %1740 = vmatpush1.msra.mxu1 %v1572_v62  ;;  %v5422_v54 = vld [vmem:[%s6706_s2 + $0x390] sm:$0xff]  ;;  %v5428_v62 = vld [vmem:[%s6706_s2 + $0x368] sm:$0xff] }
 0x70a   :  { %1628 = vmatprep.subr.mxu0 %v1567_v52  ;;  %1741 = vmatprep.subr.mxu1 %v1569_v56  ;;  %v5434_v52 = vld [vmem:[%s6706_s2 + $0x378] sm:$0xff]  ;;  %v5440_v56 = vld [vmem:[%s6706_s2 + $0x360] sm:$0xff] }
 0x70b   :  { %1629 = vmatpush1.msra.mxu0 %v1566_v63  ;;  %1742 = vmatpush1.msra.mxu1 %v1568_v59  ;;  %v5446_v63 = vld [vmem:[%s6706_s2 + $0x370] sm:$0xff]  ;;  %v5452_v59 = vld [vmem:[%s6706_s2 + $0x348] sm:$0xff] }
 0x70c   :  { %1630 = vmatprep.subr.mxu0 %v1563_v1  ;;  %1743 = vmatprep.subr.mxu1 %v1565_v3  ;;  %v5458_v1 = vld [vmem:[%s6706_s2 + $0x358] sm:$0xff]  ;;  %v5464_v3 = vld [vmem:[%s6706_s2 + $0x340] sm:$0xff] }
 0x70d   :  { %1631 = vmatpush1.msra.mxu0 %v1562_v6  ;;  %1744 = vmatpush1.msra.mxu1 %v1564_v8  ;;  %v5470_v6 = vld [vmem:[%s6706_s2 + $0x350] sm:$0xff]  ;;  %v5476_v8 = vld [vmem:[%s6706_s2 + $0x328] sm:$0xff] }
 0x70e   :  { %1632 = vmatprep.subr.mxu0 %v1559_v13  ;;  %1745 = vmatprep.subr.mxu1 %v1561_v15  ;;  %v5482_v13 = vld [vmem:[%s6706_s2 + $0x338] sm:$0xff]  ;;  %v5488_v15 = vld [vmem:[%s6706_s2 + $0x320] sm:$0xff] }
 0x70f   :  { %1633 = vmatpush1.msra.mxu0 %v1558_v17  ;;  %1746 = vmatpush1.msra.mxu1 %v1560_v21  ;;  %v5494_v17 = vld [vmem:[%s6706_s2 + $0x330] sm:$0xff]  ;;  %v5500_v21 = vld [vmem:[%s6706_s2 + $0x308] sm:$0xff] }
 0x710   :  { %1634 = vmatprep.subr.mxu0 %v1555_v22  ;;  %1747 = vmatprep.subr.mxu1 %v1557_v23  ;;  %v5506_v22 = vld [vmem:[%s6706_s2 + $0x318] sm:$0xff]  ;;  %v5512_v23 = vld [vmem:[%s6706_s2 + $0x300] sm:$0xff] }
 0x711   :  { %1635 = vmatpush1.msra.mxu0 %v1554_v24  ;;  %1748 = vmatpush1.msra.mxu1 %v1556_v25  ;;  %v5518_v24 = vld [vmem:[%s6706_s2 + $0x310] sm:$0xff]  ;;  %v5524_v25 = vld [vmem:[%s6706_s2 + $0x2e8] sm:$0xff] }
 0x712   :  { %1636 = vmatprep.subr.mxu0 %v1551_v26  ;;  %1749 = vmatprep.subr.mxu1 %v1553_v27  ;;  %v5530_v26 = vld [vmem:[%s6706_s2 + $0x2f8] sm:$0xff]  ;;  %v5536_v27 = vld [vmem:[%s6706_s2 + $0x2e0] sm:$0xff] }
 0x713   :  { %1637 = vmatpush1.msra.mxu0 %v1550_v28  ;;  %1750 = vmatpush1.msra.mxu1 %v1552_v29  ;;  %v5542_v28 = vld [vmem:[%s6706_s2 + $0x2f0] sm:$0xff]  ;;  %v5548_v29 = vld [vmem:[%s6706_s2 + $0x2c8] sm:$0xff] }
 0x714   :  { %1638 = vmatprep.subr.mxu0 %v1547_v30  ;;  %1751 = vmatprep.subr.mxu1 %v1549_v31  ;;  %v5554_v30 = vld [vmem:[%s6706_s2 + $0x2d8] sm:$0xff]  ;;  %v5560_v31 = vld [vmem:[%s6706_s2 + $0x2c0] sm:$0xff] }
 0x715   :  { %1639 = vmatpush1.msra.mxu0 %v1546_v32  ;;  %1752 = vmatpush1.msra.mxu1 %v1548_v33  ;;  %v5566_v32 = vld [vmem:[%s6706_s2 + $0x2d0] sm:$0xff]  ;;  %v5572_v33 = vld [vmem:[%s6706_s2 + $0x2a8] sm:$0xff] }
 0x716   :  { %1640 = vmatprep.subr.mxu0 %v1543_v34  ;;  %1753 = vmatprep.subr.mxu1 %v1545_v35  ;;  %v5578_v34 = vld [vmem:[%s6706_s2 + $0x2b8] sm:$0xff]  ;;  %v5584_v35 = vld [vmem:[%s6706_s2 + $0x2a0] sm:$0xff] }
 0x717   :  { %1641 = vmatpush1.msra.mxu0 %v1542_v36  ;;  %1754 = vmatpush1.msra.mxu1 %v1544_v37  ;;  %v5590_v36 = vld [vmem:[%s6706_s2 + $0x2b0] sm:$0xff]  ;;  %v5596_v37 = vld [vmem:[%s6706_s2 + $0x288] sm:$0xff] }
 0x718   :  { %1642 = vmatprep.subr.mxu0 %v1539_v38  ;;  %1755 = vmatprep.subr.mxu1 %v1541_v39  ;;  %7014 = vst [vmem:[#allocation14_spill] sm:$0xff] %v5590_v36  ;;  %7015 = vst [vmem:[#allocation21_spill] sm:$0xff] %v5596_v37  ;;  %v5602_v38 = vld [vmem:[%s6706_s2 + $0x298] sm:$0xff]  ;;  %v5608_v39 = vld [vmem:[%s6706_s2 + $0x280] sm:$0xff] }
 0x719   :  { %1643 = vmatpush1.msra.mxu0 %v1538_v40  ;;  %1756 = vmatpush1.msra.mxu1 %v1540_v41  ;;  %7016 = vst [vmem:[#allocation9_spill] sm:$0xff] %v5602_v38  ;;  %7017 = vst [vmem:[#allocation15_spill] sm:$0xff] %v5608_v39  ;;  %v5614_v40 = vld [vmem:[%s6706_s2 + $0x290] sm:$0xff]  ;;  %v5620_v41 = vld [vmem:[%s6706_s2 + $0x268] sm:$0xff] }
 0x71a   :  { %1644 = vmatprep.subr.mxu0 %v1535_v42  ;;  %1757 = vmatprep.subr.mxu1 %v1537_v43  ;;  %7018 = vst [vmem:[#allocation16_spill] sm:$0xff] %v5614_v40  ;;  %7019 = vst [vmem:[#allocation22_spill] sm:$0xff] %v5620_v41  ;;  %v5626_v42 = vld [vmem:[%s6706_s2 + $0x278] sm:$0xff]  ;;  %v5632_v43 = vld [vmem:[%s6706_s2 + $0x260] sm:$0xff] }
 0x71b   :  { %1645 = vmatpush1.msra.mxu0 %v1534_v2  ;;  %1758 = vmatpush1.msra.mxu1 %v1536_v60  ;;  %7020 = vst [vmem:[#allocation10_spill] sm:$0xff] %v5626_v42  ;;  %7021 = vst [vmem:[#allocation17_spill] sm:$0xff] %v5632_v43  ;;  %v5638_v2 = vld [vmem:[%s6706_s2 + $0x270] sm:$0xff]  ;;  %v5644_v60 = vld [vmem:[%s6706_s2 + $0x248] sm:$0xff] }
 0x71c   :  { %1646 = vmatprep.subr.mxu0 %v1531_v12  ;;  %1759 = vmatprep.subr.mxu1 %v1533_v9  ;;  %7022 = vst [vmem:[#allocation18_spill] sm:$0xff] %v5638_v2  ;;  %7023 = vst [vmem:[#allocation23_spill] sm:$0xff] %v5644_v60  ;;  %v5650_v12 = vld [vmem:[%s6706_s2 + $0x258] sm:$0xff]  ;;  %v5656_v9 = vld [vmem:[%s6706_s2 + $0x240] sm:$0xff] }
 0x71d   :  { %1647 = vmatpush1.msra.mxu0 %v1530_v44  ;;  %1680 = vmatprep.mubr.f32.mxu0 %v7009_v11  ;;  %7024 = vst [vmem:[#allocation11_spill] sm:$0xff] %v5650_v12  ;;  %7025 = vst [vmem:[#allocation7_spill] sm:$0xff] %v5656_v9  ;;  %v5662_v44 = vld [vmem:[%s6706_s2 + $0x250] sm:$0xff] }
 0x71e   :  { %1760 = vmatpush1.msra.mxu1 %v1532_v14  ;;  %1793 = vmatprep.mubr.f32.mxu1 %v7009_v11  ;;  %7026 = vst [vmem:[#allocation19_spill] sm:$0xff] %v5662_v44  ;;  %v5668_v14 = vld [vmem:[%s6706_s2 + $0x228] sm:$0xff] }
 0x71f   :  { %1681 = vmatmul.mubr.f32.vlgmr.msra.gmra.mxu0 %v1522_v18  ;;  %1794 = vmatmul.mubr.f32.vlgmr.msra.gmra.mxu1 %v1522_v18  ;;  %7027 = vst [vmem:[#allocation24_spill] sm:$0xff] %v5668_v14  ;;  %v5674_v18 = vld [vmem:[%s6706_s2 + $0x238] sm:$0xff] }
 0x720   :  { %1686 = vmatprep.mubr.f32.mxu0 %v7009_v11  ;;  %1799 = vmatprep.mubr.f32.mxu1 %v7009_v11  ;;  %7028 = vst [vmem:[#allocation12_spill] sm:$0xff] %v5674_v18 }
 0x721   :  { %1947 = vmatprep.subr.mxu0 %v5333_v58 }
 0x723   :  { %1687 = vmatmul.mubr.f32.gmra.mxu0 %v1523_v47  ;;  %1800 = vmatmul.mubr.f32.gmra.mxu1 %v1523_v47  ;;  %v5680_v47 = vld [vmem:[%s6706_s2 + $0x220] sm:$0xff] }
 0x724   :  { %1692 = vmatprep.mubr.f32.mxu0 %v7009_v11  ;;  %1805 = vmatprep.mubr.f32.mxu1 %v7009_v11  ;;  %7029 = vst [vmem:[#allocation25_spill] sm:$0xff] %v5680_v47 }
 0x727   :  { %1693 = vmatmul.mubr.f32.gmra.mxu0 %v1524_v19  ;;  %1806 = vmatmul.mubr.f32.gmra.mxu1 %v1524_v19  ;;  %v5686_v19 = vld [vmem:[%s6706_s2 + $0x230] sm:$0xff] }
 0x728   :  { %1698 = vmatprep.mubr.f32.mxu0 %v7009_v11  ;;  %1811 = vmatprep.mubr.f32.mxu1 %v7009_v11  ;;  %7030 = vst [vmem:[#allocation8_spill] sm:$0xff] %v5686_v19 }
 0x72b   :  { %1699 = vmatmul.mubr.f32.gmra.mxu0 %v7010_v45  ;;  %1812 = vmatmul.mubr.f32.gmra.mxu1 %v7010_v45  ;;  %v5692_v45 = vld [vmem:[%s6706_s2 + $0x208] sm:$0xff] }
 0x72c   :  { %1704 = vmatprep.mubr.f32.mxu0 %v7009_v11  ;;  %1817 = vmatprep.mubr.f32.mxu1 %v7009_v11  ;;  %7031 = vst [vmem:[#allocation13_spill] sm:$0xff] %v5692_v45 }
 0x72f   :  { %1705 = vmatmul.mubr.f32.gmra.mxu0 %v7011_v49  ;;  %1818 = vmatmul.mubr.f32.gmra.mxu1 %v7011_v49  ;;  %v5698_v49 = vld [vmem:[%s6706_s2 + $0x200] sm:$0xff] }
 0x730   :  { %1710 = vmatprep.mubr.f32.mxu0 %v7009_v11  ;;  %1823 = vmatprep.mubr.f32.mxu1 %v7009_v11  ;;  %7032 = vst [vmem:[#allocation26_spill] sm:$0xff] %v5698_v49 }
 0x733   :  { %1711 = vmatmul.mubr.f32.gmra.mxu0 %v5209_v10  ;;  %1824 = vmatmul.mubr.f32.gmra.mxu1 %v5209_v10  ;;  %v5338_v10 = vld [vmem:[%s6706_s2 + $0x3f8] sm:$0xff] }
 0x734   :  { %1716 = vmatprep.mubr.f32.mxu0 %v7009_v11  ;;  %1829 = vmatprep.mubr.f32.mxu1 %v7009_v11  ;;  %7013 = vst [vmem:[#allocation20_spill] sm:$0xff] %v5338_v10 }
 0x735   :  { %2018 = vmatprep.subr.mxu1 %v5338_v10 }
 0x736   :  { %2019 = vmatpush1.msra.mxu1 %v5350_v46 }
 0x737   :  { %1717 = vmatmul.mubr.f32.gmra.mxu0 %v5293_v16  ;;  %1830 = vmatmul.mubr.f32.gmra.mxu1 %v5293_v16  ;;  %v5344_v16 = vld [vmem:[%s6706_s2 + $0x3e0] sm:$0xff] }
 0x738   :  { %1722 = vmatprep.mubr.f32.mxu0 %v7009_v11  ;;  %1835 = vmatprep.mubr.f32.mxu1 %v7009_v11 }
 0x739   :  { %1948 = vmatpush1.msra.mxu0 %v5344_v16  ;;  %2020 = vmatprep.subr.mxu1 %v5362_v61 }
 0x73a   :  { %1949 = vmatprep.subr.mxu0 %v5356_v7  ;;  %2021 = vmatpush1.msra.mxu1 %v5374_v51 }
 0x73b   :  { %1950 = vmatpush1.msra.mxu0 %v5368_v20  ;;  %2022 = vmatprep.subr.mxu1 %v5386_v55 }
 0x73c   :  { %1951 = vmatprep.subr.mxu0 %v5380_v53  ;;  %2023 = vmatpush1.msra.mxu1 %v5398_v0 }
 0x73d   :  { %1952 = vmatpush1.msra.mxu0 %v5392_v50  ;;  %2024 = vmatprep.subr.mxu1 %v5410_v4 }
 0x73e   :  { %1953 = vmatprep.subr.mxu0 %v5404_v57  ;;  %2025 = vmatpush1.msra.mxu1 %v5422_v54 }
 0x73f   :  { %1954 = vmatpush1.msra.mxu0 %v5416_v48  ;;  %2026 = vmatprep.subr.mxu1 %v5434_v52 }
 0x740   :  { %1955 = vmatprep.subr.mxu0 %v5428_v62  ;;  %2027 = vmatpush1.msra.mxu1 %v5446_v63 }
 0x741   :  { %1956 = vmatpush1.msra.mxu0 %v5440_v56  ;;  %2028 = vmatprep.subr.mxu1 %v5458_v1 }
 0x742   :  { %1957 = vmatprep.subr.mxu0 %v5452_v59  ;;  %2029 = vmatpush1.msra.mxu1 %v5470_v6 }
 0x743   :  { %1958 = vmatpush1.msra.mxu0 %v5464_v3  ;;  %2030 = vmatprep.subr.mxu1 %v5482_v13 }
 0x744   :  { %1959 = vmatprep.subr.mxu0 %v5476_v8  ;;  %2031 = vmatpush1.msra.mxu1 %v5494_v17 }
 0x745   :  { %1960 = vmatpush1.msra.mxu0 %v5488_v15  ;;  %2032 = vmatprep.subr.mxu1 %v5506_v22 }
 0x746   :  { %1961 = vmatprep.subr.mxu0 %v5500_v21  ;;  %2033 = vmatpush1.msra.mxu1 %v5518_v24 }
 0x747   :  { %1962 = vmatpush1.msra.mxu0 %v5512_v23  ;;  %2034 = vmatprep.subr.mxu1 %v5530_v26 }
 0x748   :  { %1963 = vmatprep.subr.mxu0 %v5524_v25  ;;  %2035 = vmatpush1.msra.mxu1 %v5542_v28 }
 0x749   :  { %1964 = vmatpush1.msra.mxu0 %v5536_v27  ;;  %2036 = vmatprep.subr.mxu1 %v5554_v30 }
 0x74a   :  { %1965 = vmatprep.subr.mxu0 %v5548_v29  ;;  %2037 = vmatpush1.msra.mxu1 %v5566_v32 }
 0x74b   :  { %1966 = vmatpush1.msra.mxu0 %v5560_v31  ;;  %2038 = vmatprep.subr.mxu1 %v5578_v34 }
 0x74c   :  { %1967 = vmatprep.subr.mxu0 %v5572_v33  ;;  %2039 = vmatpush1.msra.mxu1 %v5590_v36 }
 0x74d   :  { %1968 = vmatpush1.msra.mxu0 %v5584_v35  ;;  %2040 = vmatprep.subr.mxu1 %v5602_v38 }
 0x74e   :  { %1969 = vmatprep.subr.mxu0 %v5596_v37  ;;  %2041 = vmatpush1.msra.mxu1 %v5614_v40 }
 0x74f   :  { %1970 = vmatpush1.msra.mxu0 %v5608_v39  ;;  %2042 = vmatprep.subr.mxu1 %v5626_v42 }
 0x750   :  { %1971 = vmatprep.subr.mxu0 %v5620_v41  ;;  %2043 = vmatpush1.msra.mxu1 %v5638_v2  ;;  %v3420_v2 = vld [vmem:[%s6704_s0 + $0xf0] sm:$0xff] }
 0x751   :  { %1972 = vmatpush1.msra.mxu0 %v5632_v43  ;;  %2044 = vmatprep.subr.mxu1 %v5650_v12 }
 0x752   :  { %1973 = vmatprep.subr.mxu0 %v5644_v60  ;;  %2045 = vmatpush1.msra.mxu1 %v5662_v44 }
 0x753   :  { %1974 = vmatpush1.msra.mxu0 %v5656_v9  ;;  %2046 = vmatprep.subr.mxu1 %v5674_v18  ;;  %v5703_v18 = vld [vmem:[%s6706_s2 + $0x218] sm:$0xff] }
 0x754   :  { %1975 = vmatprep.subr.mxu0 %v5668_v14  ;;  %2047 = vmatpush1.msra.mxu1 %v5686_v19  ;;  %7033 = vst [vmem:[#allocation27_spill] sm:$0xff] %v5703_v18  ;;  %v3418_v19 = vld [vmem:[%s6704_s0 + $0xe0] sm:$0xff] }
 0x755   :  { %1976 = vmatpush1.msra.mxu0 %v5680_v47  ;;  %2048 = vmatprep.subr.mxu1 %v5703_v18  ;;  %v5710_v47 = vld [vmem:[%s6706_s2 + $0x210] sm:$0xff]  ;;  %v3419_v18 = vld [vmem:[%s6704_s0 + $0xe8] sm:$0xff] }
 0x756   :  { %1977 = vmatprep.subr.mxu0 %v5692_v45  ;;  %7034 = vst [vmem:[#allocation28_spill] sm:$0xff] %v5710_v47  ;;  %2049 = vmatpush1.msra.mxu1 %v5710_v47 }
 0x757   :  { %1978 = vmatpush1.msra.mxu0 %v5698_v49  ;;  %2194 = vmatprep.subr.mxu1 %v5338_v10  ;;  %v3421_v10 = vld [vmem:[%s6704_s0 + $0xf8] sm:$0xff] }
 0x758   :  { %2123 = vmatprep.subr.mxu0 %v5333_v58 }
 0x7be   :  { %v1414_v45 = vpop.f32.mrf.mxu0  ;;  %v1485_v49 = vpop.f32.mrf.mxu1 }
 0x7bf   :  { %v1490_v14 = vadd.f32 %v3418_v19, %v1414_v45  ;;  %v1492_v19 = vadd.f32 %v3420_v2, %v1485_v49  ;;  %v7038_v49 = vld [vmem:[#allocation17_spill] sm:$0xff] }
 0x7c0   :  { %v1416_v44 = vpop.f32.mrf.mxu0  ;;  %v1487_v58 = vpop.f32.mrf.mxu1 }
 0x7c1   :  { %v3422_v9 = vmul.f32 -1.442695, %v1490_v14  ;;  %v1491_v12 = vadd.f32 %v3419_v18, %v1416_v44  ;;  %v1493_v60 = vadd.f32 %v3421_v10, %v1487_v58 }
 0x7c3   :  { %3641 = vpow2.f32 %v3422_v9  ;;  %v3423_v47 = vmul.f32 -1.442695, %v1491_v12  ;;  %v3424_v43 = vmul.f32 -1.442695, %v1493_v60  ;;  %v7037_v60 = vld [vmem:[#allocation10_spill] sm:$0xff] }
 0x7c5   :  { %3643 = vpow2.f32 %v3423_v47 }
 0x7c6   :  { %3645 = vpow2.f32 %v3424_v43 }
 0x7d0   :  { %v3642_v42 = vpop.eup %3641 }
 0x7d1   :  { %v1497_v45 = vadd.f32 1.0, %v3642_v42 }
 0x7d2   :  { %v3644_v14 = vpop.eup %3643 }
 0x7d3   :  { %3647 = vrcp.f32 %v1497_v45  ;;  %v1503_v9 = vadd.f32 1.0, %v3644_v14  ;;  %v3646_v12 = vpop.eup %3645  ;;  %v7040_v45 = vld [vmem:[#allocation23_spill] sm:$0xff] }
 0x7d4   :  { %3649 = vtanh.f32 %v1492_v19  ;;  %v1510_v41 = vadd.f32 1.0, %v3646_v12  ;;  %v7039_v19 = vld [vmem:[#allocation18_spill] sm:$0xff]  ;;  %v7041_v14 = vld [vmem:[#allocation11_spill] sm:$0xff] }
 0x7d5   :  { %3651 = vrcp.f32 %v1503_v9  ;;  %v7042_v9 = vld [vmem:[#allocation7_spill] sm:$0xff] }
 0x7d6   :  { %3653 = vrcp.f32 %v1510_v41  ;;  %v7036_v41 = vld [vmem:[#allocation22_spill] sm:$0xff]  ;;  %v7043_v12 = vld [vmem:[#allocation19_spill] sm:$0xff] }
 0x7e0   :  { %v3648_v44 = vpop.eup %3647 }
 0x7e1   :  { %v3650_v18 = vpop.eup %3649 }
 0x7e2   :  { %v3652_v47 = vpop.eup %3651  ;;  %v1514_v58 = vmul.f32 %v3650_v18, %v3648_v44  ;;  %v7044_v44 = vld [vmem:[#allocation24_spill] sm:$0xff] }
 0x7e3   :  { %v1513_v10 = vmul.f32 %v3652_v47, %v5290_v5  ;;  %v3654_v42 = vpop.eup %3653  ;;  %v3490_v5 = vld [vmem:[%s6708_s4 + $0x8] sm:$0xff]  ;;  %v7045_v18 = vld [vmem:[#allocation12_spill] sm:$0xff]  ;;  %v7046_v47 = vld [vmem:[#allocation25_spill] sm:$0xff] }
 0x7e5   :  { %v1515_v40 = vadd.f32 %v1514_v58, %v1513_v10  ;;  %v7047_v58 = vld [vmem:[#allocation8_spill] sm:$0xff]  ;;  %v7048_v10 = vld [vmem:[#allocation13_spill] sm:$0xff] }
 0x7e7   :  { %3655 = vtanh.f32 %v1515_v40  ;;  %1521 = vst [vmem:[%s6712_s8] sm:$0xff] %v1515_v40  ;;  %v7035_v40 = vld [vmem:[#allocation16_spill] sm:$0xff] }
 0x7f4   :  { %v3656_v43 = vpop.eup %3655 }
 0x7f5   :  { %v1517_v2 = vmul.f32 %v3656_v43, %v3654_v42  ;;  %v7049_v42 = vld [vmem:[#allocation27_spill] sm:$0xff]  ;;  %v7050_v43 = vld [vmem:[#allocation26_spill] sm:$0xff] }
 0x7f7   :  { %1520 = vst [vmem:[%s6711_s7] sm:$0xff] %v1517_v2  ;;  %1723 = vmatmul.mubr.f32.gmra.mxu0 %v1517_v2  ;;  %1836 = vmatmul.mubr.f32.gmra.mxu1 %v1517_v2  ;;  %v7051_v2 = vld [vmem:[#allocation28_spill] sm:$0xff] }
 0x7f8   :  { %2011 = vmatprep.mubr.f32.mxu0 %v7009_v11  ;;  %2082 = vmatprep.mubr.f32.mxu1 %v7009_v11 }
 0x7fb   :  { %2012 = vmatmul.mubr.f32.vlgmr.msra.gmra.mxu0 %v3490_v5  ;;  %2083 = vmatmul.mubr.f32.vlgmr.msra.gmra.mxu1 %v3490_v5  ;;  %v7052_v5 = vld [vmem:[#allocation6_spill] sm:$0xff] }
 0x7fc   :  { %2124 = vmatpush1.msra.mxu0 %v5344_v16  ;;  %2195 = vmatpush1.msra.mxu1 %v5350_v46 }
 0x7fd   :  { %2125 = vmatprep.subr.mxu0 %v5356_v7  ;;  %2196 = vmatprep.subr.mxu1 %v5362_v61 }
 0x7fe   :  { %2126 = vmatpush1.msra.mxu0 %v5368_v20  ;;  %2197 = vmatpush1.msra.mxu1 %v5374_v51 }
 0x7ff   :  { %2127 = vmatprep.subr.mxu0 %v5380_v53  ;;  %2198 = vmatprep.subr.mxu1 %v5386_v55 }
 0x800   :  { %2128 = vmatpush1.msra.mxu0 %v5392_v50  ;;  %2199 = vmatpush1.msra.mxu1 %v5398_v0 }
 0x801   :  { %2129 = vmatprep.subr.mxu0 %v5404_v57  ;;  %2200 = vmatprep.subr.mxu1 %v5410_v4 }
 0x802   :  { %2130 = vmatpush1.msra.mxu0 %v5416_v48  ;;  %2201 = vmatpush1.msra.mxu1 %v5422_v54 }
 0x803   :  { %2131 = vmatprep.subr.mxu0 %v5428_v62  ;;  %2202 = vmatprep.subr.mxu1 %v5434_v52 }
 0x804   :  { %2132 = vmatpush1.msra.mxu0 %v5440_v56  ;;  %2203 = vmatpush1.msra.mxu1 %v5446_v63 }
 0x805   :  { %2133 = vmatprep.subr.mxu0 %v5452_v59  ;;  %2204 = vmatprep.subr.mxu1 %v5458_v1 }
 0x806   :  { %2134 = vmatpush1.msra.mxu0 %v5464_v3  ;;  %2205 = vmatpush1.msra.mxu1 %v5470_v6 }
 0x807   :  { %2135 = vmatprep.subr.mxu0 %v5476_v8  ;;  %2206 = vmatprep.subr.mxu1 %v5482_v13 }
 0x808   :  { %2136 = vmatpush1.msra.mxu0 %v5488_v15  ;;  %2207 = vmatpush1.msra.mxu1 %v5494_v17 }
 0x809   :  { %2137 = vmatprep.subr.mxu0 %v5500_v21  ;;  %2208 = vmatprep.subr.mxu1 %v5506_v22 }
 0x80a   :  { %2138 = vmatpush1.msra.mxu0 %v5512_v23  ;;  %2209 = vmatpush1.msra.mxu1 %v5518_v24 }
 0x80b   :  { %2139 = vmatprep.subr.mxu0 %v5524_v25  ;;  %2210 = vmatprep.subr.mxu1 %v5530_v26 }
 0x80c   :  { %2140 = vmatpush1.msra.mxu0 %v5536_v27  ;;  %2211 = vmatpush1.msra.mxu1 %v5542_v28 }
 0x80d   :  { %2141 = vmatprep.subr.mxu0 %v5548_v29  ;;  %2212 = vmatprep.subr.mxu1 %v5554_v30 }
 0x80e   :  { %2142 = vmatpush1.msra.mxu0 %v5560_v31  ;;  %2213 = vmatpush1.msra.mxu1 %v5566_v32 }
 0x80f   :  { %2143 = vmatprep.subr.mxu0 %v5572_v33  ;;  %2214 = vmatprep.subr.mxu1 %v5578_v34 }
 0x810   :  { %2144 = vmatpush1.msra.mxu0 %v5584_v35  ;;  %2215 = vmatpush1.msra.mxu1 %v5590_v36 }
 0x811   :  { %2145 = vmatprep.subr.mxu0 %v5596_v37  ;;  %2216 = vmatprep.subr.mxu1 %v5602_v38 }
 0x812   :  { %2146 = vmatpush1.msra.mxu0 %v5608_v39  ;;  %2217 = vmatpush1.msra.mxu1 %v7035_v40 }
 0x813   :  { %2147 = vmatprep.subr.mxu0 %v7036_v41  ;;  %2218 = vmatprep.subr.mxu1 %v7037_v60 }
 0x814   :  { %2148 = vmatpush1.msra.mxu0 %v7038_v49  ;;  %2219 = vmatpush1.msra.mxu1 %v7039_v19 }
 0x815   :  { %2149 = vmatprep.subr.mxu0 %v7040_v45  ;;  %2220 = vmatprep.subr.mxu1 %v7041_v14 }
 0x816   :  { %2150 = vmatpush1.msra.mxu0 %v7042_v9  ;;  %2221 = vmatpush1.msra.mxu1 %v7043_v12 }
 0x817   :  { %2151 = vmatprep.subr.mxu0 %v7044_v44  ;;  %2222 = vmatprep.subr.mxu1 %v7045_v18  ;;  %v7053_v44 = vld [vmem:[#allocation20_spill] sm:$0xff]  ;;  %v1682_v18 = vpop.f32.mrf.mxu0 }
 0x818   :  { %2152 = vmatpush1.msra.mxu0 %v7046_v47  ;;  %2223 = vmatpush1.msra.mxu1 %v7047_v58  ;;  %v1795_v47 = vpop.f32.mrf.mxu1 }
 0x819   :  { %2153 = vmatprep.subr.mxu0 %v7048_v10  ;;  %2224 = vmatprep.subr.mxu1 %v7049_v42  ;;  %v1684_v12 = vpop.f32.mrf.mxu0 }
 0x81a   :  { %2154 = vmatpush1.msra.mxu0 %v7050_v43  ;;  %2187 = vmatprep.mubr.f32.mxu0 %v7009_v11  ;;  %v1797_v58 = vpop.f32.mrf.mxu1 }
 0x81b   :  { %2225 = vmatpush1.msra.mxu1 %v7051_v2  ;;  %2258 = vmatprep.mubr.f32.mxu1 %v7009_v11  ;;  %v5806_v9 = vpop.f32.mrf.mxu0 }
 0x81c   :  { %2299 = vmatprep.subr.mxu0 %v7052_v5  ;;  %2370 = vmatprep.subr.mxu1 %v7053_v44  ;;  %7054 = vst [vmem:[#allocation29_spill] sm:$0xff] %v5806_v9  ;;  %v5808_v10 = vpop.f32.mrf.mxu1 }
 0x81d   :  { %7055 = vst [vmem:[#allocation30_spill] sm:$0xff] %v5808_v10  ;;  %v5810_v42 = vpop.f32.mrf.mxu0 }
 0x81e   :  { %7056 = vst [vmem:[#allocation31_spill] sm:$0xff] %v5810_v42  ;;  %v5812_v43 = vpop.f32.mrf.mxu1 }
 0x81f   :  { %7057 = vst [vmem:[#allocation32_spill] sm:$0xff] %v5812_v43  ;;  %v5814_v14 = vpop.f32.mrf.mxu0 }
 0x820   :  { %7058 = vst [vmem:[#allocation33_spill] sm:$0xff] %v5814_v14  ;;  %v5816_v2 = vpop.f32.mrf.mxu1 }
 0x821   :  { %7059 = vst [vmem:[#allocation34_spill] sm:$0xff] %v5816_v2  ;;  %v5818_v11 = vpop.f32.mrf.mxu0 }
 0x822   :  { %7060 = vst [vmem:[#allocation35_spill] sm:$0xff] %v5818_v11  ;;  %v5820_v5 = vpop.f32.mrf.mxu1  ;;  %v1596_v11 = vlaneseq }
 0x823   :  { %7061 = vst [vmem:[#allocation36_spill] sm:$0xff] %v5820_v5  ;;  %v5822_v44 = vpop.f32.mrf.mxu0 }
 0x824   :  { %7062 = vst [vmem:[#allocation37_spill] sm:$0xff] %v5822_v44  ;;  %v5824_v45 = vpop.f32.mrf.mxu1 }
 0x825   :  { %7063 = vst [vmem:[#allocation38_spill] sm:$0xff] %v5824_v45  ;;  %v5826_v19 = vpop.f32.mrf.mxu0  ;;  %v1597_v45 = vshrl.u32 %v1596_v11, 7 }
 0x826   :  { %7064 = vst [vmem:[#allocation39_spill] sm:$0xff] %v5826_v19  ;;  %v5828_v9 = vpop.f32.mrf.mxu1 }
 0x827   :  { %7065 = vst [vmem:[#allocation40_spill] sm:$0xff] %v5828_v9  ;;  %v5830_v10 = vpop.f32.mrf.mxu0  ;;  %v1598_v9 = vsub.s32 0, %v1597_v45 }
 0x828   :  { %7066 = vst [vmem:[#allocation41_spill] sm:$0xff] %v5830_v10  ;;  %v5832_v42 = vpop.f32.mrf.mxu1 }
 0x829   :  { %7067 = vst [vmem:[#allocation42_spill] sm:$0xff] %v5832_v42  ;;  %v5834_v43 = vpop.f32.mrf.mxu0  ;;  %v1594_v42 = vld [vmem:[%s6707_s3] sm:$0xf] }
 0x82a   :  { %7068 = vst [vmem:[#allocation43_spill] sm:$0xff] %v5834_v43  ;;  %v5836_v14 = vpop.f32.mrf.mxu1 }
 0x82b   :  { %7069 = vst [vmem:[#allocation44_spill] sm:$0xff] %v5836_v14  ;;  %v5838_v2 = vpop.f32.mrf.mxu0  ;;  %v1602_v14 = vsub.s32 1, %v1597_v45 }
 0x82c   :  { %7070 = vst [vmem:[#allocation45_spill] sm:$0xff] %v5838_v2  ;;  %v5840_v5 = vpop.f32.mrf.mxu1  ;;  %v5855_v2 = vrot.slane %v1594_v42, %v1598_v9  ;;  %v1610_v9 = vsub.s32 3, %v1597_v45 }
 0x82d   :  { %7071 = vst [vmem:[#allocation46_spill] sm:$0xff] %v5840_v5  ;;  %v5842_v44 = vpop.f32.mrf.mxu0  ;;  %v5861_v11 = vrot.slane %v1594_v42, %v1602_v14 }
 0x82e   :  { %7072 = vst [vmem:[#allocation47_spill] sm:$0xff] %v5842_v44  ;;  %v5844_v49 = vpop.f32.mrf.mxu1  ;;  %7077 = vst [vmem:[#allocation52_spill] sm:$0xff] %v5855_v2  ;;  %v5871_v37 = vrot.slane %v1594_v42, %v1610_v9 }
 0x82f   :  { %7073 = vst [vmem:[#allocation48_spill] sm:$0xff] %v5844_v49  ;;  %v5846_v19 = vpop.f32.mrf.mxu0  ;;  %7080 = vst [vmem:[#allocation55_spill] sm:$0xff] %v5861_v11  ;;  %v1685_v41 = vadd.f32 %v1684_v12, %v5861_v11 }
 0x830   :  { %7074 = vst [vmem:[#allocation49_spill] sm:$0xff] %v5846_v19  ;;  %v5848_v10 = vpop.f32.mrf.mxu1 }
 0x831   :  { %7075 = vst [vmem:[#allocation50_spill] sm:$0xff] %v5848_v10  ;;  %v5853_v43 = vpop.f32.mrf.mxu0  ;;  %v1683_v10 = vadd.f32 %v1682_v18, %v5855_v2  ;;  %v1798_v18 = vadd.f32 %v1797_v58, %v5871_v37 }
 0x832   :  { %7076 = vst [vmem:[#allocation51_spill] sm:$0xff] %v5853_v43  ;;  %v5857_v5 = vpop.f32.mrf.mxu1 }
 0x833   :  { %7078 = vst [vmem:[#allocation53_spill] sm:$0xff] %v5857_v5 }
 0x8b7   :  { %v5859_v44 = vpop.f32.mrf.mxu0  ;;  %v5863_v49 = vpop.f32.mrf.mxu1 }
 0x8b8   :  { %7079 = vst [vmem:[#allocation54_spill] sm:$0xff] %v5859_v44  ;;  %7081 = vst [vmem:[#allocation56_spill] sm:$0xff] %v5863_v49  ;;  %v1606_v49 = vsub.s32 2, %v1597_v45 }
 0x8b9   :  { %v5865_v19 = vpop.f32.mrf.mxu0  ;;  %v5869_v40 = vpop.f32.mrf.mxu1 }
 0x8ba   :  { %7082 = vst [vmem:[#allocation57_spill] sm:$0xff] %v5865_v19  ;;  %7083 = vst [vmem:[#allocation58_spill] sm:$0xff] %v5869_v40  ;;  %v5874_v2 = vrot.slane %v1594_v42, %v1606_v49  ;;  %v3491_v49 = vld [vmem:[%s6709_s5 + $0x8] sm:$0xff] }
 0x8bb   :  { %v2013_v60 = vpop.f32.mrf.mxu0  ;;  %v2084_v44 = vpop.f32.mrf.mxu1 }
 0x8bc   :  { %v2089_v43 = vadd.f32 %v2013_v60, %v1683_v10  ;;  %v1796_v40 = vadd.f32 %v1795_v47, %v5874_v2 }
 0x8bd   :  { %v2015_v39 = vpop.f32.mrf.mxu0  ;;  %v2086_v19 = vpop.f32.mrf.mxu1 }
 0x8be   :  { %v3492_v38 = vmul.f32 -1.442695, %v2089_v43  ;;  %v2090_v5 = vadd.f32 %v2015_v39, %v1685_v41  ;;  %v2092_v12 = vadd.f32 %v2086_v19, %v1798_v18  ;;  %v2091_v11 = vadd.f32 %v2084_v44, %v1796_v40  ;;  %v7085_v18 = vld [vmem:[#allocation9_spill] sm:$0xff] }
 0x8c0   :  { %3657 = vpow2.f32 %v3492_v38  ;;  %v3493_v14 = vmul.f32 -1.442695, %v2090_v5  ;;  %v3494_v60 = vmul.f32 -1.442695, %v2092_v12  ;;  %v7086_v12 = vld [vmem:[#allocation15_spill] sm:$0xff] }
 0x8c2   :  { %3659 = vpow2.f32 %v3493_v14  ;;  %v7084_v14 = vld [vmem:[#allocation21_spill] sm:$0xff] }
 0x8c3   :  { %3661 = vpow2.f32 %v3494_v60  ;;  %v7087_v60 = vld [vmem:[#allocation16_spill] sm:$0xff] }
 0x8cd   :  { %v3658_v10 = vpop.eup %3657 }
 0x8ce   :  { %v2096_v43 = vadd.f32 1.0, %v3658_v10  ;;  %v7088_v10 = vld [vmem:[#allocation22_spill] sm:$0xff] }
 0x8cf   :  { %v3660_v39 = vpop.eup %3659 }
 0x8d0   :  { %3663 = vrcp.f32 %v2096_v43  ;;  %v2102_v38 = vadd.f32 1.0, %v3660_v39  ;;  %v3662_v41 = vpop.eup %3661  ;;  %v7089_v43 = vld [vmem:[#allocation10_spill] sm:$0xff]  ;;  %v7090_v39 = vld [vmem:[#allocation17_spill] sm:$0xff] }
 0x8d1   :  { %3665 = vtanh.f32 %v2091_v11  ;;  %v2109_v42 = vadd.f32 1.0, %v3662_v41  ;;  %v7092_v41 = vld [vmem:[#allocation23_spill] sm:$0xff] }
 0x8d2   :  { %3667 = vrcp.f32 %v2102_v38  ;;  %v7091_v38 = vld [vmem:[#allocation18_spill] sm:$0xff] }
 0x8d3   :  { %3669 = vrcp.f32 %v2109_v42  ;;  %v7097_v42 = vld [vmem:[#allocation12_spill] sm:$0xff] }
 0x8dd   :  { %v3664_v45 = vpop.eup %3663 }
 0x8de   :  { %v3666_v58 = vpop.eup %3665 }
 0x8df   :  { %v3668_v19 = vpop.eup %3667  ;;  %v2113_v47 = vmul.f32 %v3666_v58, %v3664_v45  ;;  %v7093_v45 = vld [vmem:[#allocation11_spill] sm:$0xff] }
 0x8e0   :  { %v2112_v5 = vmul.f32 %v3668_v19, %v3491_v49  ;;  %v3670_v40 = vpop.eup %3669  ;;  %v7094_v49 = vld [vmem:[#allocation7_spill] sm:$0xff]  ;;  %v7096_v19 = vld [vmem:[#allocation24_spill] sm:$0xff] }
 0x8e1   :  { %v7095_v58 = vld [vmem:[#allocation19_spill] sm:$0xff] }
 0x8e2   :  { %v5880_v9 = vadd.f32 %v2113_v47, %v2112_v5  ;;  %v7098_v47 = vld [vmem:[#allocation25_spill] sm:$0xff]  ;;  %v7099_v5 = vld [vmem:[#allocation8_spill] sm:$0xff] }
 0x8e4   :  { %3671 = vtanh.f32 %v5880_v9 }
 0x8f1   :  { %v3672_v44 = vpop.eup %3671 }
 0x8f2   :  { %v2116_v11 = vmul.f32 %v3672_v44, %v3670_v40  ;;  %v7100_v40 = vld [vmem:[#allocation13_spill] sm:$0xff]  ;;  %v7101_v44 = vld [vmem:[#allocation27_spill] sm:$0xff] }
 0x8f4   :  { %2117 = vst [vmem:[%s6710_s6] sm:$0xff] %v2116_v11  ;;  %2188 = vmatmul.mubr.f32.vlgmr.msra.gmra.mxu0 %v2116_v11  ;;  %2259 = vmatmul.mubr.f32.vlgmr.msra.gmra.mxu1 %v2116_v11  ;;  %v7102_v11 = vld [vmem:[#allocation26_spill] sm:$0xff] }
 0x8f5   :  { %2300 = vmatpush1.msra.mxu0 %v5344_v16  ;;  %2371 = vmatpush1.msra.mxu1 %v5350_v46 }
 0x8f6   :  { %2301 = vmatprep.subr.mxu0 %v5356_v7  ;;  %2372 = vmatprep.subr.mxu1 %v5362_v61 }
 0x8f7   :  { %2302 = vmatpush1.msra.mxu0 %v5368_v20  ;;  %2373 = vmatpush1.msra.mxu1 %v5374_v51 }
 0x8f8   :  { %2303 = vmatprep.subr.mxu0 %v5380_v53  ;;  %2374 = vmatprep.subr.mxu1 %v5386_v55 }
 0x8f9   :  { %2304 = vmatpush1.msra.mxu0 %v5392_v50  ;;  %2375 = vmatpush1.msra.mxu1 %v5398_v0 }
 0x8fa   :  { %2305 = vmatprep.subr.mxu0 %v5404_v57  ;;  %2376 = vmatprep.subr.mxu1 %v5410_v4 }
 0x8fb   :  { %2306 = vmatpush1.msra.mxu0 %v5416_v48  ;;  %2377 = vmatpush1.msra.mxu1 %v5422_v54 }
 0x8fc   :  { %2307 = vmatprep.subr.mxu0 %v5428_v62  ;;  %2378 = vmatprep.subr.mxu1 %v5434_v52 }
 0x8fd   :  { %2308 = vmatpush1.msra.mxu0 %v5440_v56  ;;  %2379 = vmatpush1.msra.mxu1 %v5446_v63 }
 0x8fe   :  { %2309 = vmatprep.subr.mxu0 %v5452_v59  ;;  %2380 = vmatprep.subr.mxu1 %v5458_v1 }
 0x8ff   :  { %2310 = vmatpush1.msra.mxu0 %v5464_v3  ;;  %2381 = vmatpush1.msra.mxu1 %v5470_v6 }
 0x900   :  { %2311 = vmatprep.subr.mxu0 %v5476_v8  ;;  %2382 = vmatprep.subr.mxu1 %v5482_v13 }
 0x901   :  { %2312 = vmatpush1.msra.mxu0 %v5488_v15  ;;  %2383 = vmatpush1.msra.mxu1 %v5494_v17 }
 0x902   :  { %2313 = vmatprep.subr.mxu0 %v5500_v21  ;;  %2384 = vmatprep.subr.mxu1 %v5506_v22 }
 0x903   :  { %2314 = vmatpush1.msra.mxu0 %v5512_v23  ;;  %2385 = vmatpush1.msra.mxu1 %v5518_v24 }
 0x904   :  { %2315 = vmatprep.subr.mxu0 %v5524_v25  ;;  %2386 = vmatprep.subr.mxu1 %v5530_v26 }
 0x905   :  { %2316 = vmatpush1.msra.mxu0 %v5536_v27  ;;  %2387 = vmatpush1.msra.mxu1 %v5542_v28 }
 0x906   :  { %2317 = vmatprep.subr.mxu0 %v5548_v29  ;;  %2388 = vmatprep.subr.mxu1 %v5554_v30 }
 0x907   :  { %2318 = vmatpush1.msra.mxu0 %v5560_v31  ;;  %2389 = vmatpush1.msra.mxu1 %v5566_v32 }
 0x908   :  { %2319 = vmatprep.subr.mxu0 %v5572_v33  ;;  %2390 = vmatprep.subr.mxu1 %v5578_v34 }
 0x909   :  { %2320 = vmatpush1.msra.mxu0 %v5584_v35  ;;  %2391 = vmatpush1.msra.mxu1 %v5590_v36 }
 0x90a   :  { %2321 = vmatprep.subr.mxu0 %v7084_v14  ;;  %2392 = vmatprep.subr.mxu1 %v7085_v18  ;;  %v7112_v18 = vld [vmem:[#allocation30_spill] sm:$0xff] }
 0x90b   :  { %2322 = vmatpush1.msra.mxu0 %v7086_v12  ;;  %2393 = vmatpush1.msra.mxu1 %v7087_v60 }
 0x90c   :  { %2323 = vmatprep.subr.mxu0 %v7088_v10  ;;  %2394 = vmatprep.subr.mxu1 %v7089_v43 }
 0x90d   :  { %2324 = vmatpush1.msra.mxu0 %v7090_v39  ;;  %2395 = vmatpush1.msra.mxu1 %v7091_v38  ;;  %v7109_v38 = vld [vmem:[#allocation55_spill] sm:$0xff] }
 0x90e   :  { %2325 = vmatprep.subr.mxu0 %v7092_v41  ;;  %2396 = vmatprep.subr.mxu1 %v7093_v45  ;;  %v7103_v41 = vmov 0.0   ;;  %v7104_v45 = vld [vmem:[#allocation28_spill] sm:$0xff] }
 0x90f   :  { %2326 = vmatpush1.msra.mxu0 %v7094_v49  ;;  %2397 = vmatpush1.msra.mxu1 %v7095_v58  ;;  %v7105_v58 = vld [vmem:[#allocation6_spill] sm:$0xff] }
 0x910   :  { %2327 = vmatprep.subr.mxu0 %v7096_v19  ;;  %2398 = vmatprep.subr.mxu1 %v7097_v42  ;;  %v7106_v19 = vld [vmem:[#allocation20_spill] sm:$0xff] }
 0x911   :  { %2328 = vmatpush1.msra.mxu0 %v7098_v47  ;;  %2399 = vmatpush1.msra.mxu1 %v7099_v5  ;;  %v7107_v42 = vld [vmem:[#allocation52_spill] sm:$0xff]  ;;  %v7108_v47 = vld [vmem:[#allocation29_spill] sm:$0xff] }
 0x912   :  { %2329 = vmatprep.subr.mxu0 %v7100_v40  ;;  %2400 = vmatprep.subr.mxu1 %v7101_v44  ;;  %v1689_v49 = vadd.f32 %v7108_v47, %v7107_v42  ;;  %v7110_v40 = vld [vmem:[#allocation31_spill] sm:$0xff]  ;;  %v1802_v47 = vadd.f32 %v7112_v18, %v5874_v2 }
 0x913   :  { %2330 = vmatpush1.msra.mxu0 %v7102_v11  ;;  %2363 = vmatprep.mubr.f32.mxu0 %v7103_v41  ;;  %v1691_v39 = vadd.f32 %v7110_v40, %v7109_v38 }
 0x914   :  { %2401 = vmatpush1.msra.mxu1 %v7104_v45  ;;  %2434 = vmatprep.mubr.f32.mxu1 %v7103_v41 }
 0x915   :  { %2475 = vmatprep.subr.mxu0 %v7105_v58  ;;  %2546 = vmatprep.subr.mxu1 %v7106_v19  ;;  %v7111_v58 = vld [vmem:[#allocation32_spill] sm:$0xff] }
 0x916   :  { %v1804_v12 = vadd.f32 %v7111_v58, %v5871_v37 }
 0x9b4   :  { %v2189_v5 = vpop.f32.mrf.mxu0  ;;  %v2260_v60 = vpop.f32.mrf.mxu1 }
 0x9b5   :  { %v2265_v44 = vadd.f32 %v2189_v5, %v1689_v49  ;;  %v2267_v42 = vadd.f32 %v2260_v60, %v1802_v47 }
 0x9b6   :  { %v2191_v43 = vpop.f32.mrf.mxu0  ;;  %v2262_v41 = vpop.f32.mrf.mxu1 }
 0x9b7   :  { %v3495_v11 = vmul.f32 -1.442695, %v2265_v44  ;;  %v2266_v10 = vadd.f32 %v2191_v43, %v1691_v39  ;;  %v2268_v19 = vadd.f32 %v2262_v41, %v1804_v12 }
 0x9b9   :  { %3673 = vpow2.f32 %v3495_v11  ;;  %v3496_v45 = vmul.f32 -1.442695, %v2266_v10  ;;  %v3497_v14 = vmul.f32 -1.442695, %v2268_v19 }
 0x9bb   :  { %3675 = vpow2.f32 %v3496_v45 }
 0x9bc   :  { %3677 = vtanh.f32 %v2267_v42 }
 0x9bd   :  { %3679 = vpow2.f32 %v3497_v14 }
 0x9c6   :  { %v3674_v36 = vpop.eup %3673 }
 0x9c7   :  { %v2272_v40 = vadd.f32 1.0, %v3674_v36 }
 0x9c8   :  { %v3676_v49 = vpop.eup %3675 }
 0x9c9   :  { %3681 = vrcp.f32 %v2272_v40  ;;  %v2278_v43 = vadd.f32 1.0, %v3676_v49  ;;  %v3678_v10 = vpop.eup %3677 }
 0x9ca   :  { %v3680_v39 = vpop.eup %3679 }
 0x9cb   :  { %3683 = vrcp.f32 %v2278_v43  ;;  %v2285_v58 = vadd.f32 1.0, %v3680_v39 }
 0x9cd   :  { %3685 = vrcp.f32 %v2285_v58 }
 0x9d6   :  { %v3682_v45 = vpop.eup %3681 }
 0x9d7   :  { %v2289_v5 = vmul.f32 %v3682_v45, %v3678_v10  ;;  %v7140_v10 = vld [vmem:[#allocation36_spill] sm:$0xff] }
 0x9d8   :  { %v3684_v44 = vpop.eup %3683  ;;  %v1810_v39 = vadd.f32 %v7140_v10, %v5871_v37  ;;  %v6069_v10 = vld [vmem:[%s6706_s2 + $0x3d8] sm:$0xff] }
 0x9d9   :  { %v2288_v12 = vmul.f32 %v3684_v44, %v5880_v9  ;;  %v7139_v9 = vld [vmem:[#allocation35_spill] sm:$0xff] }
 0x9da   :  { %v3686_v36 = vpop.eup %3685  ;;  %v1697_v14 = vadd.f32 %v7139_v9, %v7109_v38 }
 0x9db   :  { %v5961_v41 = vadd.f32 %v2289_v5, %v2288_v12  ;;  %v7141_v5 = vld [vmem:[#allocation34_spill] sm:$0xff] }
 0x9dc   :  { %v1808_v44 = vadd.f32 %v7141_v5, %v5874_v2  ;;  %v6087_v5 = vld [vmem:[%s6706_s2 + $0x3a8] sm:$0xff] }
 0x9dd   :  { %3687 = vtanh.f32 %v5961_v41 }
 0x9ea   :  { %v3688_v18 = vpop.eup %3687 }
 0x9eb   :  { %v2292_v60 = vmul.f32 %v3688_v18, %v3686_v36 }
 0x9ed   :  { %3498 = vst [vmem:[%s6710_s6 + $0x8] sm:$0xff] %v2292_v60  ;;  %2364 = vmatmul.mubr.f32.vlgmr.msra.gmra.mxu0 %v2292_v60  ;;  %2435 = vmatmul.mubr.f32.vlgmr.msra.gmra.mxu1 %v2292_v60 }
 0x9ee   :  { %2476 = vmatpush1.msra.mxu0 %v5344_v16  ;;  %2547 = vmatpush1.msra.mxu1 %v5350_v46  ;;  %v7113_v16 = vld [vmem:[#allocation14_spill] sm:$0xff]  ;;  %v7114_v46 = vld [vmem:[#allocation21_spill] sm:$0xff] }
 0x9ef   :  { %2477 = vmatprep.subr.mxu0 %v5356_v7  ;;  %2548 = vmatprep.subr.mxu1 %v5362_v61  ;;  %v7115_v7 = vld [vmem:[#allocation9_spill] sm:$0xff]  ;;  %v7116_v61 = vld [vmem:[#allocation15_spill] sm:$0xff] }
 0x9f0   :  { %2478 = vmatpush1.msra.mxu0 %v5368_v20  ;;  %2549 = vmatpush1.msra.mxu1 %v5374_v51  ;;  %v7117_v20 = vld [vmem:[#allocation16_spill] sm:$0xff]  ;;  %v7118_v51 = vld [vmem:[#allocation22_spill] sm:$0xff] }
 0x9f1   :  { %2479 = vmatprep.subr.mxu0 %v5380_v53  ;;  %2550 = vmatprep.subr.mxu1 %v5386_v55  ;;  %v7119_v53 = vld [vmem:[#allocation10_spill] sm:$0xff]  ;;  %v7120_v55 = vld [vmem:[#allocation17_spill] sm:$0xff] }
 0x9f2   :  { %2480 = vmatpush1.msra.mxu0 %v5392_v50  ;;  %2551 = vmatpush1.msra.mxu1 %v5398_v0  ;;  %v7121_v50 = vld [vmem:[#allocation18_spill] sm:$0xff]  ;;  %v7122_v0 = vld [vmem:[#allocation23_spill] sm:$0xff] }
 0x9f3   :  { %2481 = vmatprep.subr.mxu0 %v5404_v57  ;;  %2552 = vmatprep.subr.mxu1 %v5410_v4  ;;  %v7123_v57 = vld [vmem:[#allocation11_spill] sm:$0xff] }
 0x9f4   :  { %2482 = vmatpush1.msra.mxu0 %v5416_v48  ;;  %2553 = vmatpush1.msra.mxu1 %v5422_v54  ;;  %v7124_v4 = vld [vmem:[#allocation7_spill] sm:$0xff]  ;;  %v7126_v54 = vld [vmem:[#allocation24_spill] sm:$0xff] }
 0x9f5   :  { %2483 = vmatprep.subr.mxu0 %v5428_v62  ;;  %2554 = vmatprep.subr.mxu1 %v5434_v52  ;;  %v7125_v48 = vld [vmem:[#allocation19_spill] sm:$0xff]  ;;  %v7127_v62 = vld [vmem:[#allocation12_spill] sm:$0xff]  ;;  %v7128_v52 = vld [vmem:[#allocation25_spill] sm:$0xff] }
 0x9f6   :  { %2484 = vmatpush1.msra.mxu0 %v5440_v56  ;;  %2555 = vmatpush1.msra.mxu1 %v5446_v63  ;;  %v7129_v56 = vld [vmem:[#allocation8_spill] sm:$0xff]  ;;  %v7130_v63 = vld [vmem:[#allocation13_spill] sm:$0xff] }
 0x9f7   :  { %2485 = vmatprep.subr.mxu0 %v5452_v59  ;;  %2556 = vmatprep.subr.mxu1 %v5458_v1  ;;  %v7131_v59 = vld [vmem:[#allocation27_spill] sm:$0xff]  ;;  %v7132_v1 = vld [vmem:[#allocation26_spill] sm:$0xff] }
 0x9f8   :  { %2486 = vmatpush1.msra.mxu0 %v5464_v3  ;;  %2557 = vmatpush1.msra.mxu1 %v5470_v6  ;;  %v7133_v3 = vmov 0.0   ;;  %v7134_v6 = vld [vmem:[#allocation28_spill] sm:$0xff] }
 0x9f9   :  { %2487 = vmatprep.subr.mxu0 %v5476_v8  ;;  %2558 = vmatprep.subr.mxu1 %v5482_v13  ;;  %v7135_v8 = vld [vmem:[#allocation6_spill] sm:$0xff]  ;;  %v7136_v13 = vld [vmem:[#allocation20_spill] sm:$0xff] }
 0x9fa   :  { %2488 = vmatpush1.msra.mxu0 %v5488_v15  ;;  %2559 = vmatpush1.msra.mxu1 %v5494_v17  ;;  %v7137_v15 = vld [vmem:[#allocation52_spill] sm:$0xff]  ;;  %v7138_v17 = vld [vmem:[#allocation33_spill] sm:$0xff] }
 0x9fb   :  { %2489 = vmatprep.subr.mxu0 %v5500_v21  ;;  %2560 = vmatprep.subr.mxu1 %v5506_v22  ;;  %v1695_v21 = vadd.f32 %v7138_v17, %v7137_v15 }
 0x9fc   :  { %2490 = vmatpush1.msra.mxu0 %v5512_v23  ;;  %2561 = vmatpush1.msra.mxu1 %v5518_v24 }
 0x9fd   :  { %2491 = vmatprep.subr.mxu0 %v5524_v25  ;;  %2562 = vmatprep.subr.mxu1 %v5530_v26 }
 0x9fe   :  { %2492 = vmatpush1.msra.mxu0 %v5536_v27  ;;  %2563 = vmatpush1.msra.mxu1 %v5542_v28 }
 0x9ff   :  { %2493 = vmatprep.subr.mxu0 %v5548_v29  ;;  %2564 = vmatprep.subr.mxu1 %v5554_v30 }
 0xa00   :  { %2494 = vmatpush1.msra.mxu0 %v5560_v31  ;;  %2565 = vmatpush1.msra.mxu1 %v5566_v32 }
 0xa01   :  { %2495 = vmatprep.subr.mxu0 %v5572_v33  ;;  %2566 = vmatprep.subr.mxu1 %v5578_v34 }
 0xa02   :  { %2496 = vmatpush1.msra.mxu0 %v5584_v35  ;;  %2567 = vmatpush1.msra.mxu1 %v7113_v16 }
 0xa03   :  { %2497 = vmatprep.subr.mxu0 %v7114_v46  ;;  %2568 = vmatprep.subr.mxu1 %v7115_v7 }
 0xa04   :  { %2498 = vmatpush1.msra.mxu0 %v7116_v61  ;;  %2569 = vmatpush1.msra.mxu1 %v7117_v20 }
 0xa05   :  { %2499 = vmatprep.subr.mxu0 %v7118_v51  ;;  %2570 = vmatprep.subr.mxu1 %v7119_v53 }
 0xa06   :  { %2500 = vmatpush1.msra.mxu0 %v7120_v55  ;;  %2571 = vmatpush1.msra.mxu1 %v7121_v50 }
 0xa07   :  { %2501 = vmatprep.subr.mxu0 %v7122_v0  ;;  %2572 = vmatprep.subr.mxu1 %v7123_v57 }
 0xa08   :  { %2502 = vmatpush1.msra.mxu0 %v7124_v4  ;;  %2573 = vmatpush1.msra.mxu1 %v7125_v48 }
 0xa09   :  { %2503 = vmatprep.subr.mxu0 %v7126_v54  ;;  %2574 = vmatprep.subr.mxu1 %v7127_v62 }
 0xa0a   :  { %2504 = vmatpush1.msra.mxu0 %v7128_v52  ;;  %2575 = vmatpush1.msra.mxu1 %v7129_v56 }
 0xa0b   :  { %2505 = vmatprep.subr.mxu0 %v7130_v63  ;;  %2576 = vmatprep.subr.mxu1 %v7131_v59 }
 0xa0c   :  { %2506 = vmatpush1.msra.mxu0 %v7132_v1  ;;  %2539 = vmatprep.mubr.f32.mxu0 %v7133_v3 }
 0xa0d   :  { %2577 = vmatpush1.msra.mxu1 %v7134_v6  ;;  %2610 = vmatprep.mubr.f32.mxu1 %v7133_v3 }
 0xa0e   :  { %2651 = vmatprep.subr.mxu0 %v7135_v8  ;;  %2722 = vmatprep.subr.mxu1 %v7136_v13 }
 0xaad   :  { %v2365_v22 = vpop.f32.mrf.mxu0  ;;  %v2436_v40 = vpop.f32.mrf.mxu1 }
 0xaae   :  { %v2441_v19 = vadd.f32 %v2365_v22, %v1695_v21  ;;  %v2443_v58 = vadd.f32 %v2436_v40, %v1808_v44  ;;  %v6093_v44 = vld [vmem:[%s6706_s2 + $0x3b8] sm:$0xff] }
 0xaaf   :  { %v2367_v42 = vpop.f32.mrf.mxu0  ;;  %v2438_v43 = vpop.f32.mrf.mxu1 }
 0xab0   :  { %v3499_v11 = vmul.f32 -1.442695, %v2441_v19  ;;  %v2442_v47 = vadd.f32 %v2367_v42, %v1697_v14  ;;  %v2444_v45 = vadd.f32 %v2438_v43, %v1810_v39  ;;  %v6063_v43 = vld [vmem:[%s6706_s2 + $0x3c8] sm:$0xff]  ;;  %v6075_v39 = vld [vmem:[%s6706_s2 + $0x3c0] sm:$0xff] }
 0xab2   :  { %3689 = vpow2.f32 %v3499_v11  ;;  %v3500_v49 = vmul.f32 -1.442695, %v2442_v47  ;;  %v3501_v12 = vmul.f32 -1.442695, %v2444_v45  ;;  %v6081_v45 = vld [vmem:[%s6706_s2 + $0x3d0] sm:$0xff] }
 0xab4   :  { %3691 = vpow2.f32 %v3500_v49  ;;  %v6051_v49 = vld [vmem:[%s6706_s2 + $0x3e0] sm:$0xff] }
 0xab5   :  { %3693 = vtanh.f32 %v2443_v58  ;;  %v6099_v58 = vld [vmem:[%s6706_s2 + $0x3a0] sm:$0xff] }
 0xab6   :  { %3695 = vpow2.f32 %v3501_v12  ;;  %v6105_v12 = vld [vmem:[%s6706_s2 + $0x3b0] sm:$0xff] }
 0xabf   :  { %v3690_v36 = vpop.eup %3689 }
 0xac0   :  { %v2448_v18 = vadd.f32 1.0, %v3690_v36  ;;  %v6111_v36 = vld [vmem:[%s6706_s2 + $0x388] sm:$0xff] }
 0xac1   :  { %v3692_v60 = vpop.eup %3691 }
 0xac2   :  { %3697 = vrcp.f32 %v2448_v18  ;;  %v2454_v8 = vadd.f32 1.0, %v3692_v60  ;;  %v3694_v13 = vpop.eup %3693  ;;  %v6117_v18 = vld [vmem:[%s6706_s2 + $0x398] sm:$0xff]  ;;  %v6123_v60 = vld [vmem:[%s6706_s2 + $0x380] sm:$0xff] }
 0xac3   :  { %v3696_v17 = vpop.eup %3695 }
 0xac4   :  { %3699 = vrcp.f32 %v2454_v8  ;;  %v2461_v14 = vadd.f32 1.0, %v3696_v17  ;;  %v6129_v8 = vld [vmem:[%s6706_s2 + $0x390] sm:$0xff]  ;;  %v6141_v17 = vld [vmem:[%s6706_s2 + $0x378] sm:$0xff] }
 0xac6   :  { %3701 = vrcp.f32 %v2461_v14  ;;  %v6165_v14 = vld [vmem:[%s6706_s2 + $0x358] sm:$0xff] }
 0xacf   :  { %v3698_v21 = vpop.eup %3697 }
 0xad0   :  { %v2465_v22 = vmul.f32 %v3698_v21, %v3694_v13  ;;  %v6135_v13 = vld [vmem:[%s6706_s2 + $0x368] sm:$0xff]  ;;  %v6147_v21 = vld [vmem:[%s6706_s2 + $0x360] sm:$0xff] }
 0xad1   :  { %v3700_v9 = vpop.eup %3699 }
 0xad2   :  { %v2464_v19 = vmul.f32 %v3700_v9, %v5961_v41  ;;  %v6057_v41 = vld [vmem:[%s6706_s2 + $0x3f0] sm:$0xff]  ;;  %v6159_v9 = vld [vmem:[%s6706_s2 + $0x348] sm:$0xff] }
 0xad3   :  { %v3702_v11 = vpop.eup %3701 }
 0xad4   :  { %v6042_v42 = vadd.f32 %v2465_v22, %v2464_v19  ;;  %v6153_v22 = vld [vmem:[%s6706_s2 + $0x370] sm:$0xff]  ;;  %v6171_v19 = vld [vmem:[%s6706_s2 + $0x340] sm:$0xff] }
 0xad5   :  { %7142 = vst [vmem:[#allocation29_spill] sm:$0xff] %v6171_v19 }
 0xad6   :  { %3703 = vtanh.f32 %v6042_v42 }
 0xae3   :  { %v3704_v47 = vpop.eup %3703 }
 0xae4   :  { %v2468_v40 = vmul.f32 %v3704_v47, %v3702_v11  ;;  %v6177_v11 = vld [vmem:[%s6706_s2 + $0x350] sm:$0xff]  ;;  %v6183_v47 = vld [vmem:[%s6706_s2 + $0x328] sm:$0xff] }
 0xae5   :  { %7143 = vst [vmem:[#allocation55_spill] sm:$0xff] %v6177_v11  ;;  %7144 = vst [vmem:[#allocation31_spill] sm:$0xff] %v6183_v47 }
 0xae6   :  { %3502 = vst [vmem:[%s6710_s6 + $0x10] sm:$0xff] %v2468_v40  ;;  %2540 = vmatmul.mubr.f32.vlgmr.msra.gmra.mxu0 %v2468_v40  ;;  %2611 = vmatmul.mubr.f32.vlgmr.msra.gmra.mxu1 %v2468_v40  ;;  %v6189_v40 = vld [vmem:[%s6706_s2 + $0x338] sm:$0xff] }
 0xae7   :  { %2652 = vmatpush1.msra.mxu0 %v6051_v49  ;;  %2723 = vmatpush1.msra.mxu1 %v6057_v41  ;;  %7145 = vst [vmem:[#allocation32_spill] sm:$0xff] %v6189_v40 }
 0xae8   :  { %2653 = vmatprep.subr.mxu0 %v6063_v43  ;;  %2724 = vmatprep.subr.mxu1 %v6069_v10 }
 0xae9   :  { %2654 = vmatpush1.msra.mxu0 %v6075_v39  ;;  %2725 = vmatpush1.msra.mxu1 %v6081_v45 }
 0xaea   :  { %2655 = vmatprep.subr.mxu0 %v6087_v5  ;;  %2726 = vmatprep.subr.mxu1 %v6093_v44 }
 0xaeb   :  { %2656 = vmatpush1.msra.mxu0 %v6099_v58  ;;  %2727 = vmatpush1.msra.mxu1 %v6105_v12 }
 0xaec   :  { %2657 = vmatprep.subr.mxu0 %v6111_v36  ;;  %2728 = vmatprep.subr.mxu1 %v6117_v18 }
 0xaed   :  { %2658 = vmatpush1.msra.mxu0 %v6123_v60  ;;  %2729 = vmatpush1.msra.mxu1 %v6129_v8 }
 0xaee   :  { %2659 = vmatprep.subr.mxu0 %v6135_v13  ;;  %2730 = vmatprep.subr.mxu1 %v6141_v17 }
 0xaef   :  { %2660 = vmatpush1.msra.mxu0 %v6147_v21  ;;  %2731 = vmatpush1.msra.mxu1 %v6153_v22 }
 0xaf0   :  { %2661 = vmatprep.subr.mxu0 %v6159_v9  ;;  %2732 = vmatprep.subr.mxu1 %v6165_v14 }
 0xaf1   :  { %2662 = vmatpush1.msra.mxu0 %v6171_v19  ;;  %2733 = vmatpush1.msra.mxu1 %v6177_v11  ;;  %v6195_v19 = vld [vmem:[%s6706_s2 + $0x320] sm:$0xff]  ;;  %v6201_v11 = vld [vmem:[%s6706_s2 + $0x330] sm:$0xff] }
 0xaf2   :  { %2663 = vmatprep.subr.mxu0 %v6183_v47  ;;  %2734 = vmatprep.subr.mxu1 %v6189_v40  ;;  %v6207_v47 = vld [vmem:[%s6706_s2 + $0x308] sm:$0xff]  ;;  %v6213_v40 = vld [vmem:[%s6706_s2 + $0x318] sm:$0xff] }
 0xaf3   :  { %2664 = vmatpush1.msra.mxu0 %v6195_v19  ;;  %2735 = vmatpush1.msra.mxu1 %v6201_v11 }
 0xaf4   :  { %2665 = vmatprep.subr.mxu0 %v6207_v47  ;;  %2736 = vmatprep.subr.mxu1 %v6213_v40 }
 0xaf5   :  { %2666 = vmatpush1.msra.mxu0 %v5512_v23  ;;  %2737 = vmatpush1.msra.mxu1 %v5518_v24  ;;  %v6255_v23 = vld [vmem:[%s6706_s2 + $0x3e8] sm:$0xff]  ;;  %v6261_v24 = vld [vmem:[%s6706_s2 + $0x3f8] sm:$0xff] }
 0xaf6   :  { %2667 = vmatprep.subr.mxu0 %v5524_v25  ;;  %2738 = vmatprep.subr.mxu1 %v5530_v26  ;;  %7146 = vst [vmem:[#allocation30_spill] sm:$0xff] %v6255_v23  ;;  %7147 = vst [vmem:[#allocation14_spill] sm:$0xff] %v6261_v24  ;;  %v7148_v25 = vld [vmem:[#allocation37_spill] sm:$0xff] }
 0xaf7   :  { %2668 = vmatpush1.msra.mxu0 %v5536_v27  ;;  %2739 = vmatpush1.msra.mxu1 %v5542_v28  ;;  %v1701_v26 = vadd.f32 %v7148_v25, %v7137_v15  ;;  %v7149_v28 = vld [vmem:[#allocation39_spill] sm:$0xff] }
 0xaf8   :  { %2669 = vmatprep.subr.mxu0 %v5548_v29  ;;  %2740 = vmatprep.subr.mxu1 %v5554_v30  ;;  %v1703_v29 = vadd.f32 %v7149_v28, %v7109_v38  ;;  %v7154_v28 = vld [vmem:[#allocation31_spill] sm:$0xff] }
 0xaf9   :  { %2670 = vmatpush1.msra.mxu0 %v5560_v31  ;;  %2741 = vmatpush1.msra.mxu1 %v5566_v32 }
 0xafa   :  { %2671 = vmatprep.subr.mxu0 %v5572_v33  ;;  %2742 = vmatprep.subr.mxu1 %v5578_v34 }
 0xafb   :  { %2672 = vmatpush1.msra.mxu0 %v5584_v35  ;;  %2743 = vmatpush1.msra.mxu1 %v7113_v16 }
 0xafc   :  { %2673 = vmatprep.subr.mxu0 %v7114_v46  ;;  %2744 = vmatprep.subr.mxu1 %v7115_v7  ;;  %v7150_v46 = vld [vmem:[#allocation40_spill] sm:$0xff] }
 0xafd   :  { %2674 = vmatpush1.msra.mxu0 %v7116_v61  ;;  %2745 = vmatpush1.msra.mxu1 %v7117_v20  ;;  %v1816_v7 = vadd.f32 %v7150_v46, %v5871_v37  ;;  %v7151_v20 = vld [vmem:[#allocation38_spill] sm:$0xff]  ;;  %v6352_v46 = vld [vmem:[%s6706_s2 + $0x2d8] sm:$0xff] }
 0xafe   :  { %2675 = vmatprep.subr.mxu0 %v7118_v51  ;;  %2746 = vmatprep.subr.mxu1 %v7119_v53  ;;  %v1814_v51 = vadd.f32 %v7151_v20, %v5874_v2  ;;  %v6370_v20 = vld [vmem:[%s6706_s2 + $0x2a8] sm:$0xff] }
 0xaff   :  { %2676 = vmatpush1.msra.mxu0 %v7120_v55  ;;  %2747 = vmatpush1.msra.mxu1 %v7121_v50 }
 0xb00   :  { %2677 = vmatprep.subr.mxu0 %v7122_v0  ;;  %2748 = vmatprep.subr.mxu1 %v7123_v57 }
 0xb01   :  { %2678 = vmatpush1.msra.mxu0 %v7124_v4  ;;  %2749 = vmatpush1.msra.mxu1 %v7125_v48 }
 0xb02   :  { %2679 = vmatprep.subr.mxu0 %v7126_v54  ;;  %2750 = vmatprep.subr.mxu1 %v7127_v62 }
 0xb03   :  { %2680 = vmatpush1.msra.mxu0 %v7128_v52  ;;  %2751 = vmatpush1.msra.mxu1 %v7129_v56 }
 0xb04   :  { %2681 = vmatprep.subr.mxu0 %v7130_v63  ;;  %2752 = vmatprep.subr.mxu1 %v7131_v59 }
 0xb05   :  { %2682 = vmatpush1.msra.mxu0 %v7132_v1  ;;  %2715 = vmatprep.mubr.f32.mxu0 %v7133_v3 }
 0xb06   :  { %2753 = vmatpush1.msra.mxu1 %v7134_v6  ;;  %2786 = vmatprep.mubr.f32.mxu1 %v7133_v3 }
 0xb07   :  { %2827 = vmatprep.subr.mxu0 %v6255_v23  ;;  %2898 = vmatprep.subr.mxu1 %v6261_v24 }
 0xba6   :  { %v2541_v27 = vpop.f32.mrf.mxu0  ;;  %v2612_v34 = vpop.f32.mrf.mxu1 }
 0xba7   :  { %v2617_v30 = vadd.f32 %v2541_v27, %v1701_v26  ;;  %v2619_v53 = vadd.f32 %v2612_v34, %v1814_v51  ;;  %v7153_v27 = vld [vmem:[#allocation55_spill] sm:$0xff]  ;;  %v6334_v34 = vld [vmem:[%s6706_s2 + $0x2e0] sm:$0xff]  ;;  %v6376_v51 = vld [vmem:[%s6706_s2 + $0x2b8] sm:$0xff] }
 0xba8   :  { %v2543_v31 = vpop.f32.mrf.mxu0  ;;  %v2614_v16 = vpop.f32.mrf.mxu1 }
 0xba9   :  { %v3503_v32 = vmul.f32 -1.442695, %v2617_v30  ;;  %v2618_v33 = vadd.f32 %v2543_v31, %v1703_v29  ;;  %v2620_v61 = vadd.f32 %v2614_v16, %v1816_v7  ;;  %v7155_v29 = vld [vmem:[#allocation32_spill] sm:$0xff]  ;;  %v6310_v30 = vld [vmem:[%s6706_s2 + $0x300] sm:$0xff]  ;;  %v6346_v16 = vld [vmem:[%s6706_s2 + $0x2c8] sm:$0xff] }
 0xbaa   :  { %v6316_v31 = vld [vmem:[%s6706_s2 + $0x310] sm:$0xff]  ;;  %v6358_v7 = vld [vmem:[%s6706_s2 + $0x2c0] sm:$0xff] }
 0xbab   :  { %3705 = vpow2.f32 %v3503_v32  ;;  %v3504_v35 = vmul.f32 -1.442695, %v2618_v33  ;;  %v3505_v55 = vmul.f32 -1.442695, %v2620_v61  ;;  %v6322_v32 = vld [vmem:[%s6706_s2 + $0x2e8] sm:$0xff]  ;;  %v6328_v33 = vld [vmem:[%s6706_s2 + $0x2f8] sm:$0xff] }
 0xbac   :  { %v6364_v61 = vld [vmem:[%s6706_s2 + $0x2d0] sm:$0xff] }
 0xbad   :  { %3707 = vpow2.f32 %v3504_v35  ;;  %v6340_v35 = vld [vmem:[%s6706_s2 + $0x2f0] sm:$0xff] }
 0xbae   :  { %3709 = vtanh.f32 %v2619_v53  ;;  %v6382_v53 = vld [vmem:[%s6706_s2 + $0x2a0] sm:$0xff] }
 0xbaf   :  { %3711 = vpow2.f32 %v3505_v55  ;;  %v6388_v55 = vld [vmem:[%s6706_s2 + $0x2b0] sm:$0xff] }
 0xbb0   :  { %7156 = vst [vmem:[#allocation21_spill] sm:$0xff] %v6388_v55 }
 0xbb8   :  { %v3706_v50 = vpop.eup %3705 }
 0xbb9   :  { %v2624_v0 = vadd.f32 1.0, %v3706_v50  ;;  %v6394_v50 = vld [vmem:[%s6706_s2 + $0x288] sm:$0xff] }
 0xbba   :  { %v3708_v57 = vpop.eup %3707  ;;  %7157 = vst [vmem:[#allocation9_spill] sm:$0xff] %v6394_v50 }
 0xbbb   :  { %3713 = vrcp.f32 %v2624_v0  ;;  %v2630_v4 = vadd.f32 1.0, %v3708_v57  ;;  %v3710_v48 = vpop.eup %3709  ;;  %v6400_v0 = vld [vmem:[%s6706_s2 + $0x298] sm:$0xff]  ;;  %v6406_v57 = vld [vmem:[%s6706_s2 + $0x280] sm:$0xff] }
 0xbbc   :  { %v3712_v54 = vpop.eup %3711  ;;  %7158 = vst [vmem:[#allocation15_spill] sm:$0xff] %v6400_v0  ;;  %7159 = vst [vmem:[#allocation16_spill] sm:$0xff] %v6406_v57 }
 0xbbd   :  { %3715 = vrcp.f32 %v2630_v4  ;;  %v2637_v63 = vadd.f32 1.0, %v3712_v54  ;;  %v6412_v4 = vld [vmem:[%s6706_s2 + $0x290] sm:$0xff]  ;;  %v6424_v54 = vld [vmem:[%s6706_s2 + $0x278] sm:$0xff] }
 0xbbe   :  { %7160 = vst [vmem:[#allocation22_spill] sm:$0xff] %v6412_v4  ;;  %7162 = vst [vmem:[#allocation17_spill] sm:$0xff] %v6424_v54 }
 0xbbf   :  { %3717 = vrcp.f32 %v2637_v63  ;;  %v6448_v63 = vld [vmem:[%s6706_s2 + $0x258] sm:$0xff] }
 0xbc0   :  { %7166 = vst [vmem:[#allocation7_spill] sm:$0xff] %v6448_v63 }
 0xbc8   :  { %v3714_v62 = vpop.eup %3713 }
 0xbc9   :  { %v2641_v52 = vmul.f32 %v3714_v62, %v3710_v48  ;;  %v6418_v48 = vld [vmem:[%s6706_s2 + $0x268] sm:$0xff]  ;;  %v6430_v62 = vld [vmem:[%s6706_s2 + $0x260] sm:$0xff] }
 0xbca   :  { %v3716_v56 = vpop.eup %3715  ;;  %7161 = vst [vmem:[#allocation10_spill] sm:$0xff] %v6418_v48  ;;  %7163 = vst [vmem:[#allocation18_spill] sm:$0xff] %v6430_v62 }
 0xbcb   :  { %v2640_v59 = vmul.f32 %v3716_v56, %v6042_v42  ;;  %v7152_v42 = vld [vmem:[#allocation29_spill] sm:$0xff]  ;;  %v6442_v56 = vld [vmem:[%s6706_s2 + $0x248] sm:$0xff] }
 0xbcc   :  { %v3718_v6 = vpop.eup %3717  ;;  %7165 = vst [vmem:[#allocation11_spill] sm:$0xff] %v6442_v56 }
 0xbcd   :  { %v6273_v1 = vadd.f32 %v2641_v52, %v2640_v59  ;;  %v6436_v52 = vld [vmem:[%s6706_s2 + $0x270] sm:$0xff]  ;;  %v6454_v59 = vld [vmem:[%s6706_s2 + $0x240] sm:$0xff] }
 0xbce   :  { %7164 = vst [vmem:[#allocation23_spill] sm:$0xff] %v6436_v52  ;;  %7167 = vst [vmem:[#allocation19_spill] sm:$0xff] %v6454_v59 }
 0xbcf   :  { %3719 = vtanh.f32 %v6273_v1 }
 0xbdc   :  { %v3720_v25 = vpop.eup %3719 }
 0xbdd   :  { %v2644_v26 = vmul.f32 %v3720_v25, %v3718_v6  ;;  %v6460_v6 = vld [vmem:[%s6706_s2 + $0x250] sm:$0xff]  ;;  %v6466_v25 = vld [vmem:[%s6706_s2 + $0x228] sm:$0xff] }
 0xbde   :  { %7168 = vst [vmem:[#allocation24_spill] sm:$0xff] %v6460_v6  ;;  %7169 = vst [vmem:[#allocation12_spill] sm:$0xff] %v6466_v25 }
 0xbdf   :  { %3506 = vst [vmem:[%s6710_s6 + $0x18] sm:$0xff] %v2644_v26  ;;  %2716 = vmatmul.mubr.f32.vlgmr.msra.gmra.mxu0 %v2644_v26  ;;  %2787 = vmatmul.mubr.f32.vlgmr.msra.gmra.mxu1 %v2644_v26  ;;  %v6472_v26 = vld [vmem:[%s6706_s2 + $0x238] sm:$0xff] }
 0xbe0   :  { %2828 = vmatpush1.msra.mxu0 %v6051_v49  ;;  %2899 = vmatpush1.msra.mxu1 %v6057_v41  ;;  %7170 = vst [vmem:[#allocation25_spill] sm:$0xff] %v6472_v26 }
 0xbe1   :  { %2829 = vmatprep.subr.mxu0 %v6063_v43  ;;  %2900 = vmatprep.subr.mxu1 %v6069_v10 }
 0xbe2   :  { %2830 = vmatpush1.msra.mxu0 %v6075_v39  ;;  %2901 = vmatpush1.msra.mxu1 %v6081_v45 }
 0xbe3   :  { %2831 = vmatprep.subr.mxu0 %v6087_v5  ;;  %2902 = vmatprep.subr.mxu1 %v6093_v44 }
 0xbe4   :  { %2832 = vmatpush1.msra.mxu0 %v6099_v58  ;;  %2903 = vmatpush1.msra.mxu1 %v6105_v12 }
 0xbe5   :  { %2833 = vmatprep.subr.mxu0 %v6111_v36  ;;  %2904 = vmatprep.subr.mxu1 %v6117_v18 }
 0xbe6   :  { %2834 = vmatpush1.msra.mxu0 %v6123_v60  ;;  %2905 = vmatpush1.msra.mxu1 %v6129_v8 }
 0xbe7   :  { %2835 = vmatprep.subr.mxu0 %v6135_v13  ;;  %2906 = vmatprep.subr.mxu1 %v6141_v17 }
 0xbe8   :  { %2836 = vmatpush1.msra.mxu0 %v6147_v21  ;;  %2907 = vmatpush1.msra.mxu1 %v6153_v22 }
 0xbe9   :  { %2837 = vmatprep.subr.mxu0 %v6159_v9  ;;  %2908 = vmatprep.subr.mxu1 %v6165_v14 }
 0xbea   :  { %2838 = vmatpush1.msra.mxu0 %v7152_v42  ;;  %2909 = vmatpush1.msra.mxu1 %v7153_v27 }
 0xbeb   :  { %2839 = vmatprep.subr.mxu0 %v7154_v28  ;;  %2910 = vmatprep.subr.mxu1 %v7155_v29 }
 0xbec   :  { %2840 = vmatpush1.msra.mxu0 %v6195_v19  ;;  %2911 = vmatpush1.msra.mxu1 %v6201_v11 }
 0xbed   :  { %2841 = vmatprep.subr.mxu0 %v6207_v47  ;;  %2912 = vmatprep.subr.mxu1 %v6213_v40 }
 0xbee   :  { %2842 = vmatpush1.msra.mxu0 %v6310_v30  ;;  %2913 = vmatpush1.msra.mxu1 %v6316_v31 }
 0xbef   :  { %2843 = vmatprep.subr.mxu0 %v6322_v32  ;;  %2914 = vmatprep.subr.mxu1 %v6328_v33 }
 0xbf0   :  { %2844 = vmatpush1.msra.mxu0 %v6334_v34  ;;  %2915 = vmatpush1.msra.mxu1 %v6340_v35 }
 0xbf1   :  { %2845 = vmatprep.subr.mxu0 %v6346_v16  ;;  %2916 = vmatprep.subr.mxu1 %v6352_v46 }
 0xbf2   :  { %2846 = vmatpush1.msra.mxu0 %v6358_v7  ;;  %2917 = vmatpush1.msra.mxu1 %v6364_v61 }
 0xbf3   :  { %2847 = vmatprep.subr.mxu0 %v6370_v20  ;;  %2918 = vmatprep.subr.mxu1 %v6376_v51 }
 0xbf4   :  { %2848 = vmatpush1.msra.mxu0 %v6382_v53  ;;  %2919 = vmatpush1.msra.mxu1 %v6388_v55 }
 0xbf5   :  { %2849 = vmatprep.subr.mxu0 %v6394_v50  ;;  %2920 = vmatprep.subr.mxu1 %v6400_v0  ;;  %v7180_v0 = vld [vmem:[#allocation42_spill] sm:$0xff] }
 0xbf6   :  { %2850 = vmatpush1.msra.mxu0 %v6406_v57  ;;  %2921 = vmatpush1.msra.mxu1 %v6412_v4 }
 0xbf7   :  { %2851 = vmatprep.subr.mxu0 %v6418_v48  ;;  %2922 = vmatprep.subr.mxu1 %v6424_v54 }
 0xbf8   :  { %2852 = vmatpush1.msra.mxu0 %v6430_v62  ;;  %2923 = vmatpush1.msra.mxu1 %v6436_v52 }
 0xbf9   :  { %2853 = vmatprep.subr.mxu0 %v6442_v56  ;;  %2924 = vmatprep.subr.mxu1 %v6448_v63 }
 0xbfa   :  { %2854 = vmatpush1.msra.mxu0 %v6454_v59  ;;  %2925 = vmatpush1.msra.mxu1 %v6460_v6  ;;  %v6478_v59 = vld [vmem:[%s6706_s2 + $0x220] sm:$0xff]  ;;  %v6484_v6 = vld [vmem:[%s6706_s2 + $0x230] sm:$0xff] }
 0xbfb   :  { %2855 = vmatprep.subr.mxu0 %v6466_v25  ;;  %2926 = vmatprep.subr.mxu1 %v6472_v26  ;;  %7171 = vst [vmem:[#allocation8_spill] sm:$0xff] %v6478_v59  ;;  %7172 = vst [vmem:[#allocation13_spill] sm:$0xff] %v6484_v6  ;;  %v6490_v25 = vld [vmem:[%s6706_s2 + $0x208] sm:$0xff]  ;;  %v6496_v26 = vld [vmem:[%s6706_s2 + $0x218] sm:$0xff] }
 0xbfc   :  { %2856 = vmatpush1.msra.mxu0 %v6478_v59  ;;  %2927 = vmatpush1.msra.mxu1 %v6484_v6  ;;  %7173 = vst [vmem:[#allocation27_spill] sm:$0xff] %v6490_v25  ;;  %7174 = vst [vmem:[#allocation26_spill] sm:$0xff] %v6496_v26  ;;  %v6502_v59 = vld [vmem:[%s6706_s2 + $0x200] sm:$0xff] }
 0xbfd   :  { %2857 = vmatprep.subr.mxu0 %v6490_v25  ;;  %2928 = vmatprep.subr.mxu1 %v6496_v26  ;;  %7175 = vst [vmem:[#allocation28_spill] sm:$0xff] %v6502_v59  ;;  %v6509_v25 = vld [vmem:[%s6706_s2 + $0x210] sm:$0xff]  ;;  %v7177_v26 = vld [vmem:[#allocation41_spill] sm:$0xff] }
 0xbfe   :  { %2858 = vmatpush1.msra.mxu0 %v6502_v59  ;;  %2891 = vmatprep.mubr.f32.mxu0 %v7133_v3  ;;  %7176 = vst [vmem:[#allocation6_spill] sm:$0xff] %v6509_v25  ;;  %v1707_v6 = vadd.f32 %v7177_v26, %v7137_v15  ;;  %v7178_v59 = vld [vmem:[#allocation43_spill] sm:$0xff]  ;;  %v1820_v26 = vadd.f32 %v7180_v0, %v5874_v2 }
 0xbff   :  { %2929 = vmatpush1.msra.mxu1 %v6509_v25  ;;  %2962 = vmatprep.mubr.f32.mxu1 %v7133_v3  ;;  %v1709_v56 = vadd.f32 %v7178_v59, %v7109_v38  ;;  %v7183_v0 = vld [vmem:[#allocation15_spill] sm:$0xff] }
 0xc00   :  { %3003 = vmatprep.subr.mxu0 %v6255_v23  ;;  %3074 = vmatprep.subr.mxu1 %v6261_v24  ;;  %v7179_v23 = vld [vmem:[#allocation44_spill] sm:$0xff] }
 0xc01   :  { %v1822_v57 = vadd.f32 %v7179_v23, %v5871_v37 }
 0xc9f   :  { %v2717_v63 = vpop.f32.mrf.mxu0  ;;  %v2788_v4 = vpop.f32.mrf.mxu1 }
 0xca0   :  { %v2793_v52 = vadd.f32 %v2717_v63, %v1707_v6  ;;  %v2795_v15 = vadd.f32 %v2788_v4, %v1820_v26  ;;  %v7184_v4 = vld [vmem:[#allocation16_spill] sm:$0xff]  ;;  %v7186_v26 = vld [vmem:[#allocation10_spill] sm:$0xff] }
 0xca1   :  { %v2719_v62 = vpop.f32.mrf.mxu0  ;;  %v2790_v3 = vpop.f32.mrf.mxu1 }
 0xca2   :  { %v3507_v54 = vmul.f32 -1.442695, %v2793_v52  ;;  %v2794_v48 = vadd.f32 %v2719_v62, %v1709_v56  ;;  %v2796_v24 = vadd.f32 %v2790_v3, %v1822_v57 }
 0xca4   :  { %3721 = vpow2.f32 %v3507_v54  ;;  %v3508_v25 = vmul.f32 -1.442695, %v2794_v48  ;;  %v3509_v50 = vmul.f32 -1.442695, %v2796_v24 }
 0xca6   :  { %3723 = vpow2.f32 %v3508_v25  ;;  %v7185_v25 = vld [vmem:[#allocation22_spill] sm:$0xff] }
 0xca7   :  { %3725 = vtanh.f32 %v2795_v15 }
 0xca8   :  { %3727 = vpow2.f32 %v3509_v50  ;;  %v7182_v50 = vld [vmem:[#allocation9_spill] sm:$0xff] }
 0xcb1   :  { %v3722_v55 = vpop.eup %3721 }
 0xcb2   :  { %v2800_v59 = vadd.f32 1.0, %v3722_v55 }
 0xcb3   :  { %v3724_v63 = vpop.eup %3723 }
 0xcb4   :  { %3729 = vrcp.f32 %v2800_v59  ;;  %v2806_v54 = vadd.f32 1.0, %v3724_v63  ;;  %v3726_v48 = vpop.eup %3725  ;;  %v7187_v59 = vld [vmem:[#allocation17_spill] sm:$0xff]  ;;  %v7188_v63 = vld [vmem:[#allocation18_spill] sm:$0xff] }
 0xcb5   :  { %v3728_v62 = vpop.eup %3727 }
 0xcb6   :  { %3731 = vrcp.f32 %v2806_v54  ;;  %v2813_v23 = vadd.f32 1.0, %v3728_v62  ;;  %v7189_v54 = vld [vmem:[#allocation23_spill] sm:$0xff] }
 0xcb7   :  { %v7191_v62 = vld [vmem:[#allocation7_spill] sm:$0xff] }
 0xcb8   :  { %3733 = vrcp.f32 %v2813_v23  ;;  %v7195_v23 = vld [vmem:[#allocation25_spill] sm:$0xff] }
 0xcc1   :  { %v3730_v52 = vpop.eup %3729 }
 0xcc2   :  { %v2817_v56 = vmul.f32 %v3730_v52, %v3726_v48  ;;  %v7190_v48 = vld [vmem:[#allocation11_spill] sm:$0xff] }
 0xcc3   :  { %v3732_v6 = vpop.eup %3731  ;;  %v7192_v52 = vld [vmem:[#allocation19_spill] sm:$0xff] }
 0xcc4   :  { %v2816_v3 = vmul.f32 %v3732_v6, %v6273_v1  ;;  %v7181_v1 = vld [vmem:[#allocation21_spill] sm:$0xff]  ;;  %v7194_v6 = vld [vmem:[#allocation12_spill] sm:$0xff] }
 0xcc5   :  { %v3734_v24 = vpop.eup %3733 }
 0xcc6   :  { %v6524_v57 = vadd.f32 %v2817_v56, %v2816_v3  ;;  %v7193_v56 = vld [vmem:[#allocation24_spill] sm:$0xff] }
 0xcc7   :  { %v7196_v3 = vld [vmem:[#allocation8_spill] sm:$0xff] }
 0xcc8   :  { %3735 = vtanh.f32 %v6524_v57 }
 0xcd5   :  { %v3736_v15 = vpop.eup %3735 }
 0xcd6   :  { %v2820_v55 = vmul.f32 %v3736_v15, %v3734_v24  ;;  %v7197_v24 = vld [vmem:[#allocation13_spill] sm:$0xff]  ;;  %v7198_v15 = vld [vmem:[#allocation27_spill] sm:$0xff] }
 0xcd8   :  { %3510 = vst [vmem:[%s6710_s6 + $0x20] sm:$0xff] %v2820_v55  ;;  %2892 = vmatmul.mubr.f32.vlgmr.msra.gmra.mxu0 %v2820_v55  ;;  %2963 = vmatmul.mubr.f32.vlgmr.msra.gmra.mxu1 %v2820_v55  ;;  %v7199_v55 = vld [vmem:[#allocation26_spill] sm:$0xff] }
 0xcd9   :  { %3004 = vmatpush1.msra.mxu0 %v6051_v49  ;;  %3075 = vmatpush1.msra.mxu1 %v6057_v41 }
 0xcda   :  { %3005 = vmatprep.subr.mxu0 %v6063_v43  ;;  %3076 = vmatprep.subr.mxu1 %v6069_v10 }
 0xcdb   :  { %3006 = vmatpush1.msra.mxu0 %v6075_v39  ;;  %3077 = vmatpush1.msra.mxu1 %v6081_v45 }
 0xcdc   :  { %3007 = vmatprep.subr.mxu0 %v6087_v5  ;;  %3078 = vmatprep.subr.mxu1 %v6093_v44 }
 0xcdd   :  { %3008 = vmatpush1.msra.mxu0 %v6099_v58  ;;  %3079 = vmatpush1.msra.mxu1 %v6105_v12 }
 0xcde   :  { %3009 = vmatprep.subr.mxu0 %v6111_v36  ;;  %3080 = vmatprep.subr.mxu1 %v6117_v18 }
 0xcdf   :  { %3010 = vmatpush1.msra.mxu0 %v6123_v60  ;;  %3081 = vmatpush1.msra.mxu1 %v6129_v8 }
 0xce0   :  { %3011 = vmatprep.subr.mxu0 %v6135_v13  ;;  %3082 = vmatprep.subr.mxu1 %v6141_v17 }
 0xce1   :  { %3012 = vmatpush1.msra.mxu0 %v6147_v21  ;;  %3083 = vmatpush1.msra.mxu1 %v6153_v22 }
 0xce2   :  { %3013 = vmatprep.subr.mxu0 %v6159_v9  ;;  %3084 = vmatprep.subr.mxu1 %v6165_v14 }
 0xce3   :  { %3014 = vmatpush1.msra.mxu0 %v7152_v42  ;;  %3085 = vmatpush1.msra.mxu1 %v7153_v27 }
 0xce4   :  { %3015 = vmatprep.subr.mxu0 %v7154_v28  ;;  %3086 = vmatprep.subr.mxu1 %v7155_v29 }
 0xce5   :  { %3016 = vmatpush1.msra.mxu0 %v6195_v19  ;;  %3087 = vmatpush1.msra.mxu1 %v6201_v11 }
 0xce6   :  { %3017 = vmatprep.subr.mxu0 %v6207_v47  ;;  %3088 = vmatprep.subr.mxu1 %v6213_v40 }
 0xce7   :  { %3018 = vmatpush1.msra.mxu0 %v6310_v30  ;;  %3089 = vmatpush1.msra.mxu1 %v6316_v31 }
 0xce8   :  { %3019 = vmatprep.subr.mxu0 %v6322_v32  ;;  %3090 = vmatprep.subr.mxu1 %v6328_v33 }
 0xce9   :  { %3020 = vmatpush1.msra.mxu0 %v6334_v34  ;;  %3091 = vmatpush1.msra.mxu1 %v6340_v35 }
 0xcea   :  { %3021 = vmatprep.subr.mxu0 %v6346_v16  ;;  %3092 = vmatprep.subr.mxu1 %v6352_v46 }
 0xceb   :  { %3022 = vmatpush1.msra.mxu0 %v6358_v7  ;;  %3093 = vmatpush1.msra.mxu1 %v6364_v61 }
 0xcec   :  { %3023 = vmatprep.subr.mxu0 %v6370_v20  ;;  %3094 = vmatprep.subr.mxu1 %v6376_v51 }
 0xced   :  { %3024 = vmatpush1.msra.mxu0 %v6382_v53  ;;  %3095 = vmatpush1.msra.mxu1 %v7181_v1 }
 0xcee   :  { %3025 = vmatprep.subr.mxu0 %v7182_v50  ;;  %3096 = vmatprep.subr.mxu1 %v7183_v0  ;;  %v7209_v0 = vld [vmem:[#allocation46_spill] sm:$0xff] }
 0xcef   :  { %3026 = vmatpush1.msra.mxu0 %v7184_v4  ;;  %3097 = vmatpush1.msra.mxu1 %v7185_v25 }
 0xcf0   :  { %3027 = vmatprep.subr.mxu0 %v7186_v26  ;;  %3098 = vmatprep.subr.mxu1 %v7187_v59 }
 0xcf1   :  { %3028 = vmatpush1.msra.mxu0 %v7188_v63  ;;  %3099 = vmatpush1.msra.mxu1 %v7189_v54  ;;  %v7200_v54 = vld [vmem:[#allocation28_spill] sm:$0xff] }
 0xcf2   :  { %3029 = vmatprep.subr.mxu0 %v7190_v48  ;;  %3100 = vmatprep.subr.mxu1 %v7191_v62  ;;  %v7201_v48 = vmov 0.0   ;;  %v7202_v62 = vld [vmem:[#allocation6_spill] sm:$0xff] }
 0xcf3   :  { %3030 = vmatpush1.msra.mxu0 %v7192_v52  ;;  %3101 = vmatpush1.msra.mxu1 %v7193_v56  ;;  %v7203_v56 = vld [vmem:[#allocation30_spill] sm:$0xff] }
 0xcf4   :  { %3031 = vmatprep.subr.mxu0 %v7194_v6  ;;  %3102 = vmatprep.subr.mxu1 %v7195_v23  ;;  %v7204_v6 = vld [vmem:[#allocation14_spill] sm:$0xff]  ;;  %v7205_v23 = vld [vmem:[#allocation52_spill] sm:$0xff] }
 0xcf5   :  { %3032 = vmatpush1.msra.mxu0 %v7196_v3  ;;  %3103 = vmatpush1.msra.mxu1 %v7197_v24  ;;  %v7206_v3 = vld [vmem:[#allocation45_spill] sm:$0xff] }
 0xcf6   :  { %3033 = vmatprep.subr.mxu0 %v7198_v15  ;;  %3104 = vmatprep.subr.mxu1 %v7199_v55  ;;  %v1713_v52 = vadd.f32 %v7206_v3, %v7205_v23  ;;  %v7207_v15 = vld [vmem:[#allocation47_spill] sm:$0xff]  ;;  %v1826_v3 = vadd.f32 %v7209_v0, %v5874_v2 }
 0xcf7   :  { %3034 = vmatpush1.msra.mxu0 %v7200_v54  ;;  %3067 = vmatprep.mubr.f32.mxu0 %v7201_v48  ;;  %v1715_v63 = vadd.f32 %v7207_v15, %v7109_v38 }
 0xcf8   :  { %3105 = vmatpush1.msra.mxu1 %v7202_v62  ;;  %3138 = vmatprep.mubr.f32.mxu1 %v7201_v48 }
 0xcf9   :  { %3179 = vmatprep.subr.mxu0 %v7203_v56  ;;  %3250 = vmatprep.subr.mxu1 %v7204_v6  ;;  %v7208_v56 = vld [vmem:[#allocation48_spill] sm:$0xff] }
 0xcfa   :  { %v1828_v4 = vadd.f32 %v7208_v56, %v5871_v37 }
 0xd98   :  { %v2893_v24 = vpop.f32.mrf.mxu0  ;;  %v2964_v25 = vpop.f32.mrf.mxu1 }
 0xd99   :  { %v2969_v55 = vadd.f32 %v2893_v24, %v1713_v52  ;;  %v2971_v23 = vadd.f32 %v2964_v25, %v1826_v3 }
 0xd9a   :  { %v2895_v59 = vpop.f32.mrf.mxu0  ;;  %v2966_v48 = vpop.f32.mrf.mxu1 }
 0xd9b   :  { %v3511_v54 = vmul.f32 -1.442695, %v2969_v55  ;;  %v2970_v26 = vadd.f32 %v2895_v59, %v1715_v63  ;;  %v2972_v6 = vadd.f32 %v2966_v48, %v1828_v4 }
 0xd9d   :  { %3737 = vpow2.f32 %v3511_v54  ;;  %v3512_v62 = vmul.f32 -1.442695, %v2970_v26  ;;  %v3513_v50 = vmul.f32 -1.442695, %v2972_v6 }
 0xd9f   :  { %3739 = vpow2.f32 %v3512_v62 }
 0xda0   :  { %3741 = vtanh.f32 %v2971_v23 }
 0xda1   :  { %3743 = vpow2.f32 %v3513_v50 }
 0xdaa   :  { %v3738_v1 = vpop.eup %3737 }
 0xdab   :  { %v2976_v15 = vadd.f32 1.0, %v3738_v1 }
 0xdac   :  { %v3740_v52 = vpop.eup %3739 }
 0xdad   :  { %3745 = vrcp.f32 %v2976_v15  ;;  %v2982_v59 = vadd.f32 1.0, %v3740_v52  ;;  %v3742_v26 = vpop.eup %3741 }
 0xdae   :  { %v3744_v63 = vpop.eup %3743 }
 0xdaf   :  { %3747 = vrcp.f32 %v2982_v59  ;;  %v2989_v55 = vadd.f32 1.0, %v3744_v63 }
 0xdb1   :  { %3749 = vrcp.f32 %v2989_v55 }
 0xdba   :  { %v3746_v54 = vpop.eup %3745 }
 0xdbb   :  { %v2993_v62 = vmul.f32 %v3746_v54, %v3742_v26 }
 0xdbc   :  { %v3748_v24 = vpop.eup %3747 }
 0xdbd   :  { %v2992_v4 = vmul.f32 %v3748_v24, %v6524_v57 }
 0xdbe   :  { %v3750_v1 = vpop.eup %3749 }
 0xdbf   :  { %v6605_v48 = vadd.f32 %v2993_v62, %v2992_v4 }
 0xdc1   :  { %3751 = vtanh.f32 %v6605_v48 }
 0xdce   :  { %v3752_v0 = vpop.eup %3751 }
 0xdcf   :  { %v2996_v25 = vmul.f32 %v3752_v0, %v3750_v1  ;;  %v7237_v1 = vld [vmem:[#allocation54_spill] sm:$0xff] }
 0xdd1   :  { %3514 = vst [vmem:[%s6710_s6 + $0x28] sm:$0xff] %v2996_v25  ;;  %3068 = vmatmul.mubr.f32.vlgmr.msra.gmra.mxu0 %v2996_v25  ;;  %3139 = vmatmul.mubr.f32.vlgmr.msra.gmra.mxu1 %v2996_v25 }
 0xdd2   :  { %3180 = vmatpush1.msra.mxu0 %v6051_v49  ;;  %3251 = vmatpush1.msra.mxu1 %v6057_v41  ;;  %v7210_v49 = vld [vmem:[#allocation21_spill] sm:$0xff] }
 0xdd3   :  { %3181 = vmatprep.subr.mxu0 %v6063_v43  ;;  %3252 = vmatprep.subr.mxu1 %v6069_v10  ;;  %v7211_v41 = vld [vmem:[#allocation9_spill] sm:$0xff]  ;;  %v7212_v43 = vld [vmem:[#allocation15_spill] sm:$0xff]  ;;  %v7213_v10 = vld [vmem:[#allocation16_spill] sm:$0xff] }
 0xdd4   :  { %3182 = vmatpush1.msra.mxu0 %v6075_v39  ;;  %3253 = vmatpush1.msra.mxu1 %v6081_v45  ;;  %v7214_v39 = vld [vmem:[#allocation22_spill] sm:$0xff] }
 0xdd5   :  { %3183 = vmatprep.subr.mxu0 %v6087_v5  ;;  %3254 = vmatprep.subr.mxu1 %v6093_v44  ;;  %v7215_v45 = vld [vmem:[#allocation10_spill] sm:$0xff]  ;;  %v7216_v5 = vld [vmem:[#allocation17_spill] sm:$0xff] }
 0xdd6   :  { %3184 = vmatpush1.msra.mxu0 %v6099_v58  ;;  %3255 = vmatpush1.msra.mxu1 %v6105_v12  ;;  %v7217_v44 = vld [vmem:[#allocation18_spill] sm:$0xff]  ;;  %v7218_v58 = vld [vmem:[#allocation23_spill] sm:$0xff] }
 0xdd7   :  { %3185 = vmatprep.subr.mxu0 %v6111_v36  ;;  %3256 = vmatprep.subr.mxu1 %v6117_v18  ;;  %v7219_v12 = vld [vmem:[#allocation11_spill] sm:$0xff] }
 0xdd8   :  { %3186 = vmatpush1.msra.mxu0 %v6123_v60  ;;  %3257 = vmatpush1.msra.mxu1 %v6129_v8  ;;  %v7220_v36 = vld [vmem:[#allocation7_spill] sm:$0xff]  ;;  %v7222_v60 = vld [vmem:[#allocation24_spill] sm:$0xff] }
 0xdd9   :  { %3187 = vmatprep.subr.mxu0 %v6135_v13  ;;  %3258 = vmatprep.subr.mxu1 %v6141_v17  ;;  %v7221_v18 = vld [vmem:[#allocation19_spill] sm:$0xff]  ;;  %v7223_v8 = vld [vmem:[#allocation12_spill] sm:$0xff]  ;;  %v7224_v13 = vld [vmem:[#allocation25_spill] sm:$0xff] }
 0xdda   :  { %3188 = vmatpush1.msra.mxu0 %v6147_v21  ;;  %3259 = vmatpush1.msra.mxu1 %v6153_v22  ;;  %v7225_v17 = vld [vmem:[#allocation8_spill] sm:$0xff]  ;;  %v7226_v21 = vld [vmem:[#allocation13_spill] sm:$0xff]  ;;  %v7227_v22 = vld [vmem:[#allocation27_spill] sm:$0xff] }
 0xddb   :  { %3189 = vmatprep.subr.mxu0 %v6159_v9  ;;  %3260 = vmatprep.subr.mxu1 %v6165_v14  ;;  %v7228_v9 = vld [vmem:[#allocation26_spill] sm:$0xff]  ;;  %v7229_v14 = vld [vmem:[#allocation28_spill] sm:$0xff] }
 0xddc   :  { %3190 = vmatpush1.msra.mxu0 %v7152_v42  ;;  %3261 = vmatpush1.msra.mxu1 %v7153_v27 }
 0xddd   :  { %3191 = vmatprep.subr.mxu0 %v7154_v28  ;;  %3262 = vmatprep.subr.mxu1 %v7155_v29  ;;  %v7234_v28 = vld [vmem:[#allocation51_spill] sm:$0xff] }
 0xdde   :  { %3192 = vmatpush1.msra.mxu0 %v6195_v19  ;;  %3263 = vmatpush1.msra.mxu1 %v6201_v11  ;;  %v7230_v19 = vmov 0.0   ;;  %v7231_v11 = vld [vmem:[#allocation6_spill] sm:$0xff]  ;;  %v1721_v29 = vadd.f32 %v7234_v28, %v7109_v38 }
 0xddf   :  { %3193 = vmatprep.subr.mxu0 %v6207_v47  ;;  %3264 = vmatprep.subr.mxu1 %v6213_v40  ;;  %v7232_v47 = vld [vmem:[#allocation52_spill] sm:$0xff]  ;;  %v7233_v40 = vld [vmem:[#allocation49_spill] sm:$0xff] }
 0xde0   :  { %3194 = vmatpush1.msra.mxu0 %v6310_v30  ;;  %3265 = vmatpush1.msra.mxu1 %v6316_v31  ;;  %v1719_v42 = vadd.f32 %v7233_v40, %v7232_v47  ;;  %v1725_v0 = vadd.f32 %v7237_v1, %v7232_v47 }
 0xde1   :  { %3195 = vmatprep.subr.mxu0 %v6322_v32  ;;  %3266 = vmatprep.subr.mxu1 %v6328_v33 }
 0xde2   :  { %3196 = vmatpush1.msra.mxu0 %v6334_v34  ;;  %3267 = vmatpush1.msra.mxu1 %v6340_v35 }
 0xde3   :  { %3197 = vmatprep.subr.mxu0 %v6346_v16  ;;  %3268 = vmatprep.subr.mxu1 %v6352_v46  ;;  %v7235_v46 = vld [vmem:[#allocation53_spill] sm:$0xff] }
 0xde4   :  { %3198 = vmatpush1.msra.mxu0 %v6358_v7  ;;  %3269 = vmatpush1.msra.mxu1 %v6364_v61  ;;  %v1834_v7 = vadd.f32 %v7235_v46, %v5871_v37 }
 0xde5   :  { %3199 = vmatprep.subr.mxu0 %v6370_v20  ;;  %3270 = vmatprep.subr.mxu1 %v6376_v51  ;;  %v7236_v20 = vld [vmem:[#allocation50_spill] sm:$0xff] }
 0xde6   :  { %3200 = vmatpush1.msra.mxu0 %v6382_v53  ;;  %3271 = vmatpush1.msra.mxu1 %v7210_v49  ;;  %v1832_v51 = vadd.f32 %v7236_v20, %v5874_v2  ;;  %v7238_v49 = vld [vmem:[#allocation57_spill] sm:$0xff] }
 0xde7   :  { %3201 = vmatprep.subr.mxu0 %v7211_v41  ;;  %3272 = vmatprep.subr.mxu1 %v7212_v43  ;;  %v1727_v41 = vadd.f32 %v7238_v49, %v7109_v38 }
 0xde8   :  { %3202 = vmatpush1.msra.mxu0 %v7213_v10  ;;  %3273 = vmatpush1.msra.mxu1 %v7214_v39 }
 0xde9   :  { %3203 = vmatprep.subr.mxu0 %v7215_v45  ;;  %3274 = vmatprep.subr.mxu1 %v7216_v5 }
 0xdea   :  { %3204 = vmatpush1.msra.mxu0 %v7217_v44  ;;  %3275 = vmatpush1.msra.mxu1 %v7218_v58  ;;  %v7239_v58 = vld [vmem:[#allocation58_spill] sm:$0xff] }
 0xdeb   :  { %3205 = vmatprep.subr.mxu0 %v7219_v12  ;;  %3276 = vmatprep.subr.mxu1 %v7220_v36  ;;  %v1840_v12 = vadd.f32 %v7239_v58, %v5871_v37 }
 0xdec   :  { %3206 = vmatpush1.msra.mxu0 %v7221_v18  ;;  %3277 = vmatpush1.msra.mxu1 %v7222_v60  ;;  %v7240_v18 = vld [vmem:[#allocation56_spill] sm:$0xff] }
 0xded   :  { %3207 = vmatprep.subr.mxu0 %v7223_v8  ;;  %3278 = vmatprep.subr.mxu1 %v7224_v13  ;;  %v1838_v60 = vadd.f32 %v7240_v18, %v5874_v2 }
 0xdee   :  { %3208 = vmatpush1.msra.mxu0 %v7225_v17  ;;  %3279 = vmatpush1.msra.mxu1 %v7226_v21 }
 0xdef   :  { %3209 = vmatprep.subr.mxu0 %v7227_v22  ;;  %3280 = vmatprep.subr.mxu1 %v7228_v9 }
 0xdf0   :  { %3210 = vmatpush1.msra.mxu0 %v7229_v14  ;;  %3243 = vmatprep.mubr.f32.mxu0 %v7230_v19 }
 0xdf1   :  { %3281 = vmatpush1.msra.mxu1 %v7231_v11  ;;  %3314 = vmatprep.mubr.f32.mxu1 %v7230_v19 }
 0xe91   :  { %v3069_v27 = vpop.f32.mrf.mxu0  ;;  %v3140_v34 = vpop.f32.mrf.mxu1 }
 0xe92   :  { %v3145_v30 = vadd.f32 %v3069_v27, %v1719_v42  ;;  %v3147_v53 = vadd.f32 %v3140_v34, %v1832_v51 }
 0xe93   :  { %v3071_v31 = vpop.f32.mrf.mxu0  ;;  %v3142_v16 = vpop.f32.mrf.mxu1 }
 0xe94   :  { %v3515_v32 = vmul.f32 -1.442695, %v3145_v30  ;;  %v3146_v33 = vadd.f32 %v3071_v31, %v1721_v29  ;;  %v3148_v61 = vadd.f32 %v3142_v16, %v1834_v7 }
 0xe96   :  { %3753 = vpow2.f32 %v3515_v32  ;;  %v3516_v35 = vmul.f32 -1.442695, %v3146_v33  ;;  %v3517_v57 = vmul.f32 -1.442695, %v3148_v61 }
 0xe98   :  { %3755 = vpow2.f32 %v3516_v35 }
 0xe99   :  { %3757 = vtanh.f32 %v3147_v53 }
 0xe9a   :  { %3759 = vpow2.f32 %v3517_v57 }
 0xea3   :  { %v3754_v50 = vpop.eup %3753 }
 0xea4   :  { %v3152_v23 = vadd.f32 1.0, %v3754_v50 }
 0xea5   :  { %v3756_v56 = vpop.eup %3755 }
 0xea6   :  { %3761 = vrcp.f32 %v3152_v23  ;;  %v3158_v6 = vadd.f32 1.0, %v3756_v56  ;;  %v3758_v3 = vpop.eup %3757 }
 0xea7   :  { %v3760_v15 = vpop.eup %3759 }
 0xea8   :  { %3763 = vrcp.f32 %v3158_v6  ;;  %v3165_v63 = vadd.f32 1.0, %v3760_v15 }
 0xeaa   :  { %3765 = vrcp.f32 %v3165_v63 }
 0xeb3   :  { %v3762_v52 = vpop.eup %3761 }
 0xeb4   :  { %v3169_v59 = vmul.f32 %v3762_v52, %v3758_v3 }
 0xeb5   :  { %v3764_v26 = vpop.eup %3763 }
 0xeb6   :  { %v3168_v54 = vmul.f32 %v3764_v26, %v6605_v48 }
 0xeb7   :  { %v3766_v24 = vpop.eup %3765 }
 0xeb8   :  { %v3170_v62 = vadd.f32 %v3169_v59, %v3168_v54 }
 0xeba   :  { %3767 = vtanh.f32 %v3170_v62 }
 0xec7   :  { %v3768_v55 = vpop.eup %3767 }
 0xec8   :  { %v3172_v4 = vmul.f32 %v3768_v55, %v3766_v24 }
 0xeca   :  { %3518 = vst [vmem:[%s6710_s6 + $0x30] sm:$0xff] %v3172_v4  ;;  %3244 = vmatmul.mubr.f32.vlgmr.msra.gmra.mxu0 %v3172_v4  ;;  %3315 = vmatmul.mubr.f32.vlgmr.msra.gmra.mxu1 %v3172_v4 }
 0xf8a   :  { %v3245_v25 = vpop.f32.mrf.mxu0  ;;  %v3316_v45 = vpop.f32.mrf.mxu1 }
 0xf8b   :  { %v3321_v48 = vadd.f32 %v3245_v25, %v1725_v0  ;;  %v3323_v8 = vadd.f32 %v3316_v45, %v1838_v60 }
 0xf8c   :  { %v3247_v43 = vpop.f32.mrf.mxu0  ;;  %v3318_v44 = vpop.f32.mrf.mxu1 }
 0xf8d   :  { %v3519_v10 = vmul.f32 -1.442695, %v3321_v48  ;;  %v3322_v39 = vadd.f32 %v3247_v43, %v1727_v41  ;;  %v3324_v36 = vadd.f32 %v3318_v44, %v1840_v12 }
 0xf8f   :  { %3769 = vpow2.f32 %v3519_v10  ;;  %v3520_v5 = vmul.f32 -1.442695, %v3322_v39  ;;  %v3521_v13 = vmul.f32 -1.442695, %v3324_v36 }
 0xf91   :  { %3771 = vpow2.f32 %v3520_v5 }
 0xf92   :  { %3773 = vtanh.f32 %v3323_v8 }
 0xf93   :  { %3775 = vpow2.f32 %v3521_v13 }
 0xf9c   :  { %v3770_v17 = vpop.eup %3769 }
 0xf9d   :  { %v3328_v38 = vadd.f32 1.0, %v3770_v17 }
 0xf9e   :  { %v3772_v21 = vpop.eup %3771 }
 0xf9f   :  { %3777 = vrcp.f32 %v3328_v38  ;;  %v3334_v22 = vadd.f32 1.0, %v3772_v21  ;;  %v3774_v9 = vpop.eup %3773 }
 0xfa0   :  { %v3776_v14 = vpop.eup %3775 }
 0xfa1   :  { %3779 = vrcp.f32 %v3334_v22  ;;  %v3341_v37 = vadd.f32 1.0, %v3776_v14 }
 0xfa3   :  { %3781 = vrcp.f32 %v3341_v37 }
 0xfac   :  { %v3778_v19 = vpop.eup %3777 }
 0xfad   :  { %v3345_v11 = vmul.f32 %v3778_v19, %v3774_v9 }
 0xfae   :  { %v3780_v47 = vpop.eup %3779 }
 0xfaf   :  { %v3344_v40 = vmul.f32 %v3780_v47, %v3170_v62 }
 0xfb0   :  { %v3782_v2 = vpop.eup %3781 }
 0xfb1   :  { %v3346_v42 = vadd.f32 %v3345_v11, %v3344_v40 }
 0xfb3   :  { %3783 = vtanh.f32 %v3346_v42  ;;  %3524 = vst [vmem:[%s6712_s8 + $0x8] sm:$0xff] %v3346_v42 }
 0xfc0   :  { %v3784_v27 = vpop.eup %3783 }
 0xfc1   :  { %v3348_v28 = vmul.f32 %v3784_v27, %v3782_v2 }
 0xfc3   :  { %3522 = vst [vmem:[%s6710_s6 + $0x38] sm:$0xff] %v3348_v28  ;;  %3523 = vst [vmem:[%s6711_s7 + $0x8] sm:$0xff] %v3348_v28 }
 0xfc4   :  { %3366 = vsyncpa [#allocation3], 1 }

</bundles_post_ra>
